<compile_context>
chip_gen: v5e
topology: v5e:2x2
jax: 0.10.0
libtpu: 0.0.40
codegen_flags: <defaults>
</compile_context>

<pallas_src>
import functools

import jax
import jax.numpy as jnp
import numpy as np
from jax import lax
from jax.experimental import pallas as pl
from jax.experimental.pallas import tpu as pltpu

LANE = 128


def _cdiv(a, b):
    return -(-a // b)


def _round_up(a, b):
    return _cdiv(a, b) * b


def _fit_time(x, length):
    """Pad (zeros) or truncate the last axis of x to `length`."""
    cur = x.shape[-1]
    if cur < length:
        return jnp.pad(x, ((0, 0), (0, 0), (0, length - cur)))
    if cur > length:
        return x[:, :, :length]
    return x


def _pick_t_tile(t_out, channels, kernel_size, max_tile):
    """Largest 128-multiple time tile that (a) does not overshoot the valid
    length by more than one tile and (b) keeps the in-kernel K*C x tT patch
    buffer (plus working copies) within a few MiB of VMEM."""
    per_col_bytes = 2 * (kernel_size + 4) * max(channels, 8)     # bf16 temps
    vmem_cap = max(LANE, ((6 * 1024 * 1024) // per_col_bytes) // LANE * LANE)
    tile = min(max_tile, vmem_cap, _round_up(max(t_out, 1), LANE))
    return max(LANE, tile)


# ----------------------------------------------------------------------------
# Pallas kernels
# ----------------------------------------------------------------------------

def _ds_conv_kernel(xe_ref, xen_ref, xo_ref, xon_ref, w_ref, b_ref, o_ref,
                    *, ke, ko, t_tile, t_valid):
    """Strided (stride=2) grouped Conv1d for one (batch, time-tile) grid step.

    The stride-2 conv is expressed on even/odd input phases so every in-kernel
    slice is a stride-1, statically-offset lane slice, and the whole conv is a
    single MXU matmul against a prepacked (Cout, (ke+ko)*Cin) weight.

    xe_ref/xo_ref:   (1, Cin, tT)   current even/odd phase tiles (bf16)
    xen_ref/xon_ref: (1, Cin, 128)  right halo of each phase (bf16)
    w_ref: (Cout, (ke+ko)*Cin) bf16, columns ordered (even taps, then odd
           taps; within a tap: channel)
    b_ref: (Cout, 1) f32 bias
    o_ref: (1, Cout, tT) bf16
    """
    j = pl.program_id(1)

    xe = jnp.concatenate([xe_ref[0], xen_ref[0]], axis=-1)   # (Cin, tT + 128)
    xo = jnp.concatenate([xo_ref[0], xon_ref[0]], axis=-1)

    parts = [xe[:, m:m + t_tile] for m in range(ke)]
    parts += [xo[:, m:m + t_tile] for m in range(ko)]
    patches = jnp.concatenate(parts, axis=0)                 # ((ke+ko)*Cin, tT)

    acc = jnp.dot(w_ref[...], patches,
                  preferred_element_type=jnp.float32) + b_ref[...]

    # Keep the "zeros beyond the valid length" storage invariant.
    col = j * t_tile + lax.broadcasted_iota(jnp.int32, acc.shape, 1)
    acc = jnp.where(col < t_valid, acc, 0.0)
    o_ref[0] = acc.astype(o_ref.dtype)


def _tds_block_kernel(xp_ref, xc_ref, xn_ref, wc_ref, bc_ref, w1_ref, b1_ref,
                      w2_ref, b2_ref, rw_ref, o_ref,
                      *, kernel_size, t_tile, t_valid, n_tiles):
    """Fused TDSBlock for one (batch, time-tile) grid step.

    y = x + rw * relu(conv_K(x))                 (grouped 'same' conv)
    z = y + rw * (W2 @ relu(W1 @ y + b1) + b2)   (1x1-conv fc branch)
    Dropouts are identity (eval mode).

    xp_ref/xn_ref: (1, C, 128) left/right halo tiles of x (bf16)
    xc_ref:        (1, C, tT)  current x tile (bf16)
    wc_ref: (C, K*C) bf16 densified grouped-conv weight, column order (k, c)
    w1/w2:  (C, C) bf16 1x1-conv weights; bc/b1/b2: (C, 1) f32 biases
    rw_ref: (1,) f32 resweight in SMEM
    """
    j = pl.program_id(1)
    pad = kernel_size // 2

    xc = xc_ref[0]                                            # (C, tT) bf16
    # Halo tiles; zero them at the sequence boundaries (= conv zero padding).
    xp = jnp.where(j == 0, jnp.zeros_like(xp_ref[0]), xp_ref[0])
    xn = jnp.where(j == n_tiles - 1, jnp.zeros_like(xn_ref[0]), xn_ref[0])
    win = jnp.concatenate([xp, xc, xn], axis=-1)              # (C, tT + 256)

    # In-VMEM im2col: K statically-offset shifted views stacked on sublanes.
    patches = jnp.concatenate(
        [win[:, LANE - pad + k: LANE - pad + k + t_tile]
         for k in range(kernel_size)], axis=0)                # (K*C, tT) bf16

    rw = rw_ref[0]                                            # f32 scalar (SMEM)
    conv = jnp.dot(wc_ref[...], patches,
                   preferred_element_type=jnp.float32) + bc_ref[...]
    y = xc.astype(jnp.float32) + rw * jnp.maximum(conv, 0.0)

    h = jnp.maximum(
        jnp.dot(w1_ref[...], y.astype(xc.dtype),
                preferred_element_type=jnp.float32) + b1_ref[...], 0.0)
    fc = jnp.dot(w2_ref[...], h.astype(xc.dtype),
                 preferred_element_type=jnp.float32) + b2_ref[...]
    out = y + rw * fc

    col = j * t_tile + lax.broadcasted_iota(jnp.int32, out.shape, 1)
    out = jnp.where(col < t_valid, out, 0.0)
    o_ref[0] = out.astype(o_ref.dtype)


# ----------------------------------------------------------------------------
# pallas_call wrappers
# ----------------------------------------------------------------------------

_CPARAMS = pltpu.CompilerParams(
    dimension_semantics=("parallel", "parallel"),
    vmem_limit_bytes=32 * 1024 * 1024)


def _ds_conv(x_st, t_in, w, bias, kernel_size, t_tile):
    """Downsampling grouped conv (stride 2, no padding) over stored activations.

    x_st: (B, Cin, Lin) bf16, valid columns [0, t_in), exact zeros beyond.
    Returns (y_st, t_out) with y_st (B, Cout, nT*t_tile) bf16, same invariant.
    """
    B, Cin, _ = x_st.shape
    Cout = w.shape[0]
    ke = (kernel_size + 1) // 2
    ko = kernel_size // 2
    t_out = (t_in - kernel_size) // 2 + 1
    n_t = max(1, _cdiv(t_out, t_tile))
    r = t_tile // LANE
    le = (n_t + 1) * t_tile                     # current tiles + halo room
    xe = _fit_time(x_st[:, :, 0::2], le)
    xo = _fit_time(x_st[:, :, 1::2], le)

    kern = functools.partial(_ds_conv_kernel, ke=ke, ko=ko,
                             t_tile=t_tile, t_valid=t_out)
    out = pl.pallas_call(
        kern,
        out_shape=jax.ShapeDtypeStruct((B, Cout, n_t * t_tile), jnp.bfloat16),
        grid=(B, n_t),
        in_specs=[
            pl.BlockSpec((1, Cin, t_tile), lambda b, j: (b, 0, j)),
            pl.BlockSpec((1, Cin, LANE), lambda b, j: (b, 0, (j + 1) * r)),
            pl.BlockSpec((1, Cin, t_tile), lambda b, j: (b, 0, j)),
            pl.BlockSpec((1, Cin, LANE), lambda b, j: (b, 0, (j + 1) * r)),
            pl.BlockSpec(w.shape, lambda b, j: (0, 0)),
            pl.BlockSpec((Cout, 1), lambda b, j: (0, 0)),
        ],
        out_specs=pl.BlockSpec((1, Cout, t_tile), lambda b, j: (b, 0, j)),
        compiler_params=_CPARAMS,
    )(xe, xe, xo, xo, w, bias)
    return out, t_out


def _tds_block(x_st, t_valid, blk, kernel_size, t_tile):
    """One fused TDSBlock over the stored activation layout."""
    B, C, L = x_st.shape
    n_t = L // t_tile
    r = t_tile // LANE
    n128 = L // LANE
    kern = functools.partial(_tds_block_kernel, kernel_size=kernel_size,
                             t_tile=t_tile, t_valid=t_valid, n_tiles=n_t)
    return pl.pallas_call(
        kern,
        out_shape=jax.ShapeDtypeStruct((B, C, L), jnp.bfloat16),
        grid=(B, n_t),
        in_specs=[
            pl.BlockSpec((1, C, LANE),
                         lambda b, j: (b, 0, jnp.maximum(j * r - 1, 0))),
            pl.BlockSpec((1, C, t_tile), lambda b, j: (b, 0, j)),
            pl.BlockSpec((1, C, LANE),
                         lambda b, j: (b, 0, jnp.minimum((j + 1) * r, n128 - 1))),
            pl.BlockSpec(blk["conv_w"].shape, lambda b, j: (0, 0)),
            pl.BlockSpec((C, 1), lambda b, j: (0, 0)),
            pl.BlockSpec((C, C), lambda b, j: (0, 0)),
            pl.BlockSpec((C, 1), lambda b, j: (0, 0)),
            pl.BlockSpec((C, C), lambda b, j: (0, 0)),
            pl.BlockSpec((C, 1), lambda b, j: (0, 0)),
            pl.BlockSpec(memory_space=pltpu.MemorySpace.SMEM),
        ],
        out_specs=pl.BlockSpec((1, C, t_tile), lambda b, j: (b, 0, j)),
        compiler_params=_CPARAMS,
    )(x_st, x_st, x_st, blk["conv_w"], blk["conv_b"], blk["fc1_w"],
      blk["fc1_b"], blk["fc2_w"], blk["fc2_b"], blk["resweight"])


def tds_forward_pallas(x, prep, kernel_size, max_tile=512):
    """Full TDS forward. x: (B, feat, T) f32 -> (B, sizes[-1], T_out) f32."""
    assert kernel_size // 2 <= LANE
    x_st = x.astype(jnp.bfloat16)
    t_valid = x.shape[-1]
    for stage in prep:
        cout = stage["ds_b"].shape[0]
        t_out = (t_valid - kernel_size) // 2 + 1
        t_tile = _pick_t_tile(t_out, cout, kernel_size, max_tile)
        x_st, t_valid = _ds_conv(x_st, t_valid, stage["ds_w"], stage["ds_b"],
                                 kernel_size, t_tile)
        for blk in stage["blocks"]:
            x_st = _tds_block(x_st, t_valid, blk, kernel_size, t_tile)
    return x_st[:, :, :t_valid].astype(jnp.float32)


# ----------------------------------------------------------------------------
# One-time weight preparation (densify grouped convs, repack taps, cast bf16)
# ----------------------------------------------------------------------------

def _grouped_to_dense(w, groups):
    """PyTorch grouped conv weight (Cout, Cin/groups, K) -> dense (Cout, Cin, K)."""
    co, cin_g, k = w.shape
    co_g = co // groups
    wd = jnp.zeros((co, cin_g * groups, k), w.dtype)
    for g in range(groups):
        wd = wd.at[g * co_g:(g + 1) * co_g,
                   g * cin_g:(g + 1) * cin_g, :].set(w[g * co_g:(g + 1) * co_g])
    return wd


def prepare_params(params, groups, kernel_size):
    prep = []
    for stage in params:
        dsd = _grouped_to_dense(stage["ds_w"], groups)        # (Cout, Cin, K)
        co, cin, k = dsd.shape
        ke = (k + 1) // 2
        ko = k // 2
        # Even/odd phase weights packed as (Cout, (ke+ko)*Cin); within each
        # phase block column order is (tap m, channel c), matching the
        # in-kernel patch concatenation order.
        we = jnp.transpose(dsd[:, :, 0::2], (0, 2, 1)).reshape(co, ke * cin)
        wo = jnp.transpose(dsd[:, :, 1::2], (0, 2, 1)).reshape(co, ko * cin)
        pstage = {
            "ds_w": jnp.concatenate([we, wo], axis=1).astype(jnp.bfloat16),
            "ds_b": stage["ds_b"].reshape(co, 1).astype(jnp.float32),
            "blocks": [],
        }
        for blk in stage["blocks"]:
            cd = _grouped_to_dense(blk["conv_w"], groups)     # (C, C, K)
            c = cd.shape[0]
            pstage["blocks"].append({
                # (C, K*C), column order (tap k, channel c) to match the
                # in-kernel patch stacking order.
                "conv_w": jnp.transpose(cd, (0, 2, 1)).reshape(
                    c, kernel_size * c).astype(jnp.bfloat16),
                "conv_b": blk["conv_b"].reshape(c, 1).astype(jnp.float32),
                "fc1_w": blk["fc1_w"][:, :, 0].astype(jnp.bfloat16),
                "fc1_b": blk["fc1_b"].reshape(c, 1).astype(jnp.float32),
                "fc2_w": blk["fc2_w"][:, :, 0].astype(jnp.bfloat16),
                "fc2_b": blk["fc2_b"].reshape(c, 1).astype(jnp.float32),
                "resweight": blk["resweight"].astype(jnp.float32),
            })
        prep.append(pstage)
    return prep


# ----------------------------------------------------------------------------
# Pure-JAX reference (mirrors the kernel's bf16-operand / f32-accum points)
# ----------------------------------------------------------------------------

def _ref_conv1d(x, w, b, stride, pad, groups):
    y = lax.conv_general_dilated(
        x, w, window_strides=(stride,), padding=[(pad, pad)],
        dimension_numbers=("NCH", "OIH", "NCH"),
        feature_group_count=groups,
        preferred_element_type=jnp.float32)
    return y + b[None, :, None]


def tds_forward_ref(x, params, groups, kernel_size):
    bf = jnp.bfloat16
    x = x.astype(bf)
    for stage in params:
        x = _ref_conv1d(x, stage["ds_w"].astype(bf), stage["ds_b"],
                        2, 0, groups).astype(bf)
        for blk in stage["blocks"]:
            rw = blk["resweight"][0]
            conv = _ref_conv1d(x, blk["conv_w"].astype(bf), blk["conv_b"],
                               1, kernel_size // 2, groups)
            y = x.astype(jnp.float32) + rw * jax.nn.relu(conv)
            h = jax.nn.relu(
                jnp.einsum("oc,bct->bot", blk["fc1_w"][:, :, 0].astype(bf),
                           y.astype(bf), preferred_element_type=jnp.float32)
                + blk["fc1_b"][None, :, None])
            fc = (jnp.einsum("oc,bct->bot", blk["fc2_w"][:, :, 0].astype(bf),
                             h.astype(bf), preferred_element_type=jnp.float32)
                  + blk["fc2_b"][None, :, None])
            x = (y + rw * fc).astype(bf)
    return x.astype(jnp.float32)


# ----------------------------------------------------------------------------
# Deterministic parameter init (shapes from the PyTorch __init__)
# ----------------------------------------------------------------------------

def init_params(key, input_size, sizes, depths, kernel_size):
    params = []
    for i in range(1, len(sizes)):
        cin, cout = sizes[i - 1], sizes[i]
        key, k0, k1 = jax.random.split(key, 3)
        stage = {
            "ds_w": 0.1 * jax.random.normal(
                k0, (cout, cin // input_size, kernel_size), jnp.float32),
            "ds_b": 0.1 * jax.random.normal(k1, (cout,), jnp.float32),
            "blocks": [],
        }
        for _ in range(depths[i - 1]):
            key, *kb = jax.random.split(key, 8)
            h = cout
            stage["blocks"].append({
                "conv_w": 0.1 * jax.random.normal(
                    kb[0], (h, h // input_size, kernel_size), jnp.float32),
                "conv_b": 0.1 * jax.random.normal(kb[1], (h,), jnp.float32),
                "fc1_w": 0.1 * jax.random.normal(kb[2], (h, h, 1), jnp.float32),
                "fc1_b": 0.1 * jax.random.normal(kb[3], (h,), jnp.float32),
                "fc2_w": 0.1 * jax.random.normal(kb[4], (h, h, 1), jnp.float32),
                "fc2_b": 0.1 * jax.random.normal(kb[5], (h,), jnp.float32),
                # PyTorch init is 0.0; randomize so the residual path is tested.
                "resweight": 0.5 * jax.random.normal(kb[6], (1,), jnp.float32),
            })
        params.append(stage)
    return params


if __name__ == "__main__":
    # Small config consistent with TDS(input_size, sizes, depths, kernel_size).
    input_size = 4                 # conv groups
    sizes = (4, 32, 32)            # sizes[0] = input feature channels
    depths = (1, 1)
    K = 5
    B, T = 2, 1100                 # T chosen so stage 1 spans 2 time tiles (tT=512)

    key = jax.random.PRNGKey(0)
    kx, kp = jax.random.split(key)
    x = jax.random.normal(kx, (B, sizes[0], T), jnp.float32)  # (batch, feat, time)
    params = init_params(kp, input_size, sizes, depths, K)
    prep = prepare_params(params, input_size, K)              # weight prep: once

    fwd = jax.jit(functools.partial(tds_forward_pallas, kernel_size=K))
    out = jax.block_until_ready(fwd(x, prep))

    ref = tds_forward_ref(x, params, input_size, K)
    assert out.shape == ref.shape, (out.shape, ref.shape)
    # bf16 matmul operands (f32 accumulation) => a few-1e-3 level differences.
    np.testing.assert_allclose(np.asarray(out), np.asarray(ref),
                               atol=2e-2, rtol=2e-2)
    # TODO(synk): nn.Dropout layers are identity (eval-mode semantics).
    print("KERNEL_OK")
</pallas_src>

<mosaic_0001>
module attributes {stable_mosaic.version = 11 : i64} {
  func.func @_ds_conv_kernel(%arg0: i32, %arg1: i32, %arg2: memref<1x4x512xbf16, #tpu.memory_space<vmem>>, %arg3: memref<1x4x128xbf16, #tpu.memory_space<vmem>>, %arg4: memref<1x4x512xbf16, #tpu.memory_space<vmem>>, %arg5: memref<1x4x128xbf16, #tpu.memory_space<vmem>>, %arg6: memref<32x20xbf16, #tpu.memory_space<vmem>>, %arg7: memref<32x1xf32, #tpu.memory_space<vmem>>, %arg8: memref<1x32x512xbf16, #tpu.memory_space<vmem>>) attributes {dimension_semantics = [#tpu.dimension_semantics<parallel>, #tpu.dimension_semantics<parallel>], iteration_bounds = array<i64: 2, 2>, scalar_prefetch = 0 : i64, scratch_operands = 0 : i64, tpu.core_type = #tpu.core_type<tc>, window_params = [{transform_indices = @transform_0, window_bounds = array<i64: 1, 4, 512>}, {transform_indices = @transform_1, window_bounds = array<i64: 1, 4, 128>}, {transform_indices = @transform_2, window_bounds = array<i64: 1, 4, 512>}, {transform_indices = @transform_3, window_bounds = array<i64: 1, 4, 128>}, {pipeline_mode = #tpu.pipeline_mode<synchronous>, transform_indices = @transform_4, window_bounds = array<i64: 32, 20>}, {pipeline_mode = #tpu.pipeline_mode<synchronous>, transform_indices = @transform_5, window_bounds = array<i64: 32, 1>}, {transform_indices = @transform_6, window_bounds = array<i64: 1, 32, 512>}]} {
    %c0 = arith.constant 0 : index
    %c0_0 = arith.constant 0 : index
    %c0_1 = arith.constant 0 : index
    %0 = vector.load %arg2[%c0, %c0_0, %c0_1] : memref<1x4x512xbf16, #tpu.memory_space<vmem>>, vector<1x4x512xbf16>
    %1 = vector.shape_cast %0 : vector<1x4x512xbf16> to vector<4x512xbf16>
    %c0_2 = arith.constant 0 : index
    %c0_3 = arith.constant 0 : index
    %c0_4 = arith.constant 0 : index
    %2 = vector.load %arg3[%c0_2, %c0_3, %c0_4] : memref<1x4x128xbf16, #tpu.memory_space<vmem>>, vector<1x4x128xbf16>
    %3 = vector.shape_cast %2 : vector<1x4x128xbf16> to vector<4x128xbf16>
    %4 = tpu.concatenate %1, %3 in 1 : vector<4x512xbf16>, vector<4x128xbf16> -> vector<4x640xbf16>
    %c0_5 = arith.constant 0 : index
    %c0_6 = arith.constant 0 : index
    %c0_7 = arith.constant 0 : index
    %5 = vector.load %arg4[%c0_5, %c0_6, %c0_7] : memref<1x4x512xbf16, #tpu.memory_space<vmem>>, vector<1x4x512xbf16>
    %6 = vector.shape_cast %5 : vector<1x4x512xbf16> to vector<4x512xbf16>
    %c0_8 = arith.constant 0 : index
    %c0_9 = arith.constant 0 : index
    %c0_10 = arith.constant 0 : index
    %7 = vector.load %arg5[%c0_8, %c0_9, %c0_10] : memref<1x4x128xbf16, #tpu.memory_space<vmem>>, vector<1x4x128xbf16>
    %8 = vector.shape_cast %7 : vector<1x4x128xbf16> to vector<4x128xbf16>
    %9 = tpu.concatenate %6, %8 in 1 : vector<4x512xbf16>, vector<4x128xbf16> -> vector<4x640xbf16>
    %10 = vector.extract_strided_slice %4 {offsets = [0, 0], sizes = [4, 512], strides = [1, 1]} : vector<4x640xbf16> to vector<4x512xbf16>
    %11 = vector.extract_strided_slice %4 {offsets = [0, 1], sizes = [4, 512], strides = [1, 1]} : vector<4x640xbf16> to vector<4x512xbf16>
    %12 = vector.extract_strided_slice %4 {offsets = [0, 2], sizes = [4, 512], strides = [1, 1]} : vector<4x640xbf16> to vector<4x512xbf16>
    %13 = vector.extract_strided_slice %9 {offsets = [0, 0], sizes = [4, 512], strides = [1, 1]} : vector<4x640xbf16> to vector<4x512xbf16>
    %14 = vector.extract_strided_slice %9 {offsets = [0, 1], sizes = [4, 512], strides = [1, 1]} : vector<4x640xbf16> to vector<4x512xbf16>
    %15 = tpu.concatenate %10, %11, %12, %13, %14 in 0 : vector<4x512xbf16>, vector<4x512xbf16>, vector<4x512xbf16>, vector<4x512xbf16>, vector<4x512xbf16> -> vector<20x512xbf16>
    %c0_11 = arith.constant 0 : index
    %c0_12 = arith.constant 0 : index
    %16 = vector.load %arg6[%c0_11, %c0_12] : memref<32x20xbf16, #tpu.memory_space<vmem>>, vector<32x20xbf16>
    %cst = arith.constant dense<0.000000e+00> : vector<32x512xf32>
    %17 = tpu.matmul %16, %15, %cst {dimension_numbers = #tpu.dot_dimension_numbers<[1], [0], [0], [1], [0, 0, 1, 1], [], []>} : vector<32x20xbf16>, vector<20x512xbf16>, vector<32x512xf32> -> vector<32x512xf32>
    %c0_13 = arith.constant 0 : index
    %c0_14 = arith.constant 0 : index
    %18 = vector.load %arg7[%c0_13, %c0_14] : memref<32x1xf32, #tpu.memory_space<vmem>>, vector<32x1xf32>
    %19 = vector.broadcast %18 : vector<32x1xf32> to vector<32x512xf32>
    %20 = arith.addf %17, %19 : vector<32x512xf32>
    %c512_i32 = arith.constant 512 : i32
    %21 = arith.muli %arg1, %c512_i32 : i32
    %22 = tpu.iota {dimensions = array<i32: 1>} : vector<32x512xi32>
    %23 = vector.broadcast %21 : i32 to vector<32x512xi32>
    %24 = arith.addi %23, %22 : vector<32x512xi32>
    %c548_i32 = arith.constant 548 : i32
    %25 = vector.broadcast %c548_i32 : i32 to vector<32x512xi32>
    %26 = arith.cmpi slt, %24, %25 : vector<32x512xi32>
    %cst_15 = arith.constant 0.000000e+00 : f32
    %27 = vector.broadcast %cst_15 : f32 to vector<32x512xf32>
    %28 = arith.select %26, %20, %27 : vector<32x512xi1>, vector<32x512xf32>
    %29 = arith.truncf %28 : vector<32x512xf32> to vector<32x512xbf16>
    %c0_16 = arith.constant 0 : index
    %c0_17 = arith.constant 0 : index
    %c0_18 = arith.constant 0 : index
    %30 = vector.load %arg8[%c0_16, %c0_17, %c0_18] : memref<1x32x512xbf16, #tpu.memory_space<vmem>>, vector<1x32x512xbf16>
    %31 = vector.shape_cast %30 : vector<1x32x512xbf16> to vector<32x512xbf16>
    %32 = vector.shape_cast %29 : vector<32x512xbf16> to vector<1x32x512xbf16>
    tpu.vector_store %arg8[%c0_16, %c0_17, %c0_18], %32 {strides = array<i32>} : memref<1x32x512xbf16, #tpu.memory_space<vmem>>, vector<1x32x512xbf16>,
    return
  }
  func.func @transform_0(%arg0: i32, %arg1: i32) -> (i32, i32, i32) {
    %c0_i32 = arith.constant 0 : i32
    %c0_i32_0 = arith.constant 0 : i32
    return %arg0, %c0_i32, %arg1 : i32, i32, i32
  }
  func.func @transform_1(%arg0: i32, %arg1: i32) -> (i32, i32, i32) {
    %c1_i32 = arith.constant 1 : i32
    %0 = arith.addi %arg1, %c1_i32 : i32
    %c4_i32 = arith.constant 4 : i32
    %1 = arith.muli %0, %c4_i32 : i32
    %c0_i32 = arith.constant 0 : i32
    %c0_i32_0 = arith.constant 0 : i32
    return %arg0, %c0_i32, %1 : i32, i32, i32
  }
  func.func @transform_2(%arg0: i32, %arg1: i32) -> (i32, i32, i32) {
    %c0_i32 = arith.constant 0 : i32
    %c0_i32_0 = arith.constant 0 : i32
    return %arg0, %c0_i32, %arg1 : i32, i32, i32
  }
  func.func @transform_3(%arg0: i32, %arg1: i32) -> (i32, i32, i32) {
    %c1_i32 = arith.constant 1 : i32
    %0 = arith.addi %arg1, %c1_i32 : i32
    %c4_i32 = arith.constant 4 : i32
    %1 = arith.muli %0, %c4_i32 : i32
    %c0_i32 = arith.constant 0 : i32
    %c0_i32_0 = arith.constant 0 : i32
    return %arg0, %c0_i32, %1 : i32, i32, i32
  }
  func.func @transform_4(%arg0: i32, %arg1: i32) -> (i32, i32) {
    %c0_i32 = arith.constant 0 : i32
    %c0_i32_0 = arith.constant 0 : i32
    %c0_i32_1 = arith.constant 0 : i32
    return %c0_i32, %c0_i32_0 : i32, i32
  }
  func.func @transform_5(%arg0: i32, %arg1: i32) -> (i32, i32) {
    %c0_i32 = arith.constant 0 : i32
    %c0_i32_0 = arith.constant 0 : i32
    %c0_i32_1 = arith.constant 0 : i32
    return %c0_i32, %c0_i32_0 : i32, i32
  }
  func.func @transform_6(%arg0: i32, %arg1: i32) -> (i32, i32, i32) {
    %c0_i32 = arith.constant 0 : i32
    %c0_i32_0 = arith.constant 0 : i32
    return %arg0, %c0_i32, %arg1 : i32, i32, i32
  }
}

module attributes {stable_mosaic.version = 11 : i64} {
  func.func @_tds_block_kernel(%arg0: i32, %arg1: i32, %arg2: memref<1x32x128xbf16, #tpu.memory_space<vmem>>, %arg3: memref<1x32x512xbf16, #tpu.memory_space<vmem>>, %arg4: memref<1x32x128xbf16, #tpu.memory_space<vmem>>, %arg5: memref<32x160xbf16, #tpu.memory_space<vmem>>, %arg6: memref<32x1xf32, #tpu.memory_space<vmem>>, %arg7: memref<32x32xbf16, #tpu.memory_space<vmem>>, %arg8: memref<32x1xf32, #tpu.memory_space<vmem>>, %arg9: memref<32x32xbf16, #tpu.memory_space<vmem>>, %arg10: memref<32x1xf32, #tpu.memory_space<vmem>>, %arg11: memref<1xf32, #tpu.memory_space<smem>>, %arg12: memref<1x32x512xbf16, #tpu.memory_space<vmem>>) attributes {dimension_semantics = [#tpu.dimension_semantics<parallel>, #tpu.dimension_semantics<parallel>], iteration_bounds = array<i64: 2, 2>, scalar_prefetch = 0 : i64, scratch_operands = 0 : i64, tpu.core_type = #tpu.core_type<tc>, window_params = [{transform_indices = @transform_0, window_bounds = array<i64: 1, 32, 128>}, {transform_indices = @transform_1, window_bounds = array<i64: 1, 32, 512>}, {transform_indices = @transform_2, window_bounds = array<i64: 1, 32, 128>}, {pipeline_mode = #tpu.pipeline_mode<synchronous>, transform_indices = @transform_3, window_bounds = array<i64: 32, 160>}, {pipeline_mode = #tpu.pipeline_mode<synchronous>, transform_indices = @transform_4, window_bounds = array<i64: 32, 1>}, {pipeline_mode = #tpu.pipeline_mode<synchronous>, transform_indices = @transform_5, window_bounds = array<i64: 32, 32>}, {pipeline_mode = #tpu.pipeline_mode<synchronous>, transform_indices = @transform_6, window_bounds = array<i64: 32, 1>}, {pipeline_mode = #tpu.pipeline_mode<synchronous>, transform_indices = @transform_7, window_bounds = array<i64: 32, 32>}, {pipeline_mode = #tpu.pipeline_mode<synchronous>, transform_indices = @transform_8, window_bounds = array<i64: 32, 1>}, {transform_indices = @transform_9, window_bounds = array<i64: 1>}, {transform_indices = @transform_10, window_bounds = array<i64: 1, 32, 512>}]} {
    %c0 = arith.constant 0 : index
    %c0_0 = arith.constant 0 : index
    %c0_1 = arith.constant 0 : index
    %0 = vector.load %arg3[%c0, %c0_0, %c0_1] : memref<1x32x512xbf16, #tpu.memory_space<vmem>>, vector<1x32x512xbf16>
    %1 = vector.shape_cast %0 : vector<1x32x512xbf16> to vector<32x512xbf16>
    %c0_i32 = arith.constant 0 : i32
    %2 = arith.cmpi eq, %arg1, %c0_i32 : i32
    %cst = arith.constant 0.000000e+00 : bf16
    %3 = vector.broadcast %cst : bf16 to vector<32x128xbf16>
    %c0_2 = arith.constant 0 : index
    %c0_3 = arith.constant 0 : index
    %c0_4 = arith.constant 0 : index
    %4 = vector.load %arg2[%c0_2, %c0_3, %c0_4] : memref<1x32x128xbf16, #tpu.memory_space<vmem>>, vector<1x32x128xbf16>
    %5 = vector.shape_cast %4 : vector<1x32x128xbf16> to vector<32x128xbf16>
    %6 = arith.select %2, %3, %5 : vector<32x128xbf16>
    %c1_i32 = arith.constant 1 : i32
    %7 = arith.cmpi eq, %arg1, %c1_i32 : i32
    %cst_5 = arith.constant 0.000000e+00 : bf16
    %8 = vector.broadcast %cst_5 : bf16 to vector<32x128xbf16>
    %c0_6 = arith.constant 0 : index
    %c0_7 = arith.constant 0 : index
    %c0_8 = arith.constant 0 : index
    %9 = vector.load %arg4[%c0_6, %c0_7, %c0_8] : memref<1x32x128xbf16, #tpu.memory_space<vmem>>, vector<1x32x128xbf16>
    %10 = vector.shape_cast %9 : vector<1x32x128xbf16> to vector<32x128xbf16>
    %11 = arith.select %7, %8, %10 : vector<32x128xbf16>
    %12 = tpu.concatenate %6, %1, %11 in 1 : vector<32x128xbf16>, vector<32x512xbf16>, vector<32x128xbf16> -> vector<32x768xbf16>
    %13 = vector.extract_strided_slice %12 {offsets = [0, 126], sizes = [32, 512], strides = [1, 1]} : vector<32x768xbf16> to vector<32x512xbf16>
    %14 = vector.extract_strided_slice %12 {offsets = [0, 127], sizes = [32, 512], strides = [1, 1]} : vector<32x768xbf16> to vector<32x512xbf16>
    %15 = vector.extract_strided_slice %12 {offsets = [0, 128], sizes = [32, 512], strides = [1, 1]} : vector<32x768xbf16> to vector<32x512xbf16>
    %16 = vector.extract_strided_slice %12 {offsets = [0, 129], sizes = [32, 512], strides = [1, 1]} : vector<32x768xbf16> to vector<32x512xbf16>
    %17 = vector.extract_strided_slice %12 {offsets = [0, 130], sizes = [32, 512], strides = [1, 1]} : vector<32x768xbf16> to vector<32x512xbf16>
    %18 = tpu.concatenate %13, %14, %15, %16, %17 in 0 : vector<32x512xbf16>, vector<32x512xbf16>, vector<32x512xbf16>, vector<32x512xbf16>, vector<32x512xbf16> -> vector<160x512xbf16>
    %c0_9 = arith.constant 0 : index
    %19 = memref.load %arg11[%c0_9] : memref<1xf32, #tpu.memory_space<smem>>
    %c0_10 = arith.constant 0 : index
    %c0_11 = arith.constant 0 : index
    %20 = vector.load %arg5[%c0_10, %c0_11] : memref<32x160xbf16, #tpu.memory_space<vmem>>, vector<32x160xbf16>
    %cst_12 = arith.constant dense<0.000000e+00> : vector<32x512xf32>
    %21 = tpu.matmul %20, %18, %cst_12 {dimension_numbers = #tpu.dot_dimension_numbers<[1], [0], [0], [1], [0, 0, 1, 1], [], []>} : vector<32x160xbf16>, vector<160x512xbf16>, vector<32x512xf32> -> vector<32x512xf32>
    %c0_13 = arith.constant 0 : index
    %c0_14 = arith.constant 0 : index
    %22 = vector.load %arg6[%c0_13, %c0_14] : memref<32x1xf32, #tpu.memory_space<vmem>>, vector<32x1xf32>
    %23 = vector.broadcast %22 : vector<32x1xf32> to vector<32x512xf32>
    %24 = arith.addf %21, %23 : vector<32x512xf32>
    %25 = arith.extf %1 : vector<32x512xbf16> to vector<32x512xf32>
    %cst_15 = arith.constant 0.000000e+00 : f32
    %26 = vector.broadcast %cst_15 : f32 to vector<32x512xf32>
    %27 = arith.maximumf %24, %26 : vector<32x512xf32>
    %28 = vector.broadcast %19 : f32 to vector<32x512xf32>
    %29 = arith.mulf %28, %27 : vector<32x512xf32>
    %30 = arith.addf %25, %29 : vector<32x512xf32>
    %c0_16 = arith.constant 0 : index
    %c0_17 = arith.constant 0 : index
    %31 = vector.load %arg7[%c0_16, %c0_17] : memref<32x32xbf16, #tpu.memory_space<vmem>>, vector<32x32xbf16>
    %32 = arith.truncf %30 : vector<32x512xf32> to vector<32x512xbf16>
    %cst_18 = arith.constant dense<0.000000e+00> : vector<32x512xf32>
    %33 = tpu.matmul %31, %32, %cst_18 {dimension_numbers = #tpu.dot_dimension_numbers<[1], [0], [0], [1], [0, 0, 1, 1], [], []>} : vector<32x32xbf16>, vector<32x512xbf16>, vector<32x512xf32> -> vector<32x512xf32>
    %c0_19 = arith.constant 0 : index
    %c0_20 = arith.constant 0 : index
    %34 = vector.load %arg8[%c0_19, %c0_20] : memref<32x1xf32, #tpu.memory_space<vmem>>, vector<32x1xf32>
    %35 = vector.broadcast %34 : vector<32x1xf32> to vector<32x512xf32>
    %36 = arith.addf %33, %35 : vector<32x512xf32>
    %cst_21 = arith.constant 0.000000e+00 : f32
    %37 = vector.broadcast %cst_21 : f32 to vector<32x512xf32>
    %38 = arith.maximumf %36, %37 : vector<32x512xf32>
    %c0_22 = arith.constant 0 : index
    %c0_23 = arith.constant 0 : index
    %39 = vector.load %arg9[%c0_22, %c0_23] : memref<32x32xbf16, #tpu.memory_space<vmem>>, vector<32x32xbf16>
    %40 = arith.truncf %38 : vector<32x512xf32> to vector<32x512xbf16>
    %cst_24 = arith.constant dense<0.000000e+00> : vector<32x512xf32>
    %41 = tpu.matmul %39, %40, %cst_24 {dimension_numbers = #tpu.dot_dimension_numbers<[1], [0], [0], [1], [0, 0, 1, 1], [], []>} : vector<32x32xbf16>, vector<32x512xbf16>, vector<32x512xf32> -> vector<32x512xf32>
    %c0_25 = arith.constant 0 : index
    %c0_26 = arith.constant 0 : index
    %42 = vector.load %arg10[%c0_25, %c0_26] : memref<32x1xf32, #tpu.memory_space<vmem>>, vector<32x1xf32>
    %43 = vector.broadcast %42 : vector<32x1xf32> to vector<32x512xf32>
    %44 = arith.addf %41, %43 : vector<32x512xf32>
    %45 = vector.broadcast %19 : f32 to vector<32x512xf32>
    %46 = arith.mulf %45, %44 : vector<32x512xf32>
    %47 = arith.addf %30, %46 : vector<32x512xf32>
    %c512_i32 = arith.constant 512 : i32
    %48 = arith.muli %arg1, %c512_i32 : i32
    %49 = tpu.iota {dimensions = array<i32: 1>} : vector<32x512xi32>
    %50 = vector.broadcast %48 : i32 to vector<32x512xi32>
    %51 = arith.addi %50, %49 : vector<32x512xi32>
    %c548_i32 = arith.constant 548 : i32
    %52 = vector.broadcast %c548_i32 : i32 to vector<32x512xi32>
    %53 = arith.cmpi slt, %51, %52 : vector<32x512xi32>
    %cst_27 = arith.constant 0.000000e+00 : f32
    %54 = vector.broadcast %cst_27 : f32 to vector<32x512xf32>
    %55 = arith.select %53, %47, %54 : vector<32x512xi1>, vector<32x512xf32>
    %56 = arith.truncf %55 : vector<32x512xf32> to vector<32x512xbf16>
    %c0_28 = arith.constant 0 : index
    %c0_29 = arith.constant 0 : index
    %c0_30 = arith.constant 0 : index
    %57 = vector.load %arg12[%c0_28, %c0_29, %c0_30] : memref<1x32x512xbf16, #tpu.memory_space<vmem>>, vector<1x32x512xbf16>
    %58 = vector.shape_cast %57 : vector<1x32x512xbf16> to vector<32x512xbf16>
    %59 = vector.shape_cast %56 : vector<32x512xbf16> to vector<1x32x512xbf16>
    tpu.vector_store %arg12[%c0_28, %c0_29, %c0_30], %59 {strides = array<i32>} : memref<1x32x512xbf16, #tpu.memory_space<vmem>>, vector<1x32x512xbf16>,
    return
  }
  func.func @transform_0(%arg0: i32, %arg1: i32) -> (i32, i32, i32) {
    %c4_i32 = arith.constant 4 : i32
    %0 = arith.muli %arg1, %c4_i32 : i32
    %c1_i32 = arith.constant 1 : i32
    %1 = arith.subi %0, %c1_i32 : i32
    %c0_i32 = arith.constant 0 : i32
    %2 = arith.maxsi %1, %c0_i32 : i32
    %c0_i32_0 = arith.constant 0 : i32
    %c0_i32_1 = arith.constant 0 : i32
    return %arg0, %c0_i32_0, %2 : i32, i32, i32
  }
  func.func @transform_1(%arg0: i32, %arg1: i32) -> (i32, i32, i32) {
    %c0_i32 = arith.constant 0 : i32
    %c0_i32_0 = arith.constant 0 : i32
    return %arg0, %c0_i32, %arg1 : i32, i32, i32
  }
  func.func @transform_2(%arg0: i32, %arg1: i32) -> (i32, i32, i32) {
    %c1_i32 = arith.constant 1 : i32
    %0 = arith.addi %arg1, %c1_i32 : i32
    %c4_i32 = arith.constant 4 : i32
    %1 = arith.muli %0, %c4_i32 : i32
    %c7_i32 = arith.constant 7 : i32
    %2 = arith.minsi %1, %c7_i32 : i32
    %c0_i32 = arith.constant 0 : i32
    %c0_i32_0 = arith.constant 0 : i32
    return %arg0, %c0_i32, %2 : i32, i32, i32
  }
  func.func @transform_3(%arg0: i32, %arg1: i32) -> (i32, i32) {
    %c0_i32 = arith.constant 0 : i32
    %c0_i32_0 = arith.constant 0 : i32
    %c0_i32_1 = arith.constant 0 : i32
    return %c0_i32, %c0_i32_0 : i32, i32
  }
  func.func @transform_4(%arg0: i32, %arg1: i32) -> (i32, i32) {
    %c0_i32 = arith.constant 0 : i32
    %c0_i32_0 = arith.constant 0 : i32
    %c0_i32_1 = arith.constant 0 : i32
    return %c0_i32, %c0_i32_0 : i32, i32
  }
  func.func @transform_5(%arg0: i32, %arg1: i32) -> (i32, i32) {
    %c0_i32 = arith.constant 0 : i32
    %c0_i32_0 = arith.constant 0 : i32
    %c0_i32_1 = arith.constant 0 : i32
    return %c0_i32, %c0_i32_0 : i32, i32
  }
  func.func @transform_6(%arg0: i32, %arg1: i32) -> (i32, i32) {
    %c0_i32 = arith.constant 0 : i32
    %c0_i32_0 = arith.constant 0 : i32
    %c0_i32_1 = arith.constant 0 : i32
    return %c0_i32, %c0_i32_0 : i32, i32
  }
  func.func @transform_7(%arg0: i32, %arg1: i32) -> (i32, i32) {
    %c0_i32 = arith.constant 0 : i32
    %c0_i32_0 = arith.constant 0 : i32
    %c0_i32_1 = arith.constant 0 : i32
    return %c0_i32, %c0_i32_0 : i32, i32
  }
  func.func @transform_8(%arg0: i32, %arg1: i32) -> (i32, i32) {
    %c0_i32 = arith.constant 0 : i32
    %c0_i32_0 = arith.constant 0 : i32
    %c0_i32_1 = arith.constant 0 : i32
    return %c0_i32, %c0_i32_0 : i32, i32
  }
  func.func @transform_9(%arg0: i32, %arg1: i32) -> i32 {
    %c0_i32 = arith.constant 0 : i32
    %c0_i32_0 = arith.constant 0 : i32
    return %c0_i32 : i32
  }
  func.func @transform_10(%arg0: i32, %arg1: i32) -> (i32, i32, i32) {
    %c0_i32 = arith.constant 0 : i32
    %c0_i32_0 = arith.constant 0 : i32
    return %arg0, %c0_i32, %arg1 : i32, i32, i32
  }
}

module attributes {stable_mosaic.version = 11 : i64} {
  func.func @_ds_conv_kernel(%arg0: i32, %arg1: i32, %arg2: memref<1x32x384xbf16, #tpu.memory_space<vmem>>, %arg3: memref<1x32x128xbf16, #tpu.memory_space<vmem>>, %arg4: memref<1x32x384xbf16, #tpu.memory_space<vmem>>, %arg5: memref<1x32x128xbf16, #tpu.memory_space<vmem>>, %arg6: memref<32x160xbf16, #tpu.memory_space<vmem>>, %arg7: memref<32x1xf32, #tpu.memory_space<vmem>>, %arg8: memref<1x32x384xbf16, #tpu.memory_space<vmem>>) attributes {dimension_semantics = [#tpu.dimension_semantics<parallel>, #tpu.dimension_semantics<parallel>], iteration_bounds = array<i64: 2, 1>, scalar_prefetch = 0 : i64, scratch_operands = 0 : i64, tpu.core_type = #tpu.core_type<tc>, window_params = [{transform_indices = @transform_0, window_bounds = array<i64: 1, 32, 384>}, {transform_indices = @transform_1, window_bounds = array<i64: 1, 32, 128>}, {transform_indices = @transform_2, window_bounds = array<i64: 1, 32, 384>}, {transform_indices = @transform_3, window_bounds = array<i64: 1, 32, 128>}, {pipeline_mode = #tpu.pipeline_mode<synchronous>, transform_indices = @transform_4, window_bounds = array<i64: 32, 160>}, {pipeline_mode = #tpu.pipeline_mode<synchronous>, transform_indices = @transform_5, window_bounds = array<i64: 32, 1>}, {transform_indices = @transform_6, window_bounds = array<i64: 1, 32, 384>}]} {
    %c0 = arith.constant 0 : index
    %c0_0 = arith.constant 0 : index
    %c0_1 = arith.constant 0 : index
    %0 = vector.load %arg2[%c0, %c0_0, %c0_1] : memref<1x32x384xbf16, #tpu.memory_space<vmem>>, vector<1x32x384xbf16>
    %1 = vector.shape_cast %0 : vector<1x32x384xbf16> to vector<32x384xbf16>
    %c0_2 = arith.constant 0 : index
    %c0_3 = arith.constant 0 : index
    %c0_4 = arith.constant 0 : index
    %2 = vector.load %arg3[%c0_2, %c0_3, %c0_4] : memref<1x32x128xbf16, #tpu.memory_space<vmem>>, vector<1x32x128xbf16>
    %3 = vector.shape_cast %2 : vector<1x32x128xbf16> to vector<32x128xbf16>
    %4 = tpu.concatenate %1, %3 in 1 : vector<32x384xbf16>, vector<32x128xbf16> -> vector<32x512xbf16>
    %c0_5 = arith.constant 0 : index
    %c0_6 = arith.constant 0 : index
    %c0_7 = arith.constant 0 : index
    %5 = vector.load %arg4[%c0_5, %c0_6, %c0_7] : memref<1x32x384xbf16, #tpu.memory_space<vmem>>, vector<1x32x384xbf16>
    %6 = vector.shape_cast %5 : vector<1x32x384xbf16> to vector<32x384xbf16>
    %c0_8 = arith.constant 0 : index
    %c0_9 = arith.constant 0 : index
    %c0_10 = arith.constant 0 : index
    %7 = vector.load %arg5[%c0_8, %c0_9, %c0_10] : memref<1x32x128xbf16, #tpu.memory_space<vmem>>, vector<1x32x128xbf16>
    %8 = vector.shape_cast %7 : vector<1x32x128xbf16> to vector<32x128xbf16>
    %9 = tpu.concatenate %6, %8 in 1 : vector<32x384xbf16>, vector<32x128xbf16> -> vector<32x512xbf16>
    %10 = vector.extract_strided_slice %4 {offsets = [0, 0], sizes = [32, 384], strides = [1, 1]} : vector<32x512xbf16> to vector<32x384xbf16>
    %11 = vector.extract_strided_slice %4 {offsets = [0, 1], sizes = [32, 384], strides = [1, 1]} : vector<32x512xbf16> to vector<32x384xbf16>
    %12 = vector.extract_strided_slice %4 {offsets = [0, 2], sizes = [32, 384], strides = [1, 1]} : vector<32x512xbf16> to vector<32x384xbf16>
    %13 = vector.extract_strided_slice %9 {offsets = [0, 0], sizes = [32, 384], strides = [1, 1]} : vector<32x512xbf16> to vector<32x384xbf16>
    %14 = vector.extract_strided_slice %9 {offsets = [0, 1], sizes = [32, 384], strides = [1, 1]} : vector<32x512xbf16> to vector<32x384xbf16>
    %15 = tpu.concatenate %10, %11, %12, %13, %14 in 0 : vector<32x384xbf16>, vector<32x384xbf16>, vector<32x384xbf16>, vector<32x384xbf16>, vector<32x384xbf16> -> vector<160x384xbf16>
    %c0_11 = arith.constant 0 : index
    %c0_12 = arith.constant 0 : index
    %16 = vector.load %arg6[%c0_11, %c0_12] : memref<32x160xbf16, #tpu.memory_space<vmem>>, vector<32x160xbf16>
    %cst = arith.constant dense<0.000000e+00> : vector<32x384xf32>
    %17 = tpu.matmul %16, %15, %cst {dimension_numbers = #tpu.dot_dimension_numbers<[1], [0], [0], [1], [0, 0, 1, 1], [], []>} : vector<32x160xbf16>, vector<160x384xbf16>, vector<32x384xf32> -> vector<32x384xf32>
    %c0_13 = arith.constant 0 : index
    %c0_14 = arith.constant 0 : index
    %18 = vector.load %arg7[%c0_13, %c0_14] : memref<32x1xf32, #tpu.memory_space<vmem>>, vector<32x1xf32>
    %19 = vector.broadcast %18 : vector<32x1xf32> to vector<32x384xf32>
    %20 = arith.addf %17, %19 : vector<32x384xf32>
    %c384_i32 = arith.constant 384 : i32
    %21 = arith.muli %arg1, %c384_i32 : i32
    %22 = tpu.iota {dimensions = array<i32: 1>} : vector<32x384xi32>
    %23 = vector.broadcast %21 : i32 to vector<32x384xi32>
    %24 = arith.addi %23, %22 : vector<32x384xi32>
    %c272_i32 = arith.constant 272 : i32
    %25 = vector.broadcast %c272_i32 : i32 to vector<32x384xi32>
    %26 = arith.cmpi slt, %24, %25 : vector<32x384xi32>
    %cst_15 = arith.constant 0.000000e+00 : f32
    %27 = vector.broadcast %cst_15 : f32 to vector<32x384xf32>
    %28 = arith.select %26, %20, %27 : vector<32x384xi1>, vector<32x384xf32>
    %29 = arith.truncf %28 : vector<32x384xf32> to vector<32x384xbf16>
    %c0_16 = arith.constant 0 : index
    %c0_17 = arith.constant 0 : index
    %c0_18 = arith.constant 0 : index
    %30 = vector.load %arg8[%c0_16, %c0_17, %c0_18] : memref<1x32x384xbf16, #tpu.memory_space<vmem>>, vector<1x32x384xbf16>
    %31 = vector.shape_cast %30 : vector<1x32x384xbf16> to vector<32x384xbf16>
    %32 = vector.shape_cast %29 : vector<32x384xbf16> to vector<1x32x384xbf16>
    tpu.vector_store %arg8[%c0_16, %c0_17, %c0_18], %32 {strides = array<i32>} : memref<1x32x384xbf16, #tpu.memory_space<vmem>>, vector<1x32x384xbf16>,
    return
  }
  func.func @transform_0(%arg0: i32, %arg1: i32) -> (i32, i32, i32) {
    %c0_i32 = arith.constant 0 : i32
    %c0_i32_0 = arith.constant 0 : i32
    return %arg0, %c0_i32, %arg1 : i32, i32, i32
  }
  func.func @transform_1(%arg0: i32, %arg1: i32) -> (i32, i32, i32) {
    %c1_i32 = arith.constant 1 : i32
    %0 = arith.addi %arg1, %c1_i32 : i32
    %c3_i32 = arith.constant 3 : i32
    %1 = arith.muli %0, %c3_i32 : i32
    %c0_i32 = arith.constant 0 : i32
    %c0_i32_0 = arith.constant 0 : i32
    return %arg0, %c0_i32, %1 : i32, i32, i32
  }
  func.func @transform_2(%arg0: i32, %arg1: i32) -> (i32, i32, i32) {
    %c0_i32 = arith.constant 0 : i32
    %c0_i32_0 = arith.constant 0 : i32
    return %arg0, %c0_i32, %arg1 : i32, i32, i32
  }
  func.func @transform_3(%arg0: i32, %arg1: i32) -> (i32, i32, i32) {
    %c1_i32 = arith.constant 1 : i32
    %0 = arith.addi %arg1, %c1_i32 : i32
    %c3_i32 = arith.constant 3 : i32
    %1 = arith.muli %0, %c3_i32 : i32
    %c0_i32 = arith.constant 0 : i32
    %c0_i32_0 = arith.constant 0 : i32
    return %arg0, %c0_i32, %1 : i32, i32, i32
  }
  func.func @transform_4(%arg0: i32, %arg1: i32) -> (i32, i32) {
    %c0_i32 = arith.constant 0 : i32
    %c0_i32_0 = arith.constant 0 : i32
    %c0_i32_1 = arith.constant 0 : i32
    return %c0_i32, %c0_i32_0 : i32, i32
  }
  func.func @transform_5(%arg0: i32, %arg1: i32) -> (i32, i32) {
    %c0_i32 = arith.constant 0 : i32
    %c0_i32_0 = arith.constant 0 : i32
    %c0_i32_1 = arith.constant 0 : i32
    return %c0_i32, %c0_i32_0 : i32, i32
  }
  func.func @transform_6(%arg0: i32, %arg1: i32) -> (i32, i32, i32) {
    %c0_i32 = arith.constant 0 : i32
    %c0_i32_0 = arith.constant 0 : i32
    return %arg0, %c0_i32, %arg1 : i32, i32, i32
  }
}

module attributes {stable_mosaic.version = 11 : i64} {
  func.func @_tds_block_kernel(%arg0: i32, %arg1: i32, %arg2: memref<1x32x128xbf16, #tpu.memory_space<vmem>>, %arg3: memref<1x32x384xbf16, #tpu.memory_space<vmem>>, %arg4: memref<1x32x128xbf16, #tpu.memory_space<vmem>>, %arg5: memref<32x160xbf16, #tpu.memory_space<vmem>>, %arg6: memref<32x1xf32, #tpu.memory_space<vmem>>, %arg7: memref<32x32xbf16, #tpu.memory_space<vmem>>, %arg8: memref<32x1xf32, #tpu.memory_space<vmem>>, %arg9: memref<32x32xbf16, #tpu.memory_space<vmem>>, %arg10: memref<32x1xf32, #tpu.memory_space<vmem>>, %arg11: memref<1xf32, #tpu.memory_space<smem>>, %arg12: memref<1x32x384xbf16, #tpu.memory_space<vmem>>) attributes {dimension_semantics = [#tpu.dimension_semantics<parallel>, #tpu.dimension_semantics<parallel>], iteration_bounds = array<i64: 2, 1>, scalar_prefetch = 0 : i64, scratch_operands = 0 : i64, tpu.core_type = #tpu.core_type<tc>, window_params = [{transform_indices = @transform_0, window_bounds = array<i64: 1, 32, 128>}, {transform_indices = @transform_1, window_bounds = array<i64: 1, 32, 384>}, {transform_indices = @transform_2, window_bounds = array<i64: 1, 32, 128>}, {pipeline_mode = #tpu.pipeline_mode<synchronous>, transform_indices = @transform_3, window_bounds = array<i64: 32, 160>}, {pipeline_mode = #tpu.pipeline_mode<synchronous>, transform_indices = @transform_4, window_bounds = array<i64: 32, 1>}, {pipeline_mode = #tpu.pipeline_mode<synchronous>, transform_indices = @transform_5, window_bounds = array<i64: 32, 32>}, {pipeline_mode = #tpu.pipeline_mode<synchronous>, transform_indices = @transform_6, window_bounds = array<i64: 32, 1>}, {pipeline_mode = #tpu.pipeline_mode<synchronous>, transform_indices = @transform_7, window_bounds = array<i64: 32, 32>}, {pipeline_mode = #tpu.pipeline_mode<synchronous>, transform_indices = @transform_8, window_bounds = array<i64: 32, 1>}, {transform_indices = @transform_9, window_bounds = array<i64: 1>}, {transform_indices = @transform_10, window_bounds = array<i64: 1, 32, 384>}]} {
    %c0 = arith.constant 0 : index
    %c0_0 = arith.constant 0 : index
    %c0_1 = arith.constant 0 : index
    %0 = vector.load %arg3[%c0, %c0_0, %c0_1] : memref<1x32x384xbf16, #tpu.memory_space<vmem>>, vector<1x32x384xbf16>
    %1 = vector.shape_cast %0 : vector<1x32x384xbf16> to vector<32x384xbf16>
    %c0_i32 = arith.constant 0 : i32
    %2 = arith.cmpi eq, %arg1, %c0_i32 : i32
    %cst = arith.constant 0.000000e+00 : bf16
    %3 = vector.broadcast %cst : bf16 to vector<32x128xbf16>
    %c0_2 = arith.constant 0 : index
    %c0_3 = arith.constant 0 : index
    %c0_4 = arith.constant 0 : index
    %4 = vector.load %arg2[%c0_2, %c0_3, %c0_4] : memref<1x32x128xbf16, #tpu.memory_space<vmem>>, vector<1x32x128xbf16>
    %5 = vector.shape_cast %4 : vector<1x32x128xbf16> to vector<32x128xbf16>
    %6 = arith.select %2, %3, %5 : vector<32x128xbf16>
    %c0_i32_5 = arith.constant 0 : i32
    %7 = arith.cmpi eq, %arg1, %c0_i32_5 : i32
    %cst_6 = arith.constant 0.000000e+00 : bf16
    %8 = vector.broadcast %cst_6 : bf16 to vector<32x128xbf16>
    %c0_7 = arith.constant 0 : index
    %c0_8 = arith.constant 0 : index
    %c0_9 = arith.constant 0 : index
    %9 = vector.load %arg4[%c0_7, %c0_8, %c0_9] : memref<1x32x128xbf16, #tpu.memory_space<vmem>>, vector<1x32x128xbf16>
    %10 = vector.shape_cast %9 : vector<1x32x128xbf16> to vector<32x128xbf16>
    %11 = arith.select %7, %8, %10 : vector<32x128xbf16>
    %12 = tpu.concatenate %6, %1, %11 in 1 : vector<32x128xbf16>, vector<32x384xbf16>, vector<32x128xbf16> -> vector<32x640xbf16>
    %13 = vector.extract_strided_slice %12 {offsets = [0, 126], sizes = [32, 384], strides = [1, 1]} : vector<32x640xbf16> to vector<32x384xbf16>
    %14 = vector.extract_strided_slice %12 {offsets = [0, 127], sizes = [32, 384], strides = [1, 1]} : vector<32x640xbf16> to vector<32x384xbf16>
    %15 = vector.extract_strided_slice %12 {offsets = [0, 128], sizes = [32, 384], strides = [1, 1]} : vector<32x640xbf16> to vector<32x384xbf16>
    %16 = vector.extract_strided_slice %12 {offsets = [0, 129], sizes = [32, 384], strides = [1, 1]} : vector<32x640xbf16> to vector<32x384xbf16>
    %17 = vector.extract_strided_slice %12 {offsets = [0, 130], sizes = [32, 384], strides = [1, 1]} : vector<32x640xbf16> to vector<32x384xbf16>
    %18 = tpu.concatenate %13, %14, %15, %16, %17 in 0 : vector<32x384xbf16>, vector<32x384xbf16>, vector<32x384xbf16>, vector<32x384xbf16>, vector<32x384xbf16> -> vector<160x384xbf16>
    %c0_10 = arith.constant 0 : index
    %19 = memref.load %arg11[%c0_10] : memref<1xf32, #tpu.memory_space<smem>>
    %c0_11 = arith.constant 0 : index
    %c0_12 = arith.constant 0 : index
    %20 = vector.load %arg5[%c0_11, %c0_12] : memref<32x160xbf16, #tpu.memory_space<vmem>>, vector<32x160xbf16>
    %cst_13 = arith.constant dense<0.000000e+00> : vector<32x384xf32>
    %21 = tpu.matmul %20, %18, %cst_13 {dimension_numbers = #tpu.dot_dimension_numbers<[1], [0], [0], [1], [0, 0, 1, 1], [], []>} : vector<32x160xbf16>, vector<160x384xbf16>, vector<32x384xf32> -> vector<32x384xf32>
    %c0_14 = arith.constant 0 : index
    %c0_15 = arith.constant 0 : index
    %22 = vector.load %arg6[%c0_14, %c0_15] : memref<32x1xf32, #tpu.memory_space<vmem>>, vector<32x1xf32>
    %23 = vector.broadcast %22 : vector<32x1xf32> to vector<32x384xf32>
    %24 = arith.addf %21, %23 : vector<32x384xf32>
    %25 = arith.extf %1 : vector<32x384xbf16> to vector<32x384xf32>
    %cst_16 = arith.constant 0.000000e+00 : f32
    %26 = vector.broadcast %cst_16 : f32 to vector<32x384xf32>
    %27 = arith.maximumf %24, %26 : vector<32x384xf32>
    %28 = vector.broadcast %19 : f32 to vector<32x384xf32>
    %29 = arith.mulf %28, %27 : vector<32x384xf32>
    %30 = arith.addf %25, %29 : vector<32x384xf32>
    %c0_17 = arith.constant 0 : index
    %c0_18 = arith.constant 0 : index
    %31 = vector.load %arg7[%c0_17, %c0_18] : memref<32x32xbf16, #tpu.memory_space<vmem>>, vector<32x32xbf16>
    %32 = arith.truncf %30 : vector<32x384xf32> to vector<32x384xbf16>
    %cst_19 = arith.constant dense<0.000000e+00> : vector<32x384xf32>
    %33 = tpu.matmul %31, %32, %cst_19 {dimension_numbers = #tpu.dot_dimension_numbers<[1], [0], [0], [1], [0, 0, 1, 1], [], []>} : vector<32x32xbf16>, vector<32x384xbf16>, vector<32x384xf32> -> vector<32x384xf32>
    %c0_20 = arith.constant 0 : index
    %c0_21 = arith.constant 0 : index
    %34 = vector.load %arg8[%c0_20, %c0_21] : memref<32x1xf32, #tpu.memory_space<vmem>>, vector<32x1xf32>
    %35 = vector.broadcast %34 : vector<32x1xf32> to vector<32x384xf32>
    %36 = arith.addf %33, %35 : vector<32x384xf32>
    %cst_22 = arith.constant 0.000000e+00 : f32
    %37 = vector.broadcast %cst_22 : f32 to vector<32x384xf32>
    %38 = arith.maximumf %36, %37 : vector<32x384xf32>
    %c0_23 = arith.constant 0 : index
    %c0_24 = arith.constant 0 : index
    %39 = vector.load %arg9[%c0_23, %c0_24] : memref<32x32xbf16, #tpu.memory_space<vmem>>, vector<32x32xbf16>
    %40 = arith.truncf %38 : vector<32x384xf32> to vector<32x384xbf16>
    %cst_25 = arith.constant dense<0.000000e+00> : vector<32x384xf32>
    %41 = tpu.matmul %39, %40, %cst_25 {dimension_numbers = #tpu.dot_dimension_numbers<[1], [0], [0], [1], [0, 0, 1, 1], [], []>} : vector<32x32xbf16>, vector<32x384xbf16>, vector<32x384xf32> -> vector<32x384xf32>
    %c0_26 = arith.constant 0 : index
    %c0_27 = arith.constant 0 : index
    %42 = vector.load %arg10[%c0_26, %c0_27] : memref<32x1xf32, #tpu.memory_space<vmem>>, vector<32x1xf32>
    %43 = vector.broadcast %42 : vector<32x1xf32> to vector<32x384xf32>
    %44 = arith.addf %41, %43 : vector<32x384xf32>
    %45 = vector.broadcast %19 : f32 to vector<32x384xf32>
    %46 = arith.mulf %45, %44 : vector<32x384xf32>
    %47 = arith.addf %30, %46 : vector<32x384xf32>
    %c384_i32 = arith.constant 384 : i32
    %48 = arith.muli %arg1, %c384_i32 : i32
    %49 = tpu.iota {dimensions = array<i32: 1>} : vector<32x384xi32>
    %50 = vector.broadcast %48 : i32 to vector<32x384xi32>
    %51 = arith.addi %50, %49 : vector<32x384xi32>
    %c272_i32 = arith.constant 272 : i32
    %52 = vector.broadcast %c272_i32 : i32 to vector<32x384xi32>
    %53 = arith.cmpi slt, %51, %52 : vector<32x384xi32>
    %cst_28 = arith.constant 0.000000e+00 : f32
    %54 = vector.broadcast %cst_28 : f32 to vector<32x384xf32>
    %55 = arith.select %53, %47, %54 : vector<32x384xi1>, vector<32x384xf32>
    %56 = arith.truncf %55 : vector<32x384xf32> to vector<32x384xbf16>
    %c0_29 = arith.constant 0 : index
    %c0_30 = arith.constant 0 : index
    %c0_31 = arith.constant 0 : index
    %57 = vector.load %arg12[%c0_29, %c0_30, %c0_31] : memref<1x32x384xbf16, #tpu.memory_space<vmem>>, vector<1x32x384xbf16>
    %58 = vector.shape_cast %57 : vector<1x32x384xbf16> to vector<32x384xbf16>
    %59 = vector.shape_cast %56 : vector<32x384xbf16> to vector<1x32x384xbf16>
    tpu.vector_store %arg12[%c0_29, %c0_30, %c0_31], %59 {strides = array<i32>} : memref<1x32x384xbf16, #tpu.memory_space<vmem>>, vector<1x32x384xbf16>,
    return
  }
  func.func @transform_0(%arg0: i32, %arg1: i32) -> (i32, i32, i32) {
    %c3_i32 = arith.constant 3 : i32
    %0 = arith.muli %arg1, %c3_i32 : i32
    %c1_i32 = arith.constant 1 : i32
    %1 = arith.subi %0, %c1_i32 : i32
    %c0_i32 = arith.constant 0 : i32
    %2 = arith.maxsi %1, %c0_i32 : i32
    %c0_i32_0 = arith.constant 0 : i32
    %c0_i32_1 = arith.constant 0 : i32
    return %arg0, %c0_i32_0, %2 : i32, i32, i32
  }
  func.func @transform_1(%arg0: i32, %arg1: i32) -> (i32, i32, i32) {
    %c0_i32 = arith.constant 0 : i32
    %c0_i32_0 = arith.constant 0 : i32
    return %arg0, %c0_i32, %arg1 : i32, i32, i32
  }
  func.func @transform_2(%arg0: i32, %arg1: i32) -> (i32, i32, i32) {
    %c1_i32 = arith.constant 1 : i32
    %0 = arith.addi %arg1, %c1_i32 : i32
    %c3_i32 = arith.constant 3 : i32
    %1 = arith.muli %0, %c3_i32 : i32
    %c2_i32 = arith.constant 2 : i32
    %2 = arith.minsi %1, %c2_i32 : i32
    %c0_i32 = arith.constant 0 : i32
    %c0_i32_0 = arith.constant 0 : i32
    return %arg0, %c0_i32, %2 : i32, i32, i32
  }
  func.func @transform_3(%arg0: i32, %arg1: i32) -> (i32, i32) {
    %c0_i32 = arith.constant 0 : i32
    %c0_i32_0 = arith.constant 0 : i32
    %c0_i32_1 = arith.constant 0 : i32
    return %c0_i32, %c0_i32_0 : i32, i32
  }
  func.func @transform_4(%arg0: i32, %arg1: i32) -> (i32, i32) {
    %c0_i32 = arith.constant 0 : i32
    %c0_i32_0 = arith.constant 0 : i32
    %c0_i32_1 = arith.constant 0 : i32
    return %c0_i32, %c0_i32_0 : i32, i32
  }
  func.func @transform_5(%arg0: i32, %arg1: i32) -> (i32, i32) {
    %c0_i32 = arith.constant 0 : i32
    %c0_i32_0 = arith.constant 0 : i32
    %c0_i32_1 = arith.constant 0 : i32
    return %c0_i32, %c0_i32_0 : i32, i32
  }
  func.func @transform_6(%arg0: i32, %arg1: i32) -> (i32, i32) {
    %c0_i32 = arith.constant 0 : i32
    %c0_i32_0 = arith.constant 0 : i32
    %c0_i32_1 = arith.constant 0 : i32
    return %c0_i32, %c0_i32_0 : i32, i32
  }
  func.func @transform_7(%arg0: i32, %arg1: i32) -> (i32, i32) {
    %c0_i32 = arith.constant 0 : i32
    %c0_i32_0 = arith.constant 0 : i32
    %c0_i32_1 = arith.constant 0 : i32
    return %c0_i32, %c0_i32_0 : i32, i32
  }
  func.func @transform_8(%arg0: i32, %arg1: i32) -> (i32, i32) {
    %c0_i32 = arith.constant 0 : i32
    %c0_i32_0 = arith.constant 0 : i32
    %c0_i32_1 = arith.constant 0 : i32
    return %c0_i32, %c0_i32_0 : i32, i32
  }
  func.func @transform_9(%arg0: i32, %arg1: i32) -> i32 {
    %c0_i32 = arith.constant 0 : i32
    %c0_i32_0 = arith.constant 0 : i32
    return %c0_i32 : i32
  }
  func.func @transform_10(%arg0: i32, %arg1: i32) -> (i32, i32, i32) {
    %c0_i32 = arith.constant 0 : i32
    %c0_i32_0 = arith.constant 0 : i32
    return %arg0, %c0_i32, %arg1 : i32, i32, i32
  }
}

</mosaic_0001>

<bundles_post_ra>
// kernel: tds_forward_pallas.4
= control target key start
LH: loop header
LB: loop body
LE: loop exit
PB: predicated region body
PF: predicated region fallthrough
CT: control target
= control target key end

     0   :  { %s1079_s21 = smov 0   ;;  %s1081_s22 = smov 0   ;;  %s1342_s0 = inlined_call_operand.vmem [shape: bf16[2,4,1536], index: 0, kind: input, shape index: {}, may-alias: {0,1}]   ;;  %s1343_s1 = inlined_call_operand.vmem [shape: bf16[2,4,1536], index: 1, kind: input, shape index: {}, may-alias: {0,1}]   ;;  %s1344_s2 = inlined_call_operand.vmem [shape: bf16[2,4,1536], index: 2, kind: input, shape index: {}, may-alias: {2,3}]   ;;  %s1345_s3 = inlined_call_operand.vmem [shape: bf16[2,4,1536], index: 3, kind: input, shape index: {}, may-alias: {2,3}]   ;;  %s1346_s4 = inlined_call_operand.vmem [shape: bf16[32,20], index: 4, kind: input, shape index: {}]   ;;  %s1347_s5 = inlined_call_operand.vmem [shape: f32[32,1], index: 5, kind: input, shape index: {}]   ;;  %s1348_s6 = inlined_call_operand.vmem [shape: bf16[2,32,1024], index: 6, kind: output, shape index: {}]  }
   0x1   :  { %s1083_s23 = smov 0   ;;  %s1085_s24 = smov 0  }
   0x2   :  { %s1087_s25 = smov 0   ;;  %s1089_s26 = smov 0  }
   0x3   :  { %s1091_s27 = smov 0  }
   0x4 LB: > { %1353 = sst [smem:[#allocation3_spill]] %s1031_s25  ;;  %s25_s28 = sadd.s32 1, %s1031_s25  ;;  %s1039_s27 = sphi %s1091_s27, %s16_s27   ;;  %s1035_s26 = sphi %s1089_s26, %s1361_s26   ;;  %s1031_s25 = sphi %s1087_s25, %s1360_s25   ;;  %s1027_s24 = sphi %s1085_s24, %s1359_s24   ;;  %s1023_s23 = sphi %s1083_s23, %s1358_s23   ;;  %s1019_s22 = sphi %s1081_s22, %s1363_s22   ;;  %s1015_s21 = sphi %s1079_s21, %s1362_s21  }
   0x5   : > { %1354 = sst [smem:[#allocation4_spill]] %s1035_s26  ;;  %p26_p0 = scmp.ge.s32.totalorder %s25_s28, 2 }
   0x6   : > { %s28_s29 = sadd.s32 1, %s1035_s26  ;;  %s867_s30 = sadd.s32 4294967295, %s1039_s27  }
   0x7   : > { %p209_p1 = scmp.ne.s32.totalorder %s1019_s22, %s1015_s21  ;;  %s1365_s28 = smov (%p26_p0, %s25_s28), 0 }
   0x8   : > { %1355 = sst [smem:[#allocation5_spill]] %s1365_s28  ;;  %s1367_s29 = smov (!%p26_p0, %s28_s29), %s1035_s26 }
   0x9   : > { %s195_s7 = ssub.s32 %s1031_s25, %s1365_s28  ;;  %p210_p2 = scmp.eq.s32.totalorder %s867_s30, 3 }
   0xa   : > { %p30_p3 = scmp.ge.s32.totalorder %s1367_s29, 2  ;;  %p875_p4 = scmp.ge.s32.totalorder %s1039_s27, 1 }
   0xb   : > { %p1125_p5 = por %p210_p2, %p209_p1  ;;  %p296_p6 = scmp.lt.s32.totalorder %s1039_s27, 5 }
   0xc   : > { %s1369_s29 = smov (%p30_p3, %s1367_s29), 0  ;;  %s199_s11 = sadd.s32 1, %s1019_s22 }
   0xd   : > { %1357 = sst [smem:[#allocation6_spill]] %s1369_s29  ;;  %p297_p7 = pnand %p875_p4, %p296_p6 }
   0xe   : > { %s194_s9 = ssub.s32 %s1035_s26, %s1369_s29  ;;  %s1139_s13 = sshll.u32 (!%p297_p7), %s1023_s23, 2 }
   0xf   : > { %s196_s10 = sor.u32 %s195_s7, %s194_s9  ;;  %300 = sbr.rel (%p297_p7) target bundleno = 358 (0x166), region = 44 }
  0x10   : > { %p197_p8 = scmp.eq.s32.totalorder %s196_s10, 0  ;;  %p359_p9 = scmp.lt.s32.totalorder (!%p297_p7), %s1027_s24, 1 }
  0x11   : > { %s917_s14 = sadd.s32 (!%p297_p7), 4, %s1139_s13  ;;  %p361_p11 = scmp.lt.s32.totalorder (!%p297_p7), %s1139_s13, 11 }
  0x12   : > { %s1136_s12 = scalar_select %p197_p8, %s1019_s22, %s199_s11  }
  0x13   : > { %p372_p10 = scmp.lt.s32.totalorder (!%p297_p7), %s917_s14, 11  ;;  %s1041_s26 = smov (!%p297_p7), 127  }
  0x14   : > { %s360_s15 = scalar_select %p359_p9, %s1027_s24, 1  ;;  %v524_v30 = vld [vmem:[%s1347_s5 + $0x8] sm:$0xff]  ;;  %v523_v31 = vld [vmem:[%s1347_s5] sm:$0xff]  ;;  %vm444_vm0 = vcmask 1039360   ;;  %v1043_v32 = vmov 0   ;;  %vm488_vm1 = vcmask 1041408  }
  0x15   : > { %s1371_s14 = smov (!%p372_p10, %s917_s14), 11  ;;  %s1042_s25 = smov 126   ;;  %983 = vset.pattern.permute.xlu1 %v1043_v32  ;;  %982 = vset.pattern.permute.xlu0 %v1043_v32  ;;  %vm464_vm2 = vcmask 1031168   ;;  %vm497_vm3 = vcmask 1043456   ;;  %vm506_vm4 = vcmask 1045504   ;;  %v920_v53 = vld [vmem:[%s1346_s4] sm:$0xff] }
  0x16   : > { %s922_s16 = smul.u32 12, %s360_s15  ;;  %984 = vset.pattern.permute.xlu2 %v1043_v32  ;;  %vm557_vm5 = vcmask 162816   ;;  %v526_v56 = vld [vmem:[%s1347_s5 + $0x18] sm:$0xff]  ;;  %v525_v57 = vld [vmem:[%s1347_s5 + $0x10] sm:$0xff] }
  0x17   : > { %s362_s17 = scalar_select %p361_p11, %s1139_s13, 11 }
  0x18   : > { %s375_s18 = sadd.s32 %s922_s16, %s1371_s14 }
  0x19   : > { %s880_s19 = sshll.u32 %s375_s18, 1  ;;  %s364_s20 = sadd.s32 %s922_s16, %s362_s17 }
  0x1a   : > { %s399_s9 = scalar_lea.vmem %s1345_s3, %s880_s19  ;;  %s878_s10 = sshll.u32 %s364_s20, 1 }
  0x1b   : > { %v417_v0 = vld [vmem:[%s399_s9] sm:$0x3]  ;;  %s366_s28 = scalar_lea.vmem %s1342_s0, %s878_s10  ;;  %s377_s14 = scalar_lea.vmem %s1343_s1, %s880_s19 }
  0x1c   : > { %482 = vrot.lane.b32.xlu1 %v417_v0, %s1041_s26  ;;  %v404_v1 = vld [vmem:[%s366_s28] sm:$0xff]  ;;  %s388_s18 = scalar_lea.vmem %s1344_s2, %s878_s10  ;;  %s901_s16 = sshll.u32 %s1023_s23, 9 }
  0x1d   : > { %407 = vst [vmem:[#allocation1] ss:$4 sm:$0xff] %v404_v1  ;;  %v405_v2 = vld [vmem:[%s377_s14] sm:$0x3]  ;;  %s355_s17 = sand.u32 1, %s1015_s21   ;;  %s904_s23 = sshll.u32 (%p1125_p5), %s1027_s24, 5 }
  0x1e   : > { %v433_v3 = vrot.slane %v405_v2, 6  ;;  %v416_v4 = vld [vmem:[%s388_s18] sm:$0xff]  ;;  %v453_v5 = vrot.slane %v405_v2, 4  ;;  %s876_s18 = sshll.u32 %s355_s17, 6 }
  0x1f   : > { %s1271_s21 = scalar_lea.vmem [#allocation2], %s876_s18 }
  0x20   : > { %442 = vrot.lane.b32.xlu2 %v433_v3, %s1041_s26 }
  0x24   : > { %v412_v6 = vld.sshfl [vmem:[#allocation1 + $0x10] sm:$0xff pattern:$0x73625140]  ;;  %v1160_v7 = vld.sshfl [vmem:[#allocation1 + $0x18] sm:$0xff pattern:$0x73625140] }
  0x25   : > { %v451_v8 = vrot.slane %v412_v6, 4  ;;  %v431_v9 = vrot.slane %v412_v6, 6  ;;  %v1162_v10 = vld.sshfl [vmem:[#allocation1] sm:$0xff pattern:$0x73625140]  ;;  %v452_v12 = vrot.slane %v1160_v7, 4 }
  0x26   : > { %v1164_v11 = vld.sshfl [vmem:[#allocation1 + $0x8] sm:$0xff pattern:$0x73625140]  ;;  %v432_v13 = vrot.slane %v1160_v7, 6  ;;  %v429_v15 = vrot.slane %v1162_v10, 6  ;;  %v449_v18 = vrot.slane %v1162_v10, 4 }
  0x27   : > { %458 = vrot.lane.b32.xlu0 %v451_v8, %s1042_s25  ;;  %438 = vrot.lane.b32.xlu1 %v431_v9, %s1041_s26  ;;  %419 = vst [vmem:[#allocation1] ss:$4 sm:$0xff] %v416_v4  ;;  %v450_v19 = vrot.slane %v1164_v11, 4  ;;  %v430_v21 = vrot.slane %v1164_v11, 6 }
  0x28   : > { %462 = vrot.lane.b32.xlu2 %v453_v5, %s1042_s25 }
  0x2e   : > { %v1169_v14 = vld.sshfl [vmem:[#allocation1 + $0x10] sm:$0xff pattern:$0x73625140]  ;;  %v426_v16 = vld.sshfl [vmem:[#allocation1 + $0x18] sm:$0xff pattern:$0x73625140] }
  0x2f   : > { %460 = vrot.lane.b32.xlu1 %v452_v12, %s1042_s25  ;;  %478 = vrot.lane.b32.xlu0 %v1169_v14, %s1041_s26  ;;  %v1175_v17 = vld.sshfl [vmem:[#allocation1 + $0x8] sm:$0xff pattern:$0x73625140]  ;;  %v1183_v20 = vld.sshfl [vmem:[#allocation1] sm:$0xff pattern:$0x73625140] }
  0x30   : > { %440 = vrot.lane.b32.xlu2 %v432_v13, %s1041_s26  ;;  %v471_v43 = vrot.slane %v1169_v14, 2  ;;  %v472_v47 = vrot.slane %v426_v16, 2  ;;  %v470_v62 = vrot.slane %v1175_v17, 2  ;;  %v469_v63 = vrot.slane %v1183_v20, 2  ;;  %v921_v13 = vld [vmem:[%s1346_s4 + $0x8] sm:$0xff] }
  0x37   : > { %480 = vrot.lane.b32.xlu0 %v426_v16, %s1041_s26  ;;  %476 = vrot.lane.b32.xlu1 %v1175_v17, %s1041_s26  ;;  %v658_v16 = vstv %s901_s16 }
  0x38   : > { %434 = vrot.lane.b32.xlu2 %v429_v15, %s1041_s26 }
  0x3f   : > { %474 = vrot.lane.b32.xlu0 %v1183_v20, %s1041_s26  ;;  %454 = vrot.lane.b32.xlu1 %v449_v18, %s1042_s25 }
  0x40   : > { %456 = vrot.lane.b32.xlu2 %v450_v19, %s1042_s25  ;;  %s708_s25 = sadd.s32 (%p1125_p5), %s904_s23, %s1139_s13 }
  0x41   : > { %s905_s28 = sshll.u32 (%p1125_p5), %s708_s25, 2 }
  0x42   : > { %s710_s8 = scalar_lea.vmem (%p1125_p5), %s1348_s6, %s905_s28 }
  0x47   : > { %436 = vrot.lane.b32.xlu0 %v430_v21, %s1041_s26  ;;  %534 = vperm.xlu1 %983, %v524_v30  }
  0x48   : > { %539 = vperm.xlu2 %984, %v525_v57  }
  0x4f   : > { %529 = vperm.xlu0 %982, %v523_v31   ;;  %544 = vperm.xlu1 %983, %v526_v56  }
  0x7a   : > { %v443_v23 = vpop.permute.xlu2 %442 }
  0x82   : > { %v463_v26 = vpop.permute.xlu2 %462 }
  0x8a   : > { %v441_v29 = vpop.permute.xlu2 %440 }
  0x8b   : > { %v448_v34 = vsel %vm444_vm0, %v441_v29, %v443_v23 }
  0x8c   : > { %v496_v48 = vsel %vm488_vm1, %v1160_v7, %v448_v34 }
  0x8e   : > { %v483_v22 = vpop.permute.xlu1 %482 }
  0x92   : > { %v435_v51 = vpop.permute.xlu2 %434 }
  0x99   : > { %v1189_v24 = vpop.permute.xlu0 %458  ;;  %v1191_v25 = vpop.permute.xlu1 %438 }
  0x9a   : > { %v447_v33 = vsel %vm444_vm0, %v1191_v25, %v441_v29  ;;  %v457_v61 = vpop.permute.xlu2 %456 }
  0x9b   : > { %v494_v35 = vsel %vm488_vm1, %v412_v6, %v447_v33  ;;  %v466_v4 = vsel %vm464_vm2, %v457_v61, %v1189_v24 }
  0xa1   : > { %v461_v27 = vpop.permute.xlu1 %460  ;;  %v479_v28 = vpop.permute.xlu0 %478 }
  0xa2   : > { %v467_v36 = vsel %vm464_vm2, %v1189_v24, %v461_v27  ;;  %v468_v39 = vsel %vm464_vm2, %v461_v27, %v463_v26 }
  0xa3   : > { %v503_v49 = vsel %vm497_vm3, %v494_v35, %v467_v36  ;;  %v505_v50 = vsel %vm497_vm3, %v496_v48, %v468_v39 }
  0xa4   : > { %v514_v52 = vsel %vm506_vm4, %v503_v49, %v471_v43  ;;  %v517_v54 = vsel %vm506_vm4, %v505_v50, %v472_v47 }
  0xa9   : > { %v481_v37 = vpop.permute.xlu0 %480  ;;  %v477_v38 = vpop.permute.xlu1 %476 }
  0xaa   : > { %v485_v40 = vsel %vm444_vm0, %v477_v38, %v479_v28  ;;  %v486_v41 = vsel %vm444_vm0, %v479_v28, %v481_v37  ;;  %v487_v42 = vsel %vm444_vm0, %v481_v37, %v483_v22 }
  0xab   : > { %v568_v44 = vsel %vm488_vm1, %v485_v40, 0  ;;  %v571_v45 = vsel %vm488_vm1, %v486_v41, 0  ;;  %v574_v46 = vsel %vm488_vm1, %v487_v42, 0 }
  0xac   : > { %601 = vmatpush.bf16.msra.mxu1 %v568_v44  ;;  %620 = vmatpush.bf16.msra.mxu2 %v571_v45  ;;  %v540_v45 = vpop.permute.xlu2 %539 }
  0xad   : > { %639 = vmatpush.bf16.msra.mxu3 %v574_v46 }
  0xb0   : > { %621 = vmatpush.bf16.msra.mxu2 %v514_v52 }
  0xb1   : > { %640 = vmatpush.bf16.msra.mxu3 %v517_v54  ;;  %v475_v55 = vpop.permute.xlu0 %474  ;;  %v455_v60 = vpop.permute.xlu1 %454 }
  0xb2   : > { %v484_v58 = vsel %vm444_vm0, %v475_v55, %v477_v38  ;;  %v465_v1 = vsel %vm464_vm2, %v455_v60, %v457_v61 }
  0xb3   : > { %897 = vmatmul.msk.bf16.vlgmr.msra.gmra.mxu2 %vm557_vm5, %v920_v53  ;;  %v565_v59 = vsel %vm488_vm1, %v484_v58, 0 }
  0xb4   : > { %899 = vmatmul.msk.bf16.vlgmr.msra.gmra.mxu3 %vm557_vm5, %v920_v53  ;;  %582 = vmatpush.bf16.msra.mxu0 %v565_v59 }
  0xb9   : > { %v437_v0 = vpop.permute.xlu0 %436  ;;  %v535_v30 = vpop.permute.xlu1 %534 }
  0xba   : > { %v445_v2 = vsel %vm444_vm0, %v435_v51, %v437_v0  ;;  %v446_v3 = vsel %vm444_vm0, %v437_v0, %v1191_v25 }
  0xbb   : > { %v490_v5 = vsel %vm488_vm1, %v1162_v10, %v445_v2  ;;  %v492_v6 = vsel %vm488_vm1, %v1164_v11, %v446_v3  ;;  %v653_v10 = vlaneseq }
  0xbc   : > { %v499_v7 = vsel %vm497_vm3, %v490_v5, %v465_v1  ;;  %v501_v8 = vsel %vm497_vm3, %v492_v6, %v466_v4 }
  0xbd   : > { %v508_v9 = vsel %vm506_vm4, %v499_v7, %v469_v63  ;;  %v511_v12 = vsel %vm506_vm4, %v501_v8, %v470_v62  ;;  %v654_v11 = vand.u32 127, %v653_v10 }
  0xbe   : > { %583 = vmatpush.bf16.msra.mxu0 %v508_v9  ;;  %602 = vmatpush.bf16.msra.mxu1 %v511_v12 }
  0xbf   : > { %v656_v14 = vadd.s32 256, %v654_v11  ;;  %v657_v15 = vadd.s32 384, %v654_v11  ;;  %v655_v21 = vadd.s32 128, %v654_v11  ;;  %v659_v29 = vadd.s32 %v658_v16, %v654_v11 }
  0xc1   : > { %893 = vmatmul.msk.bf16.vlgmr.msra.gmra.mxu0 %vm557_vm5, %v920_v53  ;;  %895 = vmatmul.msk.bf16.vlgmr.msra.gmra.mxu1 %vm557_vm5, %v920_v53  ;;  %v1258_v17 = vadd.s32 %v658_v16, %v656_v14  ;;  %v1260_v18 = vadd.s32 %v658_v16, %v657_v15  ;;  %v530_v19 = vpop.permute.xlu0 %529  ;;  %v1269_v27 = vadd.s32 %v658_v16, %v655_v21  ;;  %vm663_vm9 = vcmp.lt.s32.totalorder %v659_v29, 548  ;;  %v545_v60 = vpop.permute.xlu1 %544 }
  0xc3   : > { %898 = vmatmul.msk.bf16.gmra.mxu2 %vm557_vm5, %v921_v13  ;;  %vm665_vm6 = vcmp.lt.s32.totalorder %v1258_v17, 548  ;;  %vm666_vm7 = vcmp.lt.s32.totalorder %v1260_v18, 548  ;;  %vm664_vm8 = vcmp.lt.s32.totalorder %v1269_v27, 548 }
  0xc4   : > { %900 = vmatmul.msk.bf16.gmra.mxu3 %vm557_vm5, %v921_v13 }
  0xd1   : > { %894 = vmatmul.msk.bf16.gmra.mxu0 %vm557_vm5, %v921_v13  ;;  %896 = vmatmul.msk.bf16.gmra.mxu1 %vm557_vm5, %v921_v13 }
 0x136   : > { %v623_v20 = vpop.f32.mrf.mxu2 }
 0x137   : > { %v642_v22 = vpop.f32.mrf.mxu3  ;;  %v624_v23 = vadd.f32 %v623_v20, %v530_v19 }
 0x138   : > { %v643_v24 = vadd.f32 %v642_v22, %v530_v19 }
 0x139   : > { %v669_v25 = vsel %vm665_vm6, %v624_v23, 0.0 }
 0x13a   : > { %v670_v26 = vsel %vm666_vm7, %v643_v24, 0.0 }
 0x13b   : > { %v684_v28 = vpack.c.bf16 %v670_v26, %v669_v25 }
 0x13d   : > { %692 = vst [vmem:[%s1271_s21 + $0x8] sm:$0xff] %v684_v28 }
 0x13e   : > { %v625_v31 = vpop.f32.mrf.mxu2  ;;  %v604_v32 = vpop.f32.mrf.mxu1 }
 0x13f   : > { %v644_v33 = vpop.f32.mrf.mxu3  ;;  %v626_v34 = vadd.f32 %v625_v31, %v535_v30  ;;  %v605_v35 = vadd.f32 %v604_v32, %v530_v19  ;;  %v585_v36 = vpop.f32.mrf.mxu0 }
 0x140   : > { %v645_v37 = vadd.f32 %v644_v33, %v535_v30  ;;  %v586_v38 = vadd.f32 %v585_v36, %v530_v19 }
 0x141   : > { %v673_v39 = vsel %vm665_vm6, %v626_v34, 0.0  ;;  %v668_v40 = vsel %vm664_vm8, %v605_v35, 0.0 }
 0x142   : > { %v674_v41 = vsel %vm666_vm7, %v645_v37, 0.0  ;;  %v667_v42 = vsel %vm663_vm9, %v586_v38, 0.0 }
 0x143   : > { %v686_v43 = vpack.c.bf16 %v674_v41, %v673_v39  ;;  %v683_v44 = vpack.c.bf16 %v668_v40, %v667_v42 }
 0x144   : > { %v725_v19 = vld [vmem:[%s1271_s21 + $0x8] sm:$0xff] (%p1125_p5) }
 0x145   : > { %694 = vst [vmem:[%s1271_s21 + $0x18] sm:$0xff] %v686_v43 }
 0x146   : > { %691 = vst [vmem:[%s1271_s21] sm:$0xff] %v683_v44  ;;  %v606_v46 = vpop.f32.mrf.mxu1  ;;  %v628_v47 = vpop.f32.mrf.mxu2 }
 0x147   : > { %v587_v48 = vpop.f32.mrf.mxu0  ;;  %v607_v49 = vadd.f32 %v606_v46, %v535_v30  ;;  %v647_v50 = vpop.f32.mrf.mxu3  ;;  %v629_v51 = vadd.f32 %v628_v47, %v540_v45  ;;  %726 = vst [vmem:[%s710_s8 + $0x8] sm:$0xff] (%p1125_p5), %v725_v19 }
 0x148   : > { %v588_v52 = vadd.f32 %v587_v48, %v535_v30  ;;  %v648_v53 = vadd.f32 %v647_v50, %v540_v45 }
 0x149   : > { %v672_v54 = vsel %vm664_vm8, %v607_v49, 0.0  ;;  %v677_v55 = vsel %vm665_vm6, %v629_v51, 0.0 }
 0x14a   : > { %v671_v56 = vsel %vm663_vm9, %v588_v52, 0.0  ;;  %v678_v57 = vsel %vm666_vm7, %v648_v53, 0.0 }
 0x14b   : > { %v685_v58 = vpack.c.bf16 %v672_v54, %v671_v56  ;;  %v688_v59 = vpack.c.bf16 %v678_v57, %v677_v55 }
 0x14c   : > { %v729_v21 = vld [vmem:[%s1271_s21 + $0x18] sm:$0xff] (%p1125_p5) }
 0x14d   : > { %693 = vst [vmem:[%s1271_s21 + $0x10] sm:$0xff] %v685_v58  ;;  %v723_v18 = vld [vmem:[%s1271_s21] sm:$0xff] (%p1125_p5) }
 0x14e   : > { %696 = vst [vmem:[%s1271_s21 + $0x28] sm:$0xff] %v688_v59  ;;  %v630_v61 = vpop.f32.mrf.mxu2  ;;  %v609_v62 = vpop.f32.mrf.mxu1 }
 0x14f   : > { %v649_v63 = vpop.f32.mrf.mxu3  ;;  %v631_v0 = vadd.f32 %v630_v61, %v545_v60  ;;  %v590_v1 = vpop.f32.mrf.mxu0  ;;  %v610_v2 = vadd.f32 %v609_v62, %v540_v45  ;;  %724 = vst [vmem:[%s710_s8] sm:$0xff] (%p1125_p5), %v723_v18 }
 0x150   : > { %v650_v3 = vadd.f32 %v649_v63, %v545_v60  ;;  %v591_v4 = vadd.f32 %v590_v1, %v540_v45  ;;  %730 = vst [vmem:[%s710_s8 + $0x28] sm:$0xff] (%p1125_p5), %v729_v21 }
 0x151   : > { %v681_v5 = vsel %vm665_vm6, %v631_v0, 0.0  ;;  %v676_v6 = vsel %vm664_vm8, %v610_v2, 0.0 }
 0x152   : > { %v682_v7 = vsel %vm666_vm7, %v650_v3, 0.0  ;;  %v675_v8 = vsel %vm663_vm9, %v591_v4, 0.0 }
 0x153   : > { %v690_v9 = vpack.c.bf16 %v682_v7, %v681_v5  ;;  %v687_v12 = vpack.c.bf16 %v676_v6, %v675_v8 }
 0x154   : > { %v727_v20 = vld [vmem:[%s1271_s21 + $0x10] sm:$0xff] (%p1125_p5) }
 0x155   : > { %698 = vst [vmem:[%s1271_s21 + $0x38] sm:$0xff] %v690_v9  ;;  %v733_v23 = vld [vmem:[%s1271_s21 + $0x28] sm:$0xff] (%p1125_p5) }
 0x156   : > { %695 = vst [vmem:[%s1271_s21 + $0x20] sm:$0xff] %v687_v12  ;;  %v611_v13 = vpop.f32.mrf.mxu1 }
 0x157   : > { %v592_v10 = vpop.f32.mrf.mxu0  ;;  %v612_v11 = vadd.f32 %v611_v13, %v545_v60  ;;  %728 = vst [vmem:[%s710_s8 + $0x20] sm:$0xff] (%p1125_p5), %v727_v20 }
 0x158   : > { %v593_v14 = vadd.f32 %v592_v10, %v545_v60  ;;  %734 = vst [vmem:[%s710_s8 + $0x48] sm:$0xff] (%p1125_p5), %v733_v23 }
 0x159   : > { %v680_v15 = vsel %vm664_vm8, %v612_v11, 0.0  ;;  %705 = sbr.rel (!%p1125_p5) target bundleno = 358 (0x166), region = 48 }
 0x15a   : > { %v679_v16 = vsel %vm663_vm9, %v593_v14, 0.0 }
 0x15b   : > { %v689_v17 = vpack.c.bf16 %v680_v15, %v679_v16 }
 0x15c   : > { %v737_v25 = vld [vmem:[%s1271_s21 + $0x38] sm:$0xff] (%p1125_p5) }
 0x15d   : > { %697 = vst [vmem:[%s1271_s21 + $0x30] sm:$0xff] %v689_v17  ;;  %v731_v22 = vld [vmem:[%s1271_s21 + $0x20] sm:$0xff] (%p1125_p5) }
 0x15e   : > { %732 = vst [vmem:[%s710_s8 + $0x40] sm:$0xff] %v731_v22 }
 0x15f   : > { %738 = vst [vmem:[%s710_s8 + $0x68] sm:$0xff] %v737_v25 }
 0x164   : > { %v735_v24 = vld [vmem:[%s1271_s21 + $0x30] sm:$0xff] }
 0x165   : > { %736 = vst [vmem:[%s710_s8 + $0x60] sm:$0xff] %v735_v24 }
 0x166 PF: > { %s16_s27 = sadd.s32 1, %s1039_s27   ;;  %s1358_s23 = sld [smem:[#allocation3_spill]] }
 0x167   : > { %p13_p12 = scmp.ge.s32.totalorder %s16_s27, 6   ;;  %s1359_s24 = sld [smem:[#allocation4_spill]] }
 0x168   : > { %s1360_s25 = sld [smem:[#allocation5_spill]]  ;;  %s1362_s21 = smov %s1019_s22 }
 0x169   : > { %s1361_s26 = sld [smem:[#allocation6_spill]]  ;;  %s1363_s22 = smov %s1136_s12 }
 0x16a   :  { %15 = sbr.rel (!%p13_p12) target bundleno = 4 (0x4), region = 106 }

// kernel: tds_forward_pallas.5
= control target key start
LH: loop header
LB: loop body
LE: loop exit
PB: predicated region body
PF: predicated region fallthrough
CT: control target
= control target key end

     0   :  { %s3042_s0 = inlined_call_operand.vmem [shape: bf16[2,32,1024], index: 0, kind: input, shape index: {}, may-alias: {0,1,2}]   ;;  %s3043_s1 = inlined_call_operand.vmem [shape: bf16[2,32,1024], index: 1, kind: input, shape index: {}, may-alias: {0,1,2}]   ;;  %s3044_s2 = inlined_call_operand.vmem [shape: bf16[2,32,1024], index: 2, kind: input, shape index: {}, may-alias: {0,1,2}]   ;;  %s3045_s3 = inlined_call_operand.vmem [shape: bf16[32,160], index: 3, kind: input, shape index: {}]   ;;  %s3046_s4 = inlined_call_operand.vmem [shape: f32[32,1], index: 4, kind: input, shape index: {}]   ;;  %s3047_s5 = inlined_call_operand.vmem [shape: bf16[32,32], index: 5, kind: input, shape index: {}]   ;;  %s3048_s6 = inlined_call_operand.vmem [shape: f32[32,1], index: 6, kind: input, shape index: {}]   ;;  %s3049_s7 = inlined_call_operand.vmem [shape: bf16[32,32], index: 7, kind: input, shape index: {}]   ;;  %s3050_s8 = inlined_call_operand.vmem [shape: f32[32,1], index: 8, kind: input, shape index: {}]   ;;  %s3051_s9 = inlined_call_operand.<no memory space> [shape: f32[1], index: 9, kind: input, shape index: {}]   ;;  %s3052_s10 = inlined_call_operand.vmem [shape: bf16[2,32,1024], index: 10, kind: output, shape index: {}]  }
   0x1   :  { %3060 = sst [smem:[#allocation14_spill]] %s3047_s5 }
   0x2   :  { %3061 = sst [smem:[#allocation15_spill]] %s3049_s7 }
   0x3   :  { %3062 = sst [smem:[#allocation16_spill]] %s3050_s8 }
   0x4   :  { %3063 = sst [smem:[#allocation17_spill]] %s3052_s10 }
   0x5   :  { %15 = sst [smem:[#allocation2]] %s3051_s9 }
   0x6   :  { %s2158_s15 = smov 0   ;;  %s2160_s16 = smov 0  }
   0x7   :  { %s2162_s17 = smov 0   ;;  %s2164_s18 = smov 0  }
   0x8   :  { %s2166_s19 = smov 0   ;;  %s2168_s20 = smov 0  }
   0x9   :  { %s2170_s21 = smov 0   ;;  %s2172_s22 = smov 0  }
   0xa   :  { %s2174_s23 = smov 0   ;;  %s2176_s24 = smov 0  }
   0xb   :  { %s2178_s9 = smov 0  }
   0xc LB: > { %3064 = sst [smem:[#allocation7_spill]] %s2080_s22  ;;  %s30_s25 = sadd.s32 1, %s2084_s23  ;;  %s2092_s9 = sphi %s2178_s9, %s21_s9   ;;  %s2088_s24 = sphi %s2176_s24, %s3101_s24   ;;  %s2084_s23 = sphi %s2174_s23, %s3100_s23   ;;  %s2080_s22 = sphi %s2172_s22, %s3099_s22   ;;  %s2076_s21 = sphi %s2170_s21, %s3098_s21   ;;  %s2072_s20 = sphi %s2168_s20, %s3097_s20   ;;  %s2068_s19 = sphi %s2166_s19, %s3096_s19   ;;  %s2064_s18 = sphi %s2164_s18, %s3095_s18   ;;  %s2060_s17 = sphi %s2162_s17, %s3094_s17   ;;  %s2056_s16 = sphi %s2160_s16, %s3093_s16   ;;  %s2052_s15 = sphi %s2158_s15, %s3092_s15  }
   0xd   : > { %3065 = sst [smem:[#allocation8_spill]] %s2084_s23  ;;  %p31_p0 = scmp.ge.s32.totalorder %s30_s25, 2 }
   0xe   : > { %s33_s26 = sadd.s32 1, %s2088_s24  ;;  %s2216_s27 = sshll.u32 %s2084_s23, 2 }
   0xf   : > { %s50_s28 = sadd.s32 1, %s2072_s20  ;;  %s3103_s25 = smov (%p31_p0, %s30_s25), 0 }
  0x10   : > { %3066 = sst [smem:[#allocation9_spill]] %s3103_s25  ;;  %s3105_s26 = smov (!%p31_p0, %s33_s26), %s2088_s24 }
  0x11   : > { %s1757_s29 = sadd.s32 4294967295, %s2216_s27  ;;  %s1758_s30 = sshll.u32 %s3103_s25, 2 }
  0x12   : > { %p35_p1 = scmp.ge.s32.totalorder %s3105_s26, 2  ;;  %p39_p2 = scmp.gt.s32.totalorder %s1757_s29, 0 }
  0x13   : > { %s1759_s11 = sadd.s32 4294967295, %s1758_s30  ;;  %p57_p3 = scmp.ne.s32.totalorder %s2072_s20, %s2068_s19 }
  0x14   : > { %s3107_s26 = smov (%p35_p1, %s3105_s26), 0  ;;  %s3109_s29 = smov (!%p39_p2, %s1757_s29), 0 }
  0x15   : > { %3067 = sst [smem:[#allocation10_spill]] %s3107_s26  ;;  %p43_p4 = scmp.gt.s32.totalorder %s1759_s11, 0 }
  0x16   : > { %s45_s12 = ssub.s32 %s2088_s24, %s3107_s26  ;;  %p58_p5 = scmp.eq.s32.totalorder %s2092_s9, 0 }
  0x17   : > { %s74_s13 = ssub.s32 %s2084_s23, %s3103_s25  ;;  %s3111_s11 = smov (!%p43_p4, %s1759_s11), 0 }
  0x18   : > { %p2237_p6 = por %p58_p5, %p57_p3  ;;  %s75_s10 = sor.u32 %s74_s13, %s45_s12 }
  0x19   : > { %s46_s22 = ssub.s32 %s3109_s29, %s3111_s11  ;;  %p76_p7 = scmp.eq.s32.totalorder %s75_s10, 0 }
  0x1a   : > { %s47_s7 = sor.u32 %s46_s22, %s45_s12  ;;  %s78_s5 = sadd.s32 1, %s2064_s18 }
  0x1b   : > { %p48_p8 = scmp.eq.s32.totalorder %s47_s7, 0  ;;  %p85_p9 = scmp.ne.s32.totalorder %s2064_s18, %s2060_s17 }
  0x1c   : > { %s2246_s26 = scalar_select %p76_p7, %s2064_s18, %s78_s5  }
  0x1d   : > { %s2249_s25 = scalar_select %p48_p8, %s2072_s20, %s50_s28  }
  0x1e   : > { %3069 = sst [smem:[#allocation11_spill]] %s2246_s26  ;;  %p2256_p10 = por %p85_p9, %p58_p5 }
  0x1f   : > { %3070 = sst [smem:[#allocation12_spill]] %s2249_s25  ;;  %s1878_s10 = sadd.s32 4, %s2216_s27 }
  0x20   : > { %p103_p11 = scmp.lt.s32.totalorder %s1878_s10, 7  ;;  %s1880_s22 = sadd.s32 4, %s1758_s30 }
  0x21   : > { %s1754_s11 = sadd.s32 4294967295, %s2092_s9   ;;  %p107_p12 = scmp.lt.s32.totalorder %s1880_s22, 7 }
  0x22   : > { %s3113_s10 = smov (!%p103_p11, %s1878_s10), 7  ;;  %p121_p13 = scmp.ne.s32.totalorder %s2056_s16, %s2052_s15 }
  0x23   : > { %s3115_s22 = smov (!%p107_p12, %s1880_s22), 7  ;;  %p300_p0 = scmp.eq.s32.totalorder %s1754_s11, 3 }
  0x24   : > { %s110_s5 = ssub.s32 %s3113_s10, %s3115_s22  ;;  %s114_s7 = sadd.s32 1, %s2056_s16 }
  0x25   : > { %s111_s28 = sor.u32 %s110_s5, %s45_s12  ;;  %p2270_p1 = por %p121_p13, %p58_p5 }
  0x26   : > { %p112_p2 = scmp.eq.s32.totalorder %s111_s28, 0  ;;  %p2277_p3 = por %p300_p0, %p85_p9 }
  0x27   : > { %p1763_p4 = scmp.ge.s32.totalorder %s2092_s9, 4 }
  0x28   : > { %s3073_s30 = scalar_select %p2277_p3, 1, 0 }
  0x29   : > { %s2282_s25 = scalar_select %p112_p2, %s2056_s16, %s114_s7  }
  0x2a   : > { %3074 = sst [smem:[#allocation13_spill]] %s3073_s30  ;;  %343 = sbr.rel (%p1763_p4) target bundleno = 81 (0x51), region = 44 }
  0x2f   : > { %346 = sbr.rel (!%p2237_p6) target bundleno = 57 (0x39), region = 48  ;;  %s348_s12 = sand.u32 (%p2237_p6), 1, %s2072_s20  }
  0x30   : > { %s1767_s22 = sshll.u32 (%p2237_p6), %s2088_s24, 5  ;;  %s1764_s11 = sshll.u32 (%p2237_p6), %s348_s12, 4 }
  0x31   : > { %s356_s5 = sadd.s32 (%p2237_p6), %s1767_s22, %s3109_s29  ;;  %s350_s7 = scalar_lea.vmem (%p2237_p6), [#allocation3], %s1764_s11 }
  0x32   : > { %s1768_s28 = sshll.u32 (%p2237_p6), %s356_s5, 2 }
  0x33   : > { %s358_s30 = scalar_lea.vmem (%p2237_p6), %s3042_s0, %s1768_s28 }
  0x34   : > { %v375_v0 = vld [vmem:[%s358_s30] sm:$0xf] }
  0x35   : > { %v377_v1 = vld [vmem:[%s358_s30 + $0x20] sm:$0xf]  ;;  %376 = vst [vmem:[%s350_s7] sm:$0xf] %v375_v0 }
  0x36   : > { %v379_v2 = vld [vmem:[%s358_s30 + $0x40] sm:$0xf]  ;;  %378 = vst [vmem:[%s350_s7 + $0x4] sm:$0xf] %v377_v1 }
  0x37   : > { %v381_v3 = vld [vmem:[%s358_s30 + $0x60] sm:$0xf]  ;;  %380 = vst [vmem:[%s350_s7 + $0x8] sm:$0xf] %v379_v2 }
  0x38   : > { %382 = vst [vmem:[%s350_s7 + $0xc] sm:$0xf] %v381_v3 }
  0x39 PF: > { %414 = sbr.rel (!%p2256_p10) target bundleno = 71 (0x47), region = 89  ;;  %s416_s29 = sand.u32 (%p2256_p10), 1, %s2064_s18  }
  0x3a   : > { %s1771_s14 = sshll.u32 (%p2256_p10), %s2088_s24, 5  ;;  %s1769_s8 = sshll.u32 (%p2256_p10), %s416_s29, 6 }
  0x3b   : > { %s421_s26 = sadd.s32 (%p2256_p10), %s1771_s14, %s2216_s27  ;;  %s418_s30 = scalar_lea.vmem (%p2256_p10), [#allocation4], %s1769_s8 }
  0x3c   : > { %s1772_s12 = sshll.u32 (%p2256_p10), %s421_s26, 2 }
  0x3d   : > { %s423_s11 = scalar_lea.vmem (%p2256_p10), %s3043_s1, %s1772_s12 }
  0x3e   : > { %v436_v4 = vld [vmem:[%s423_s11] sm:$0xff]  ;;  %v438_v5 = vld [vmem:[%s423_s11 + $0x8] sm:$0xff] }
  0x3f   : > { %v440_v6 = vld [vmem:[%s423_s11 + $0x20] sm:$0xff]  ;;  %437 = vst [vmem:[%s418_s30] sm:$0xff] %v436_v4  ;;  %v442_v7 = vld [vmem:[%s423_s11 + $0x28] sm:$0xff] }
  0x40   : > { %439 = vst [vmem:[%s418_s30 + $0x8] sm:$0xff] %v438_v5  ;;  %v444_v8 = vld [vmem:[%s423_s11 + $0x40] sm:$0xff]  ;;  %v446_v9 = vld [vmem:[%s423_s11 + $0x48] sm:$0xff] }
  0x41   : > { %441 = vst [vmem:[%s418_s30 + $0x10] sm:$0xff] %v440_v6  ;;  %v448_v10 = vld [vmem:[%s423_s11 + $0x60] sm:$0xff]  ;;  %v450_v11 = vld [vmem:[%s423_s11 + $0x68] sm:$0xff] }
  0x42   : > { %443 = vst [vmem:[%s418_s30 + $0x18] sm:$0xff] %v442_v7 }
  0x43   : > { %445 = vst [vmem:[%s418_s30 + $0x20] sm:$0xff] %v444_v8 }
  0x44   : > { %447 = vst [vmem:[%s418_s30 + $0x28] sm:$0xff] %v446_v9 }
  0x45   : > { %449 = vst [vmem:[%s418_s30 + $0x30] sm:$0xff] %v448_v10 }
  0x46   : > { %451 = vst [vmem:[%s418_s30 + $0x38] sm:$0xff] %v450_v11 }
  0x47 PF: > { %457 = sbr.rel (!%p2270_p1) target bundleno = 81 (0x51), region = 112  ;;  %s459_s27 = sand.u32 (%p2270_p1), 1, %s2056_s16  }
  0x48   : > { %s1775_s13 = sshll.u32 (%p2270_p1), %s2088_s24, 5  ;;  %s1773_s28 = sshll.u32 (%p2270_p1), %s459_s27, 4 }
  0x49   : > { %s467_s7 = sadd.s32 (%p2270_p1), %s1775_s13, %s3113_s10  ;;  %s461_s12 = scalar_lea.vmem (%p2270_p1), [#allocation5], %s1773_s28 }
  0x4a   : > { %s1776_s29 = sshll.u32 (%p2270_p1), %s467_s7, 2 }
  0x4b   : > { %s469_s26 = scalar_lea.vmem (%p2270_p1), %s3044_s2, %s1776_s29 }
  0x4c   : > { %v486_v12 = vld [vmem:[%s469_s26] sm:$0xf] }
  0x4d   : > { %v488_v13 = vld [vmem:[%s469_s26 + $0x20] sm:$0xf]  ;;  %487 = vst [vmem:[%s461_s12] sm:$0xf] %v486_v12 }
  0x4e   : > { %v490_v14 = vld [vmem:[%s469_s26 + $0x40] sm:$0xf]  ;;  %489 = vst [vmem:[%s461_s12 + $0x4] sm:$0xf] %v488_v13 }
  0x4f   : > { %v492_v15 = vld [vmem:[%s469_s26 + $0x60] sm:$0xf]  ;;  %491 = vst [vmem:[%s461_s12 + $0x8] sm:$0xf] %v490_v14 }
  0x50   : > { %493 = vst [vmem:[%s461_s12 + $0xc] sm:$0xf] %v492_v15 }
  0x51 PF: > { %p1777_p5 = scmp.ge.s32.totalorder %s2092_s9, 1  ;;  %p524_p6 = scmp.lt.s32.totalorder %s2092_s9, 5 }
  0x53   : > { %p525_p7 = pnand %p1777_p5, %p524_p6 }
  0x54   : > { %s538_s23 = sand.u32 (!%p525_p7), 1, %s2060_s17   ;;  %s2094_s17 = smov (!%p525_p7), 124  }
  0x55   : > { %528 = sbr.rel (%p525_p7) target bundleno = 985 (0x3d9), region = 153  ;;  %s2312_s10 = sshll.u32 (!%p525_p7), %s538_s23, 6 }
  0x56   : > { %s2315_s22 = scalar_lea.vmem (!%p525_p7), [#allocation4], %s2312_s10  ;;  %s2095_s5 = smov (!%p525_p7), 125  }
  0x57   : > { %s2096_s11 = smov (!%p525_p7), 126   ;;  %s2097_s30 = smov (!%p525_p7), 127  }
  0x58   : > { %p608_p8 = scmp.eq.s32.totalorder (!%p525_p7), %s2076_s21, 0  ;;  %s531_s27 = sand.u32 (!%p525_p7), 1, %s2068_s19  }
  0x59   : > { %s1778_s28 = sshll.u32 (!%p525_p7), %s531_s27, 4  ;;  %p620_p9 = scmp.eq.s32.totalorder (!%p525_p7), %s2076_s21, 1 }
  0x5a   : > { %v1808_v16 = vld [vmem:[%s2315_s22 + $0x28] sm:$0xf]  ;;  %v1890_v17 = vld [vmem:[%s2315_s22 + $0x34] sm:$0xf0]  ;;  %v1800_v18 = vld [vmem:[%s2315_s22 + $0x20] sm:$0xf] }
  0x5b   : > { %v2320_v19 = vor.u32 %v1890_v17, %v1808_v16  ;;  %v1889_v20 = vld [vmem:[%s2315_s22 + $0x2c] sm:$0xf0]  ;;  %v1883_v22 = vld [vmem:[%s2315_s22 + $0x4] sm:$0xf]  ;;  %v1786_v23 = vld [vmem:[%s2315_s22 + $0x10] sm:$0xf0] }
  0x5c   : > { %v2323_v21 = vor.u32 %v1889_v20, %v1800_v18  ;;  %v1784_v24 = vld [vmem:[%s2315_s22] sm:$0xf]  ;;  %v1885_v25 = vld [vmem:[%s2315_s22 + $0xc] sm:$0xf0]  ;;  %v2333_v26 = vor.u32 %v1883_v22, %v1786_v23  ;;  %v1887_v27 = vld [vmem:[%s2315_s22 + $0x24] sm:$0xf] }
  0x5d   : > { %779 = vrot.lane.b32.xlu1 %v2320_v19, %s2094_s17  ;;  %v1802_v28 = vld [vmem:[%s2315_s22 + $0x30] sm:$0xf0]  ;;  %v2339_v29 = vor.u32 %v1885_v25, %v1784_v24  ;;  %v1792_v30 = vld [vmem:[%s2315_s22 + $0x8] sm:$0xf]  ;;  %v1886_v31 = vld [vmem:[%s2315_s22 + $0x14] sm:$0xf0] }
  0x5e   : > { %775 = vrot.lane.b32.xlu0 %v2323_v21, %s2094_s17  ;;  %767 = vrot.lane.b32.xlu2 %v2333_v26, %s2094_s17  ;;  %v2343_v32 = vor.u32 %v1887_v27, %v1802_v28  ;;  %v2345_v33 = vor.u32 %v1886_v31, %v1792_v30  ;;  %v1888_v34 = vld [vmem:[%s2315_s22 + $0x2c] sm:$0xf]  ;;  %v1810_v35 = vld [vmem:[%s2315_s22 + $0x38] sm:$0xf0]  ;;  %s613_s13 = scalar_select %p608_p8, 1, 0 }
  0x5f   : > { %v2361_v36 = vor.u32 %v1888_v34, %v1810_v35  ;;  %v1884_v37 = vld [vmem:[%s2315_s22 + $0xc] sm:$0xf]  ;;  %v1794_v38 = vld [vmem:[%s2315_s22 + $0x18] sm:$0xf0]  ;;  %s545_s7 = sand.u32 1, %s2052_s15   ;;  %s533_s14 = scalar_lea.vmem [#allocation3], %s1778_s28 }
  0x60   : > { %v2371_v39 = vor.u32 %v1884_v37, %v1794_v38  ;;  %v614_v40 = vstv %s613_s13  ;;  %s625_s29 = scalar_select %p620_p9, 1, 0  ;;  %v611_v41 = vld [vmem:[%s533_s14 + $0x8] sm:$0xf]  ;;  %v612_v42 = vld [vmem:[%s533_s14 + $0xc] sm:$0xf] }
  0x61   : > { %vm2397_vm0 = vcmp.eq.s32.totalorder %v614_v40, 1  ;;  %s1780_s19 = sshll.u32 %s545_s7, 4  ;;  %v609_v44 = vld [vmem:[%s533_s14] sm:$0xf]  ;;  %v610_v45 = vld [vmem:[%s533_s14 + $0x4] sm:$0xf] }
  0x62   : > { %v618_v46 = vsel %vm2397_vm0, 0, %v611_v41  ;;  %v619_v47 = vsel %vm2397_vm0, 0, %v612_v42  ;;  %v626_v48 = vstv %s625_s29  ;;  %v616_v49 = vsel %vm2397_vm0, 0, %v609_v44  ;;  %s547_s15 = scalar_lea.vmem [#allocation5], %s1780_s19  ;;  %s2098_s8 = smov 2  }
  0x63   : > { %v617_v50 = vsel %vm2397_vm0, 0, %v610_v45  ;;  %v638_v51 = vunpack.c.l.b16 %v618_v46  ;;  %v639_v52 = vunpack.c.l.b16 %v619_v47  ;;  %v621_v53 = vld [vmem:[%s547_s15] sm:$0xf]  ;;  %v622_v54 = vld [vmem:[%s547_s15 + $0x4] sm:$0xf]  ;;  %vm2415_vm1 = vcmp.eq.s32.totalorder %v626_v48, 1 }
  0x64   : > { %v636_v56 = vunpack.c.l.b16 %v616_v49  ;;  %v637_v57 = vunpack.c.l.b16 %v617_v50  ;;  %v628_v59 = vsel %vm2415_vm1, 0, %v621_v53  ;;  %v629_v60 = vsel %vm2415_vm1, 0, %v622_v54  ;;  %v623_v0 = vld [vmem:[%s547_s15 + $0x8] sm:$0xf]  ;;  %v624_v1 = vld [vmem:[%s547_s15 + $0xc] sm:$0xf] }
  0x65   : > { %765 = vrot.lane.b32.xlu1 %v2339_v29, %s2094_s17  ;;  %v2421_v58 = vpack.c.b16 %v639_v52, %v638_v51  ;;  %v678_v62 = vunpack.c.l.b16 %v628_v59  ;;  %v679_v63 = vunpack.c.l.b16 %v629_v60  ;;  %v630_v3 = vsel %vm2415_vm1, 0, %v623_v0  ;;  %s3079_s15 = sld [smem:[#allocation16_spill]]  ;;  %s2927_s27 = scalar_lea.vmem [#allocation6], %s2312_s10 }
  0x66   : > { %777 = vrot.lane.b32.xlu0 %v2343_v32, %s2094_s17  ;;  %769 = vrot.lane.b32.xlu2 %v2345_v33, %s2094_s17  ;;  %v2427_v61 = vpack.c.b16 %v637_v57, %v636_v56  ;;  %v631_v4 = vsel %vm2415_vm1, 0, %v624_v1  ;;  %v680_v5 = vunpack.c.l.b16 %v630_v3  ;;  %vm785_vm2 = vcmask 1014784   ;;  %s794_s7 = sld [smem:[#allocation2]]  ;;  %s1872_s28 = sshll.u32 (%p2277_p3), %s2076_s21, 2 }
  0x67   : > { %v2435_v2 = vpack.c.b16 %v679_v63, %v678_v62  ;;  %v681_v6 = vunpack.c.l.b16 %v631_v4  ;;  %vm756_vm3 = vcmask 1022976   ;;  %vm729_vm4 = vcmask 1031168   ;;  %s3081_s14 = sld [smem:[#allocation14_spill]] }
  0x68   : > { %vm704_vm5 = vcmask 1039360   ;;  %vm941_vm6 = vcmask 15360   ;;  %vm1022_vm7 = vcmask 261120   ;;  %s3082_s23 = sld [smem:[#allocation15_spill]] }
  0x69   : > { %v683_v7 = vpack.c.b16 %v681_v6, %v680_v5  ;;  %s3085_s13 = sld [smem:[#allocation7_spill]] (%p2277_p3) }
  0x6a   : > { %s3086_s26 = sld [smem:[#allocation17_spill]] (%p2277_p3) }
  0x6d   : > { %748 = vrot.lane.b32.xlu1 %v2343_v32, %s2095_s5 }
  0x6e   : > { %746 = vrot.lane.b32.xlu0 %v2323_v21, %s2095_s5  ;;  %750 = vrot.lane.b32.xlu2 %v2320_v19, %s2095_s5 }
  0x75   : > { %736 = vrot.lane.b32.xlu1 %v2339_v29, %s2095_s5 }
  0x76   : > { %752 = vrot.lane.b32.xlu0 %v2361_v36, %s2095_s5  ;;  %738 = vrot.lane.b32.xlu2 %v2333_v26, %s2095_s5 }
  0x7d   : > { %742 = vrot.lane.b32.xlu1 %v2371_v39, %s2095_s5 }
  0x7e   : > { %740 = vrot.lane.b32.xlu0 %v2345_v33, %s2095_s5  ;;  %721 = vrot.lane.b32.xlu2 %v2323_v21, %s2096_s11 }
  0x85   : > { %725 = vrot.lane.b32.xlu1 %v2320_v19, %s2096_s11 }
  0x86   : > { %723 = vrot.lane.b32.xlu0 %v2343_v32, %s2096_s11  ;;  %727 = vrot.lane.b32.xlu2 %v2361_v36, %s2096_s11 }
  0x8d   : > { %715 = vrot.lane.b32.xlu1 %v2333_v26, %s2096_s11 }
  0x8e   : > { %713 = vrot.lane.b32.xlu0 %v2339_v29, %s2096_s11  ;;  %717 = vrot.lane.b32.xlu2 %v2345_v33, %s2096_s11 }
  0x95   : > { %696 = vrot.lane.b32.xlu1 %v2323_v21, %s2097_s30 }
  0x96   : > { %719 = vrot.lane.b32.xlu0 %v2371_v39, %s2096_s11  ;;  %698 = vrot.lane.b32.xlu2 %v2343_v32, %s2097_s30 }
  0x9d   : > { %702 = vrot.lane.b32.xlu1 %v2361_v36, %s2097_s30 }
  0x9e   : > { %700 = vrot.lane.b32.xlu0 %v2320_v19, %s2097_s30  ;;  %686 = vrot.lane.b32.xlu2 %v2339_v29, %s2097_s30 }
  0xa5   : > { %690 = vrot.lane.b32.xlu1 %v2345_v33, %s2097_s30 }
  0xa6   : > { %688 = vrot.lane.b32.xlu0 %v2333_v26, %s2097_s30  ;;  %692 = vrot.lane.b32.xlu2 %v2371_v39, %s2097_s30 }
  0xad   : > { %781 = vrot.lane.b32.xlu1 %v2361_v36, %s2094_s17 }
  0xae   : > { %694 = vrot.lane.b32.xlu0 %v2421_v58, %s2097_s30  ;;  %684 = vrot.lane.b32.xlu2 %v2427_v61, %s2097_s30  ;;  %s1870_s30 = sshll.u32 %s2076_s21, 9 }
  0xb5   : > { %744 = vrot.lane.b32.xlu1 %v2435_v2, %s2095_s5 }
  0xb6   : > { %771 = vrot.lane.b32.xlu0 %v2371_v39, %s2094_s17 }
  0xb8   : > { %v768_v8 = vpop.permute.xlu2 %767 }
  0xbe   : > { %754 = vrot.lane.b32.xlu0 %v683_v7, %s2095_s5  ;;  %s3083_s5 = smov %s3082_s23 }
  0xc0   : > { %v2446_v9 = vpop.permute.xlu2 %769 }
  0xc1   : > { %v787_v25 = vsel %vm785_vm2, %v768_v8, %v2446_v9 }
  0xc8   : > { %v751_v13 = vpop.permute.xlu2 %750 }
  0xcf   : > { %v2448_v10 = vpop.permute.xlu1 %779 }
  0xd0   : > { %v776_v11 = vpop.permute.xlu0 %775  ;;  %v739_v23 = vpop.permute.xlu2 %738 }
  0xd1   : > { %931 = vrot.lane.b32.xlu0 %v776_v11, %s2098_s8 }
  0xd7   : > { %v766_v12 = vpop.permute.xlu1 %765 }
  0xd8   : > { %v778_v14 = vpop.permute.xlu0 %777  ;;  %921 = vrot.lane.b32.xlu2 %v766_v12, %s2098_s8  ;;  %v786_v20 = vsel %vm785_vm2, %v766_v12, %v768_v8  ;;  %v722_v31 = vpop.permute.xlu2 %721 }
  0xd9   : > { %v790_v15 = vsel %vm785_vm2, %v776_v11, %v778_v14  ;;  %v791_v17 = vsel %vm785_vm2, %v778_v14, %v2448_v10 }
  0xda   : > { %933 = vrot.lane.b32.xlu1 %v790_v15, %s2098_s8 }
  0xdf   : > { %v749_v16 = vpop.permute.xlu1 %748 }
  0xe0   : > { %v747_v18 = vpop.permute.xlu0 %746  ;;  %935 = vrot.lane.b32.xlu2 %v791_v17, %s2098_s8  ;;  %v762_v27 = vsel %vm756_vm3, %v749_v16, %v751_v13  ;;  %v2478_v40 = vpop.permute.xlu2 %727 }
  0xe1   : > { %v761_v22 = vsel %vm756_vm3, %v747_v18, %v749_v16 }
  0xe2   : > { %923 = vrot.lane.b32.xlu1 %v786_v20, %s2098_s8  ;;  %913 = vrot.lane.b32.xlu0 %v761_v22, %s2098_s8 }
  0xe7   : > { %v737_v24 = vpop.permute.xlu1 %736 }
  0xe8   : > { %v2464_v28 = vpop.permute.xlu0 %752  ;;  %925 = vrot.lane.b32.xlu2 %v787_v25, %s2098_s8  ;;  %v757_v30 = vsel %vm756_vm3, %v737_v24, %v739_v23  ;;  %v718_v50 = vpop.permute.xlu2 %717 }
  0xe9   : > { %v763_v35 = vsel %vm756_vm3, %v751_v13, %v2464_v28 }
  0xea   : > { %915 = vrot.lane.b32.xlu1 %v762_v27, %s2098_s8  ;;  %903 = vrot.lane.b32.xlu0 %v757_v30, %s2098_s8 }
  0xef   : > { %v2470_v34 = vpop.permute.xlu1 %742 }
  0xf0   : > { %v741_v37 = vpop.permute.xlu0 %740  ;;  %917 = vrot.lane.b32.xlu2 %v763_v35, %s2098_s8  ;;  %v699_v54 = vpop.permute.xlu2 %698 }
  0xf1   : > { %v758_v38 = vsel %vm756_vm3, %v739_v23, %v741_v37  ;;  %v759_v42 = vsel %vm756_vm3, %v741_v37, %v2470_v34 }
  0xf2   : > { %905 = vrot.lane.b32.xlu1 %v758_v38, %s2098_s8  ;;  %911 = vrot.lane.b32.xlu0 %v747_v18, %s2098_s8 }
  0xf7   : > { %v726_v41 = vpop.permute.xlu1 %725 }
  0xf8   : > { %v724_v43 = vpop.permute.xlu0 %723  ;;  %907 = vrot.lane.b32.xlu2 %v759_v42, %s2098_s8  ;;  %v735_v44 = vsel %vm729_vm4, %v726_v41, %v2478_v40  ;;  %v687_v62 = vpop.permute.xlu2 %686 }
  0xf9   : > { %v733_v45 = vsel %vm729_vm4, %v722_v31, %v724_v43  ;;  %v734_v47 = vsel %vm729_vm4, %v724_v43, %v726_v41  ;;  %v1891_v43 = vld [vmem:[%s3045_s3 + $0x4] sm:$0xf] }
  0xfa   : > { %893 = vrot.lane.b32.xlu1 %v733_v45, %s2098_s8  ;;  %897 = vrot.lane.b32.xlu0 %v735_v44, %s2098_s8  ;;  %v1818_v44 = vld [vmem:[%s3045_s3 + $0x8] sm:$0xf0] }
  0xff   : > { %v716_v46 = vpop.permute.xlu1 %715 }
 0x100   : > { %v714_v48 = vpop.permute.xlu0 %713  ;;  %895 = vrot.lane.b32.xlu2 %v734_v47, %s2098_s8  ;;  %v731_v51 = vsel %vm729_vm4, %v716_v46, %v718_v50  ;;  %v2591_v47 = vor.u32 %v1891_v43, %v1818_v44 }
 0x101   : > { %v730_v49 = vsel %vm729_vm4, %v714_v48, %v716_v46 }
 0x102   : > { %901 = vrot.lane.b32.xlu1 %v737_v24, %s2098_s8  ;;  %883 = vrot.lane.b32.xlu0 %v730_v49, %s2098_s8 }
 0x107   : > { %v697_v53 = vpop.permute.xlu1 %696 }
 0x108   : > { %v720_v52 = vpop.permute.xlu0 %719  ;;  %783 = vrot.lane.b32.xlu2 %v683_v7, %s2094_s17  ;;  %v710_v60 = vsel %vm704_vm5, %v697_v53, %v699_v54 }
 0x109   : > { %v732_v55 = vsel %vm729_vm4, %v718_v50, %v720_v52 }
 0x10a   : > { %885 = vrot.lane.b32.xlu1 %v731_v51, %s2098_s8  ;;  %891 = vrot.lane.b32.xlu0 %v722_v31, %s2098_s8 }
 0x10f   : > { %v703_v59 = vpop.permute.xlu1 %702 }
 0x110   : > { %v701_v56 = vpop.permute.xlu0 %700  ;;  %887 = vrot.lane.b32.xlu2 %v732_v55, %s2098_s8  ;;  %v1826_v55 = vld [vmem:[%s3045_s3 + $0x18] sm:$0xf0] }
 0x111   : > { %v711_v57 = vsel %vm704_vm5, %v699_v54, %v701_v56  ;;  %v712_v63 = vsel %vm704_vm5, %v701_v56, %v703_v59  ;;  %v1893_v54 = vld [vmem:[%s3045_s3 + $0x14] sm:$0xf] }
 0x112   : > { %773 = vrot.lane.b32.xlu1 %v2435_v2, %s2094_s17  ;;  %875 = vrot.lane.b32.xlu0 %v711_v57, %s2098_s8  ;;  %v693_v2 = vpop.permute.xlu2 %692 }
 0x117   : > { %v691_v3 = vpop.permute.xlu1 %690 }
 0x118   : > { %v689_v0 = vpop.permute.xlu0 %688  ;;  %873 = vrot.lane.b32.xlu2 %v710_v60, %s2098_s8  ;;  %v708_v7 = vsel %vm704_vm5, %v691_v3, %v693_v2 }
 0x119   : > { %v706_v1 = vsel %vm704_vm5, %v687_v62, %v689_v0  ;;  %v707_v4 = vsel %vm704_vm5, %v689_v0, %v691_v3 }
 0x11a   : > { %877 = vrot.lane.b32.xlu1 %v712_v63, %s2098_s8  ;;  %863 = vrot.lane.b32.xlu0 %v706_v1, %s2098_s8  ;;  %v685_v12 = vpop.permute.xlu2 %684 }
 0x11b   : > { %v705_v15 = vsel %vm704_vm5, %v685_v12, %v687_v62 }
 0x11f   : > { %v782_v8 = vpop.permute.xlu1 %781 }
 0x120   : > { %v695_v5 = vpop.permute.xlu0 %694  ;;  %881 = vrot.lane.b32.xlu2 %v714_v48, %s2098_s8  ;;  %v792_v11 = vsel %vm785_vm2, %v2448_v10, %v782_v8 }
 0x121   : > { %v709_v6 = vsel %vm704_vm5, %v695_v5, %v697_v53 }
 0x122   : > { %865 = vrot.lane.b32.xlu1 %v707_v4, %s2098_s8  ;;  %871 = vrot.lane.b32.xlu0 %v709_v6, %s2098_s8 }
 0x128   : > { %867 = vrot.lane.b32.xlu2 %v708_v7, %s2098_s8  ;;  %v2521_v13 = vpop.permute.xlu0 %771 }
 0x129   : > { %v788_v14 = vsel %vm785_vm2, %v2446_v9, %v2521_v13 }
 0x12a   : > { %937 = vrot.lane.b32.xlu1 %v792_v11, %s2098_s8  ;;  %855 = vrot.lane.b32.xlu0 %v2343_v32, %s2098_s8 }
 0x130   : > { %853 = vrot.lane.b32.xlu2 %v2323_v21, %s2098_s8  ;;  %v755_v32 = vpop.permute.xlu0 %754 }
 0x132   : > { %857 = vrot.lane.b32.xlu1 %v2320_v19, %s2098_s8  ;;  %927 = vrot.lane.b32.xlu0 %v788_v14, %s2098_s8  ;;  %v922_v10 = vpop.permute.xlu2 %921  ;;  %v764_v19 = vsel %vm756_vm3, %v2464_v28, %v755_v32 }
 0x138   : > { %861 = vrot.lane.b32.xlu2 %v705_v15, %s2098_s8 }
 0x13a   : > { %843 = vrot.lane.b32.xlu1 %v2339_v29, %s2098_s8  ;;  %847 = vrot.lane.b32.xlu0 %v2345_v33, %s2098_s8  ;;  %v2537_v21 = vpop.permute.xlu2 %935  ;;  %v745_v29 = vpop.permute.xlu1 %744 }
 0x13b   : > { %v760_v33 = vsel %vm756_vm3, %v2470_v34, %v745_v29 }
 0x140   : > { %845 = vrot.lane.b32.xlu2 %v2333_v26, %s2098_s8 }
 0x142   : > { %851 = vrot.lane.b32.xlu1 %v2421_v58, %s2098_s8  ;;  %919 = vrot.lane.b32.xlu0 %v764_v19, %s2098_s8  ;;  %v2546_v9 = vpop.permute.xlu2 %925 }
 0x143   : > { %v932_v16 = vpop.permute.xlu0 %931 }
 0x148   : > { %841 = vrot.lane.b32.xlu2 %v2427_v61, %s2098_s8 }
 0x14a   : > { %909 = vrot.lane.b32.xlu1 %v760_v33, %s2098_s8  ;;  %889 = vrot.lane.b32.xlu0 %v720_v52, %s2098_s8  ;;  %v2554_v26 = vpop.permute.xlu2 %917 }
 0x14c   : > { %v934_v58 = vpop.permute.xlu1 %933 }
 0x14d   : > { %v978_v17 = vsel %vm941_vm6, %v932_v16, %v934_v58  ;;  %v979_v18 = vsel %vm941_vm6, %v934_v58, %v2537_v21 }
 0x14e   : > { %1054 = vmatpush.bf16.msra.mxu1 %v978_v17  ;;  %1092 = vmatpush.bf16.msra.mxu3 %v979_v18  ;;  %v2099_v17 = vmov 0   ;;  %v801_v18 = vld [vmem:[%s3046_s4 + $0x10] sm:$0xff] }
 0x14f   : > { %2005 = vset.pattern.permute.xlu0 %v2099_v17  ;;  %2003 = vset.pattern.permute.xlu1 %v2099_v17 }
 0x150   : > { %899 = vrot.lane.b32.xlu2 %v2478_v40, %s2098_s8 }
 0x151   : > { %2004 = vset.pattern.permute.xlu2 %v2099_v17 }
 0x152   : > { %879 = vrot.lane.b32.xlu1 %v703_v59, %s2098_s8  ;;  %v2562_v61 = vpop.permute.xlu2 %907  ;;  %v2607_v59 = vor.u32 %v1893_v54, %v1826_v55  ;;  %v802_v55 = vld [vmem:[%s3046_s4 + $0x18] sm:$0xff] }
 0x154   : > { %v924_v20 = vpop.permute.xlu1 %923  ;;  %v914_v22 = vpop.permute.xlu0 %913 }
 0x155   : > { %v974_v23 = vsel %vm941_vm6, %v922_v10, %v924_v20  ;;  %v975_v24 = vsel %vm941_vm6, %v924_v20, %v2546_v9  ;;  %v799_v20 = vld [vmem:[%s3046_s4] sm:$0xff] }
 0x156   : > { %1055 = vmatpush.bf16.msra.mxu1 %v974_v23  ;;  %1093 = vmatpush.bf16.msra.mxu3 %v975_v24 }
 0x158   : > { %869 = vrot.lane.b32.xlu2 %v693_v2, %s2098_s8 }
 0x159   : > { %1832 = vmatmul.msk.bf16.vlgmr.msra.gmra.mxu3 %vm1022_vm7, %v2591_v47  ;;  %1830 = vmatmul.msk.bf16.vlgmr.msra.gmra.mxu1 %vm1022_vm7, %v2591_v47 }
 0x15a   : > { %859 = vrot.lane.b32.xlu1 %v2361_v36, %s2098_s8  ;;  %v896_v25 = vpop.permute.xlu2 %895 }
 0x15c   : > { %v916_v27 = vpop.permute.xlu1 %915  ;;  %v904_v28 = vpop.permute.xlu0 %903 }
 0x15d   : > { %v971_v30 = vsel %vm941_vm6, %v914_v22, %v916_v27  ;;  %v972_v31 = vsel %vm941_vm6, %v916_v27, %v2554_v26 }
 0x15e   : > { %1067 = vmatpush.bf16.msra.mxu2 %v971_v30  ;;  %1105 = vmatpush.bf16.msrb.mxu1 %v972_v31 }
 0x162   : > { %v784_v34 = vpop.permute.xlu2 %783  ;;  %815 = vperm.xlu1 %2003, %v801_v18  }
 0x163   : > { %v793_v35 = vsel %vm785_vm2, %v782_v8, %v784_v34 }
 0x164   : > { %v906_v37 = vpop.permute.xlu1 %905  ;;  %v912_v38 = vpop.permute.xlu0 %911  ;;  %939 = vrot.lane.b32.xlu0 %v793_v35, %s2098_s8 }
 0x165   : > { %v970_v40 = vsel %vm941_vm6, %v912_v38, %v914_v22  ;;  %v967_v36 = vsel %vm941_vm6, %v904_v28, %v906_v37  ;;  %v968_v41 = vsel %vm941_vm6, %v906_v37, %v2562_v61 }
 0x166   : > { %1029 = vmatpush.bf16.msra.mxu0 %v970_v40  ;;  %1068 = vmatpush.bf16.msra.mxu2 %v967_v36 }
 0x167   : > { %1106 = vmatpush.bf16.msrb.mxu1 %v968_v41 }
 0x169   : > { %1833 = vmatmul.msk.bf16.gmra.mxu3 %vm1022_vm7, %v2607_v59  ;;  %1831 = vmatmul.msk.bf16.gmra.mxu1 %vm1022_vm7, %v2607_v59 }
 0x16a   : > { %v2579_v42 = vpop.permute.xlu2 %887 }
 0x16c   : > { %v894_v45 = vpop.permute.xlu1 %893  ;;  %v2587_v46 = vpop.permute.xlu0 %897  ;;  %849 = vrot.lane.b32.xlu0 %v2371_v39, %s2098_s8 }
 0x16d   : > { %v963_v48 = vsel %vm941_vm6, %v894_v45, %v896_v25  ;;  %v964_v49 = vsel %vm941_vm6, %v896_v25, %v2587_v46  ;;  %v800_v25 = vld [vmem:[%s3046_s4 + $0x8] sm:$0xff] }
 0x16e   : > { %1069 = vmatpush.bf16.msra.mxu2 %v963_v48  ;;  %1107 = vmatpush.bf16.msrb.mxu1 %v964_v49  ;;  %v1894_v48 = vld [vmem:[%s3045_s3 + $0x14] sm:$0xf0] }
 0x16f   : > { %810 = vperm.xlu1 %2003, %v800_v25  }
 0x172   : > { %v874_v50 = vpop.permute.xlu2 %873 }
 0x174   : > { %v902_v51 = vpop.permute.xlu1 %901  ;;  %v884_v52 = vpop.permute.xlu0 %883  ;;  %805 = vperm.xlu0 %2005, %v799_v20  }
 0x175   : > { %v966_v39 = vsel %vm941_vm6, %v902_v51, %v904_v28  ;;  %v1816_v28 = vld [vmem:[%s3045_s3] sm:$0xf] }
 0x176   : > { %1030 = vmatpush.bf16.msra.mxu0 %v966_v39 }
 0x17a   : > { %v882_v53 = vpop.permute.xlu2 %881 }
 0x17b   : > { %v958_v0 = vsel %vm941_vm6, %v882_v53, %v884_v52 }
 0x17c   : > { %v886_v56 = vpop.permute.xlu1 %885  ;;  %v892_v57 = vpop.permute.xlu0 %891 }
 0x17d   : > { %v962_v60 = vsel %vm941_vm6, %v892_v57, %v894_v45  ;;  %v959_v62 = vsel %vm941_vm6, %v884_v52, %v886_v56  ;;  %v960_v63 = vsel %vm941_vm6, %v886_v56, %v2579_v42  ;;  %v1824_v45 = vld [vmem:[%s3045_s3 + $0x10] sm:$0xf]  ;;  %v1402_v57 = vld [vmem:[%s3079_s15] sm:$0xff] }
 0x17e   : > { %1031 = vmatpush.bf16.msra.mxu0 %v962_v60  ;;  %1070 = vmatpush.bf16.msra.mxu2 %v959_v62  ;;  %v1260_v60 = vld [vmem:[%s3048_s6 + $0x10] sm:$0xff] }
 0x17f   : > { %1108 = vmatpush.bf16.msrb.mxu1 %v960_v63 }
 0x182   : > { %1032 = vmatpush.bf16.msra.mxu0 %v958_v0  ;;  %v2618_v1 = vpop.permute.xlu2 %867 }
 0x184   : > { %v774_v3 = vpop.permute.xlu1 %773  ;;  %v876_v4 = vpop.permute.xlu0 %875 }
 0x185   : > { %v789_v2 = vsel %vm785_vm2, %v2521_v13, %v774_v3  ;;  %v955_v5 = vsel %vm941_vm6, %v874_v50, %v876_v4 }
 0x186   : > { %929 = vrot.lane.b32.xlu2 %v789_v2, %s2098_s8  ;;  %1071 = vmatpush.bf16.msra.mxu2 %v955_v5  ;;  %s3080_s8 = smov %s3079_s15 }
 0x187   : > { %v1404_v63 = vld [vmem:[%s3080_s8 + $0x10] sm:$0xff] }
 0x18a   : > { %v854_v6 = vpop.permute.xlu2 %853 }
 0x18c   : > { %v2624_v7 = vpop.permute.xlu1 %877  ;;  %v864_v8 = vpop.permute.xlu0 %863 }
 0x18d   : > { %v956_v11 = vsel %vm941_vm6, %v876_v4, %v2624_v7  ;;  %v1405_v4 = vld [vmem:[%s3080_s8 + $0x18] sm:$0xff] }
 0x18e   : > { %1109 = vmatpush.bf16.msrb.mxu1 %v956_v11  ;;  %820 = vperm.xlu2 %2004, %v802_v55  }
 0x192   : > { %v862_v32 = vpop.permute.xlu2 %861 }
 0x193   : > { %v950_v19 = vsel %vm941_vm6, %v862_v32, %v864_v8 }
 0x194   : > { %v866_v12 = vpop.permute.xlu1 %865  ;;  %v872_v14 = vpop.permute.xlu0 %871 }
 0x195   : > { %v954_v10 = vsel %vm941_vm6, %v872_v14, %v874_v50  ;;  %v951_v15 = vsel %vm941_vm6, %v864_v8, %v866_v12  ;;  %v952_v13 = vsel %vm941_vm6, %v866_v12, %v2618_v1  ;;  %v1825_v50 = vor.u32 %v1894_v48, %v1824_v45  ;;  %v2764_v48 = vld [vmem:[%s2315_s22 + $0x38] sm:$0xff] }
 0x196   : > { %1033 = vmatpush.bf16.msra.mxu0 %v954_v10  ;;  %1072 = vmatpush.bf16.msra.mxu2 %v951_v15 }
 0x197   : > { %1110 = vmatpush.bf16.msrb.mxu1 %v952_v13  ;;  %1274 = vperm.xlu2 %2004, %v1260_v60  }
 0x19a   : > { %1034 = vmatpush.bf16.msra.mxu0 %v950_v19  ;;  %v846_v27 = vpop.permute.xlu2 %845 }
 0x19c   : > { %v2633_v29 = vpop.permute.xlu1 %937  ;;  %v856_v33 = vpop.permute.xlu0 %855 }
 0x19d   : > { %v980_v16 = vsel %vm941_vm6, %v2537_v21, %v2633_v29  ;;  %v947_v58 = vsel %vm941_vm6, %v854_v6, %v856_v33 }
 0x19e   : > { %1130 = vmatpush.bf16.msrb.mxu3 %v980_v16  ;;  %1073 = vmatpush.bf16.msra.mxu2 %v947_v58 }
 0x1a2   : > { %v842_v38 = vpop.permute.xlu2 %841 }
 0x1a4   : > { %v2645_v22 = vpop.permute.xlu1 %857  ;;  %v2647_v21 = vpop.permute.xlu0 %927 }
 0x1a5   : > { %v976_v23 = vsel %vm941_vm6, %v2546_v9, %v2647_v21  ;;  %v948_v24 = vsel %vm941_vm6, %v856_v33, %v2645_v22  ;;  %v1892_v9 = vld [vmem:[%s3045_s3 + $0x4] sm:$0xf0] }
 0x1a6   : > { %1131 = vmatpush.bf16.msrb.mxu3 %v976_v23  ;;  %1111 = vmatpush.bf16.msrb.mxu1 %v948_v24  ;;  %v2670_v37 = vor.u32 %v1892_v9, %v1816_v28 }
 0x1a9   : > { %1834 = vmatmul.msk.bf16.vlgmr.msrb.gmra.mxu3 %vm1022_vm7, %v2591_v47 }
 0x1aa   : > { %v900_v51 = vpop.permute.xlu2 %899 }
 0x1ab   : > { %v965_v52 = vsel %vm941_vm6, %v2587_v46, %v900_v51  ;;  %v1259_v46 = vld [vmem:[%s3048_s6 + $0x8] sm:$0xff] }
 0x1ac   : > { %v844_v30 = vpop.permute.xlu1 %843  ;;  %v2665_v31 = vpop.permute.xlu0 %847  ;;  %1269 = vperm.xlu0 %2005, %v1259_v46  }
 0x1ad   : > { %v943_v34 = vsel %vm941_vm6, %v844_v30, %v846_v27  ;;  %v944_v35 = vsel %vm941_vm6, %v846_v27, %v2665_v31  ;;  %v942_v44 = vsel %vm941_vm6, %v842_v38, %v844_v30 }
 0x1ae   : > { %1074 = vmatpush.bf16.msra.mxu2 %v943_v34  ;;  %1112 = vmatpush.bf16.msrb.mxu1 %v944_v35 }
 0x1b1   : > { %1075 = vmatmul.bf16.vlgmr.msra.gmra.mxu2 %v2670_v37  ;;  %1113 = vmatmul.bf16.vlgmr.msrb.gmra.mxu1 %v2670_v37 }
 0x1b2   : > { %v870_v56 = vpop.permute.xlu2 %869 }
 0x1b3   : > { %v953_v62 = vsel %vm941_vm6, %v2618_v1, %v870_v56  ;;  %v1258_v1 = vld [vmem:[%s3048_s6] sm:$0xff] }
 0x1b4   : > { %v852_v40 = vpop.permute.xlu1 %851  ;;  %v920_v36 = vpop.permute.xlu0 %919  ;;  %1418 = vperm.xlu0 %2005, %v1404_v63   ;;  %1264 = vperm.xlu2 %2004, %v1258_v1  }
 0x1b5   : > { %v973_v41 = vsel %vm941_vm6, %v2554_v26, %v920_v36  ;;  %v946_v43 = vsel %vm941_vm6, %v852_v40, %v854_v6  ;;  %v1403_v6 = vld [vmem:[%s3080_s8 + $0x8] sm:$0xff] }
 0x1b6   : > { %1035 = vmatpush.bf16.msra.mxu0 %v946_v43  ;;  %1899 = vmatpush.bf16.msra.mxu1 %v973_v41 }
 0x1b9   : > { %1835 = vmatmul.msk.bf16.gmra.mxu3 %vm1022_vm7, %v2607_v59 }
 0x1ba   : > { %1036 = vmatpush.bf16.msra.mxu0 %v942_v44 }
 0x1bc   : > { %v910_v26 = vpop.permute.xlu1 %909  ;;  %v890_v39 = vpop.permute.xlu0 %889  ;;  %1413 = vperm.xlu2 %2004, %v1403_v6  }
 0x1bd   : > { %1037 = vmatmul.bf16.vlgmr.msra.gmra.mxu0 %v2670_v37  ;;  %v969_v49 = vsel %vm941_vm6, %v2562_v61, %v910_v26  ;;  %v961_v54 = vsel %vm941_vm6, %v2579_v42, %v890_v39  ;;  %v1261_v61 = vld [vmem:[%s3048_s6 + $0x18] sm:$0xff] }
 0x1be   : > { %1143 = vmatpush.bf16.msrb.mxu0 %v973_v41  ;;  %1900 = vmatpush.bf16.msra.mxu1 %v969_v49  ;;  %v2760_v41 = vld [vmem:[%s2315_s22 + $0x28] sm:$0xff] }
 0x1bf   : > { %1279 = vperm.xlu1 %2003, %v1261_v61  }
 0x1c1   : > { %1080 = vmatmul.bf16.gmra.mxu2 %v1825_v50  ;;  %1118 = vmatmul.bf16.gmra.mxu1 %v1825_v50 }
 0x1c2   : > { %1144 = vmatpush.bf16.msrb.mxu0 %v969_v49  ;;  %1901 = vmatpush.bf16.msra.mxu1 %v965_v52  ;;  %v2768_v49 = vld [vmem:[%s2315_s22 + $0x8] sm:$0xff] }
 0x1c4   : > { %v880_v53 = vpop.permute.xlu1 %879 }
 0x1c5   : > { %v957_v42 = vsel %vm941_vm6, %v2624_v7, %v880_v53  ;;  %v2774_v53 = vld [vmem:[%s2315_s22 + $0x18] sm:$0xff] }
 0x1c6   : > { %1145 = vmatpush.bf16.msrb.mxu0 %v965_v52  ;;  %1902 = vmatpush.bf16.msra.mxu1 %v961_v54  ;;  %v2771_v52 = vstv %s794_s7  ;;  %s1873_s7 = sshll.u32 (%p2277_p3), %s3085_s13, 5 }
 0x1c7   : > { %1408 = vperm.xlu1 %2003, %v1402_v57   ;;  %v1183_v57 = vunpack.c.l.bf16 %v2768_v49 }
 0x1ca   : > { %1146 = vmatpush.bf16.msrb.mxu0 %v961_v54  ;;  %1903 = vmatpush.bf16.msra.mxu1 %v957_v42  ;;  %v1191_v54 = vunpack.c.l.bf16 %v2760_v41 }
 0x1cc   : > { %v860_v0 = vpop.permute.xlu1 %859 }
 0x1cd   : > { %1042 = vmatmul.bf16.gmra.mxu0 %v1825_v50  ;;  %v949_v3 = vsel %vm941_vm6, %v2645_v22, %v860_v0 }
 0x1ce   : > { %1147 = vmatpush.bf16.msrb.mxu0 %v957_v42  ;;  %1904 = vmatpush.bf16.msra.mxu1 %v953_v62  ;;  %v1195_v42 = vunpack.c.l.bf16 %v2764_v48 }
 0x1cf   : > { %1423 = vperm.xlu1 %2003, %v1405_v4  }
 0x1d2   : > { %1148 = vmatpush.bf16.msrb.mxu0 %v953_v62  ;;  %1905 = vmatpush.bf16.msra.mxu1 %v949_v3  ;;  %v2781_v62 = vld [vmem:[%s2315_s22 + $0x20] sm:$0xff] }
 0x1d4   : > { %v2747_v18 = vpop.permute.xlu1 %815 }
 0x1d6   : > { %1149 = vmatpush.bf16.msrb.mxu0 %v949_v3  ;;  %v940_v2 = vpop.permute.xlu0 %939  ;;  %v2737_v10 = vpop.f32.mrf.mxu1  ;;  %v1187_v3 = vunpack.c.l.bf16 %v2774_v53 }
 0x1d7   : > { %v981_v5 = vsel %vm941_vm6, %v2633_v29, %v940_v2 }
 0x1d8   : > { %1168 = vmatpush.bf16.msrb.mxu2 %v981_v5  ;;  %1907 = vmatpush.bf16.msra.mxu3 %v981_v5 }
 0x1dc   : > { %v1095_v14 = vpop.f32.mrf.mxu3 }
 0x1de   : > { %v850_v7 = vpop.permute.xlu0 %849  ;;  %v2739_v13 = vpop.f32.mrf.mxu1 }
 0x1df   : > { %v945_v8 = vsel %vm941_vm6, %v2665_v31, %v850_v7 }
 0x1e0   : > { %v930_v11 = vpop.permute.xlu2 %929  ;;  %1150 = vmatpush.bf16.msrb.mxu0 %v945_v8  ;;  %1906 = vmatpush.bf16.msra.mxu1 %v945_v8 }
 0x1e1   : > { %v977_v12 = vsel %vm941_vm6, %v2647_v21, %v930_v11  ;;  %v2751_v25 = vpop.permute.xlu1 %810 }
 0x1e2   : > { %1169 = vmatpush.bf16.msrb.mxu2 %v977_v12  ;;  %1908 = vmatpush.bf16.msra.mxu3 %v977_v12  ;;  %v606_v12 = vld [vmem:[%s2315_s22 + $0x30] sm:$0xff] }
 0x1e3   : > { %1156 = vmatmul.bf16.vlgmr.msra.gmra.mxu1 %v1825_v50  ;;  %1151 = vmatmul.bf16.vlgmr.msrb.gmra.mxu0 %v2670_v37 }
 0x1e4   : > { %v1097_v15 = vpop.f32.mrf.mxu3 }
 0x1e5   : > { %1836 = vmatmul.msk.bf16.vlgmr.msrb.gmra.mxu2 %vm1022_vm7, %v2591_v47  ;;  %1837 = vmatmul.msk.bf16.vlgmr.msra.gmra.mxu3 %vm1022_vm7, %v2607_v59 }
 0x1e6   : > { %v2741_v19 = vpop.f32.mrf.mxu1  ;;  %v2749_v24 = vpop.permute.xlu0 %805 }
 0x1e8   : > { %v2756_v38 = vpop.permute.xlu2 %820 }
 0x1ec   : > { %v1100_v32 = vpop.f32.mrf.mxu3 }
 0x1ee   : > { %v2745_v33 = vpop.f32.mrf.mxu1 }
 0x1f4   : > { %v2743_v29 = vpop.f32.mrf.mxu3 }
 0x22c   : > { %v1133_v16 = vpop.f32.mrf.mxu3 }
 0x22e   : > { %v1114_v58 = vpop.f32.mrf.mxu1 }
 0x22f   : > { %v1115_v28 = vadd.f32 %v1114_v58, %v2749_v24 }
 0x231   : > { %v1134_v34 = vadd.f32 %v1133_v16, %v1115_v28 }
 0x233   : > { %v1199_v50 = vmax.f32 %v1134_v34, 0.0 }
 0x234   : > { %v1076_v17 = vpop.f32.mrf.mxu2  ;;  %v1135_v47 = vpop.f32.mrf.mxu3 }
 0x235   : > { %v1077_v51 = vadd.f32 %v1076_v17, %v2749_v24  ;;  %v1216_v5 = vmul.f32 %v2771_v52, %v1199_v50 }
 0x236   : > { %v1116_v59 = vpop.f32.mrf.mxu1 }
 0x237   : > { %v1117_v9 = vadd.f32 %v1116_v59, %v2751_v25  ;;  %v1096_v4 = vadd.f32 %v1095_v14, %v1077_v51  ;;  %v1190_v14 = vunpack.c.h.bf16 %v2781_v62  ;;  %v602_v59 = vld [vmem:[%s2315_s22 + $0x10] sm:$0xff] }
 0x239   : > { %v1136_v35 = vadd.f32 %v1135_v47, %v1117_v9 }
 0x23a   : > { %v1038_v20 = vpop.f32.mrf.mxu0 }
 0x23b   : > { %v1203_v39 = vmax.f32 %v1136_v35, 0.0 }
 0x23c   : > { %v1078_v22 = vpop.f32.mrf.mxu2  ;;  %v1138_v21 = vpop.f32.mrf.mxu3 }
 0x23d   : > { %v1079_v45 = vadd.f32 %v1078_v22, %v2751_v25  ;;  %v1220_v6 = vmul.f32 %v2771_v52, %v1203_v39  ;;  %v1198_v22 = vmax.f32 %v1096_v4, 0.0  ;;  %v1189_v39 = vunpack.c.l.bf16 %v2781_v62 }
 0x23e   : > { %v1119_v23 = vpop.f32.mrf.mxu1  ;;  %v1185_v62 = vunpack.c.l.bf16 %v602_v59 }
 0x23f   : > { %v1120_v27 = vadd.f32 %v1119_v23, %v2747_v18  ;;  %v1098_v60 = vadd.f32 %v1097_v15, %v1079_v45  ;;  %v2800_v23 = vadd.f32 %v1216_v5, %v1183_v57 }
 0x241   : > { %v1139_v30 = vadd.f32 %v1138_v21, %v1120_v27  ;;  %v1202_v16 = vmax.f32 %v1098_v60, 0.0  ;;  %v1194_v21 = vunpack.c.h.bf16 %v606_v12  ;;  %v2802_v27 = vadd.f32 %v1220_v6, %v1187_v3 }
 0x242   : > { %v1040_v31 = vpop.f32.mrf.mxu0 }
 0x243   : > { %v1207_v40 = vmax.f32 %v1139_v30, 0.0  ;;  %v1041_v1 = vadd.f32 %v1040_v31, %v2751_v25  ;;  %v600_v31 = vld [vmem:[%s2315_s22] sm:$0xff]  ;;  %v1219_v35 = vmul.f32 %v2771_v52, %v1202_v16  ;;  %s1606_s22 = sadd.s32 (%p2277_p3), %s1873_s7, %s1872_s28 }
 0x244   : > { %v1081_v37 = vpop.f32.mrf.mxu2  ;;  %v1140_v44 = vpop.f32.mrf.mxu3  ;;  %s1874_s29 = sshll.u32 (%p2277_p3), %s1606_s22, 2 }
 0x245   : > { %v1082_v36 = vadd.f32 %v1081_v37, %v2747_v18  ;;  %v1224_v61 = vmul.f32 %v2771_v52, %v1207_v40  ;;  %v1060_v28 = vadd.f32 %v2739_v13, %v1041_v1  ;;  %v1215_v13 = vmul.f32 %v2771_v52, %v1198_v22  ;;  %s1608_s12 = scalar_lea.vmem (%p2277_p3), %s3086_s26, %s1874_s29 }
 0x246   : > { %v1121_v43 = vpop.f32.mrf.mxu1 }
 0x247   : > { %v1122_v26 = vadd.f32 %v1121_v43, %v2756_v38  ;;  %v1101_v55 = vadd.f32 %v1100_v32, %v1082_v36  ;;  %v2788_v7 = vadd.f32 %v1224_v61, %v1191_v54  ;;  %v1039_v32 = vadd.f32 %v1038_v20, %v2749_v24  ;;  %v2825_v61 = vld [vmem:[%s3081_s14] sm:$0xff] }
 0x248   : > { %v1252_v43 = vpack.c.bf16 %v2802_v27, %v2800_v23  ;;  %v1201_v45 = vmax.f32 %v1060_v28, 0.0  ;;  %v1193_v54 = vunpack.c.l.bf16 %v606_v12 }
 0x249   : > { %v1141_v46 = vadd.f32 %v1140_v44, %v1122_v26  ;;  %v1206_v8 = vmax.f32 %v1101_v55, 0.0  ;;  %v1182_v44 = vunpack.c.h.bf16 %v600_v31 }
 0x24a   : > { %v1043_v56 = vpop.f32.mrf.mxu0 }
 0x24b   : > { %v1211_v63 = vmax.f32 %v1141_v46, 0.0  ;;  %v1044_v0 = vadd.f32 %v1043_v56, %v2747_v18  ;;  %v1223_v20 = vmul.f32 %v2771_v52, %v1206_v8  ;;  %v2834_v60 = vadd.f32 %v1215_v13, %v1182_v44 }
 0x24c   : > { %v1083_v2 = vpop.f32.mrf.mxu2  ;;  %v1184_v13 = vunpack.c.h.bf16 %v2768_v49 }
 0x24d   : > { %v1228_v11 = vmul.f32 %v2771_v52, %v1211_v63  ;;  %v1084_v15 = vadd.f32 %v1083_v2, %v2756_v38  ;;  %v1063_v17 = vadd.f32 %v2741_v19, %v1044_v0  ;;  %v1058_v19 = vadd.f32 %v2737_v10, %v1039_v32 }
 0x24e   : > { %v2816_v26 = vadd.f32 %v1223_v20, %v1190_v14  ;;  %v1181_v63 = vunpack.c.l.bf16 %v600_v31 }
 0x24f   : > { %v2795_v58 = vadd.f32 %v1228_v11, %v1195_v42  ;;  %v1103_v47 = vadd.f32 %v2743_v29, %v1084_v15  ;;  %v1186_v29 = vunpack.c.h.bf16 %v602_v59  ;;  %v1205_v37 = vmax.f32 %v1063_v17, 0.0  ;;  %v1896_v15 = vld [vmem:[%s3081_s14 + $0x8] sm:$0xff] }
 0x250   : > { %v1197_v51 = vmax.f32 %v1058_v19, 0.0 }
 0x251   : > { %v1256_v9 = vpack.c.bf16 %v2795_v58, %v2788_v7  ;;  %v1210_v30 = vmax.f32 %v1103_v47, 0.0  ;;  %v1222_v55 = vmul.f32 %v2771_v52, %v1205_v37  ;;  %v2830_v56 = vadd.f32 %v1219_v35, %v1186_v29 }
 0x252   : > { %v1045_v34 = vpop.f32.mrf.mxu0  ;;  %v1214_v0 = vmul.f32 %v2771_v52, %v1197_v51  ;;  %v1196_v29 = vunpack.c.h.bf16 %v2764_v48 }
 0x253   : > { %v1227_v40 = vmul.f32 %v2771_v52, %v1210_v30  ;;  %v1046_v36 = vadd.f32 %v1045_v34, %v2756_v38  ;;  %1342 = vmatpush.bf16.msra.mxu0 %v1256_v9  ;;  %v2839_v3 = vadd.f32 %v1222_v55, %v1189_v39  ;;  %v1251_v1 = vpack.c.bf16 %v2830_v56, %v2834_v60  ;;  %v1275_v55 = vpop.permute.xlu2 %1274 }
 0x254   : > { %v2849_v6 = vadd.f32 %v1214_v0, %v1181_v63  ;;  %v1192_v34 = vunpack.c.h.bf16 %v2760_v41  ;;  %v1270_v63 = vpop.permute.xlu0 %1269 }
 0x255   : > { %v2818_v10 = vadd.f32 %v1227_v40, %v1194_v21  ;;  %v1065_v50 = vadd.f32 %v2745_v33, %v1046_v36  ;;  %v1218_v33 = vmul.f32 %v2771_v52, %v1201_v45  ;;  %v1188_v36 = vunpack.c.h.bf16 %v2774_v53 }
 0x257   : > { %v1209_v46 = vmax.f32 %v1065_v50, 0.0  ;;  %1343 = vmatpush.bf16.msra.mxu0 %v1252_v43  ;;  %v1255_v42 = vpack.c.bf16 %v2818_v10, %v2816_v26  ;;  %v2847_v5 = vadd.f32 %v1218_v33, %v1185_v62 }
 0x259   : > { %v1226_v57 = vmul.f32 %v2771_v52, %v1209_v46  ;;  %1323 = vmatpush.bf16.msrb.mxu3 %v1255_v42  ;;  %v1250_v8 = vpack.c.bf16 %v2847_v5, %v2849_v6 }
 0x25a   : > { %1850 = vmatmul.msk.bf16.vlgmr.msra.gmra.mxu0 %vm1022_vm7, %v2825_v61 }
 0x25b   : > { %v2841_v4 = vadd.f32 %v1226_v57, %v1193_v54  ;;  %v1280_v57 = vpop.permute.xlu1 %1279 }
 0x25d   : > { %1324 = vmatpush.bf16.msrb.mxu3 %v1251_v1  ;;  %v1254_v2 = vpack.c.bf16 %v2841_v4, %v2839_v3 }
 0x25f   : > { %1304 = vmatpush.bf16.msrb.mxu1 %v1254_v2 }
 0x260   : > { %1848 = vmatmul.msk.bf16.vlgmr.msrb.gmra.mxu3 %vm1022_vm7, %v2825_v61  ;;  %v1157_v11 = vpop.f32.mrf.mxu1  ;;  %v1152_v12 = vpop.f32.mrf.mxu0 }
 0x261   : > { %v1158_v32 = vadd.f32 %v1157_v11, %v2747_v18  ;;  %v1153_v17 = vadd.f32 %v1152_v12, %v2749_v24 }
 0x263   : > { %1305 = vmatpush.bf16.msrb.mxu1 %v1250_v8  ;;  %v1265_v8 = vpop.permute.xlu2 %1264 }
 0x266   : > { %1846 = vmatmul.msk.bf16.vlgmr.msrb.gmra.mxu1 %vm1022_vm7, %v2825_v61 }
 0x268   : > { %v1171_v14 = vpop.f32.mrf.mxu2  ;;  %v1176_v16 = vpop.f32.mrf.mxu3 }
 0x269   : > { %v1177_v47 = vadd.f32 %v1176_v16, %v1158_v32  ;;  %v1159_v59 = vpop.f32.mrf.mxu1  ;;  %v1154_v22 = vpop.f32.mrf.mxu0  ;;  %v1172_v21 = vadd.f32 %v1171_v14, %v1153_v17 }
 0x26a   : > { %1851 = vmatmul.msk.bf16.gmra.mxu0 %vm1022_vm7, %v1896_v15  ;;  %v1160_v20 = vadd.f32 %v1159_v59, %v2756_v38  ;;  %v1155_v9 = vadd.f32 %v1154_v22, %v2751_v25  ;;  %v1897_v59 = vld [vmem:[%s3082_s23] sm:$0xff] }
 0x26b   : > { %v1208_v28 = vmax.f32 %v1177_v47, 0.0  ;;  %v1200_v24 = vmax.f32 %v1172_v21, 0.0 }
 0x26d   : > { %v1225_v35 = vmul.f32 %v2771_v52, %v1208_v28  ;;  %v1217_v43 = vmul.f32 %v2771_v52, %v1200_v24 }
 0x26f   : > { %v2875_v41 = vadd.f32 %v1225_v35, %v1192_v34  ;;  %v2883_v53 = vadd.f32 %v1217_v43, %v1184_v13 }
 0x270   : > { %v1173_v30 = vpop.f32.mrf.mxu2  ;;  %v1178_v31 = vpop.f32.mrf.mxu3  ;;  %1849 = vmatmul.msk.bf16.gmra.mxu3 %vm1022_vm7, %v1896_v15 }
 0x271   : > { %v1174_v18 = vadd.f32 %v1173_v30, %v1155_v9  ;;  %v1179_v19 = vadd.f32 %v1178_v31, %v1160_v20 }
 0x273   : > { %v1204_v37 = vmax.f32 %v1174_v18, 0.0  ;;  %v1212_v40 = vmax.f32 %v1179_v19, 0.0 }
 0x275   : > { %v1221_v38 = vmul.f32 %v2771_v52, %v1204_v37  ;;  %v1229_v25 = vmul.f32 %v2771_v52, %v1212_v40 }
 0x276   : > { %1847 = vmatmul.msk.bf16.gmra.mxu1 %vm1022_vm7, %v1896_v15 }
 0x277   : > { %v2877_v48 = vadd.f32 %v1229_v25, %v1196_v29  ;;  %v2879_v44 = vadd.f32 %v1221_v38, %v1188_v36 }
 0x279   : > { %v1257_v45 = vpack.c.bf16 %v2877_v48, %v2875_v41  ;;  %v1253_v50 = vpack.c.bf16 %v2879_v44, %v2883_v53 }
 0x27b   : > { %1361 = vmatpush.bf16.msra.mxu2 %v1257_v45 }
 0x27f   : > { %1362 = vmatpush.bf16.msra.mxu2 %v1253_v50 }
 0x282   : > { %1852 = vmatmul.msk.bf16.vlgmr.msra.gmra.mxu2 %vm1022_vm7, %v2825_v61 }
 0x292   : > { %1853 = vmatmul.msk.bf16.gmra.mxu2 %vm1022_vm7, %v1896_v15 }
 0x2d7   : > { %v1345_v49 = vpop.f32.mrf.mxu0 }
 0x2d8   : > { %v1346_v11 = vadd.f32 %v1345_v49, %v1265_v8 }
 0x2da   : > { %v1376_v17 = vmax.f32 %v1346_v11, 0.0 }
 0x2df   : > { %v1347_v51 = vpop.f32.mrf.mxu0 }
 0x2e0   : > { %v1348_v1 = vadd.f32 %v1347_v51, %v1270_v63  ;;  %v1898_v51 = vld [vmem:[%s3083_s5 + $0x8] sm:$0xff] }
 0x2e2   : > { %v1380_v14 = vmax.f32 %v1348_v1, 0.0 }
 0x2e3   : > { %v1307_v39 = vpop.f32.mrf.mxu1  ;;  %v1326_v54 = vpop.f32.mrf.mxu3 }
 0x2e4   : > { %v1396_v47 = vpack.c.bf16 %v1380_v14, %v1376_v17  ;;  %v1308_v19 = vadd.f32 %v1307_v39, %v1265_v8  ;;  %v1327_v34 = vadd.f32 %v1326_v54, %v1265_v8  ;;  %v2904_v14 = vpop.permute.xlu1 %1408 }
 0x2e6   : > { %v1374_v13 = vmax.f32 %v1308_v19, 0.0  ;;  %v1375_v43 = vmax.f32 %v1327_v34, 0.0 }
 0x2e7   : > { %v1350_v46 = vpop.f32.mrf.mxu0 }
 0x2e8   : > { %v1351_v62 = vadd.f32 %v1350_v46, %v1275_v55 }
 0x2ea   : > { %v1384_v12 = vmax.f32 %v1351_v62, 0.0 }
 0x2eb   : > { %v1309_v42 = vpop.f32.mrf.mxu1  ;;  %v1328_v33 = vpop.f32.mrf.mxu3 }
 0x2ec   : > { %v1310_v9 = vadd.f32 %v1309_v42, %v1270_v63  ;;  %v1329_v30 = vadd.f32 %v1328_v33, %v1270_v63 }
 0x2ee   : > { %v1378_v40 = vmax.f32 %v1310_v9, 0.0  ;;  %v1379_v36 = vmax.f32 %v1329_v30, 0.0 }
 0x2ef   : > { %v1352_v0 = vpop.f32.mrf.mxu0 }
 0x2f0   : > { %v1353_v2 = vadd.f32 %v1352_v0, %v1280_v57  ;;  %v1394_v45 = vpack.c.bf16 %v1378_v40, %v1374_v13  ;;  %v1395_v50 = vpack.c.bf16 %v1379_v36, %v1375_v43  ;;  %v2924_v40 = vpop.permute.xlu0 %1418 }
 0x2f2   : > { %v1388_v61 = vmax.f32 %v1353_v2, 0.0 }
 0x2f3   : > { %v1312_v32 = vpop.f32.mrf.mxu1  ;;  %v1331_v15 = vpop.f32.mrf.mxu3 }
 0x2f4   : > { %v1400_v16 = vpack.c.bf16 %v1388_v61, %v1384_v12  ;;  %v1313_v22 = vadd.f32 %v1312_v32, %v1275_v55  ;;  %v1332_v21 = vadd.f32 %v1331_v15, %v1275_v55  ;;  %v1551_v15 = vlaneseq }
 0x2f6   : > { %1486 = vmatpush.bf16.msrb.mxu0 %v1400_v16  ;;  %v1382_v29 = vmax.f32 %v1313_v22, 0.0  ;;  %v1383_v24 = vmax.f32 %v1332_v21, 0.0  ;;  %v2908_v16 = vstv %s1870_s30 }
 0x2fa   : > { %1487 = vmatpush.bf16.msrb.mxu0 %v1396_v47 }
 0x2fb   : > { %v1314_v28 = vpop.f32.mrf.mxu1  ;;  %v1333_v20 = vpop.f32.mrf.mxu3 }
 0x2fc   : > { %v1315_v31 = vadd.f32 %v1314_v28, %v1280_v57  ;;  %v1334_v18 = vadd.f32 %v1333_v20, %v1280_v57  ;;  %v2914_v28 = vpop.permute.xlu2 %1413 }
 0x2fd   : > { %1866 = vmatmul.msk.bf16.vlgmr.msrb.gmra.mxu0 %vm1022_vm7, %v1897_v59 }
 0x2fe   : > { %v1386_v35 = vmax.f32 %v1315_v31, 0.0  ;;  %v1387_v37 = vmax.f32 %v1334_v18, 0.0 }
 0x300   : > { %v1398_v38 = vpack.c.bf16 %v1386_v35, %v1382_v29  ;;  %v1399_v25 = vpack.c.bf16 %v1387_v37, %v1383_v24 }
 0x302   : > { %1448 = vmatpush.bf16.msra.mxu1 %v1398_v38  ;;  %1467 = vmatpush.bf16.msra.mxu3 %v1399_v25 }
 0x305   : > { %v1364_v49 = vpop.f32.mrf.mxu2 }
 0x306   : > { %1449 = vmatpush.bf16.msra.mxu1 %v1394_v45  ;;  %1468 = vmatpush.bf16.msra.mxu3 %v1395_v50  ;;  %v1365_v0 = vadd.f32 %v1364_v49, %v1265_v8 }
 0x308   : > { %v1377_v61 = vmax.f32 %v1365_v0, 0.0 }
 0x309   : > { %1862 = vmatmul.msk.bf16.vlgmr.msra.gmra.mxu1 %vm1022_vm7, %v1897_v59  ;;  %1864 = vmatmul.msk.bf16.vlgmr.msra.gmra.mxu3 %vm1022_vm7, %v1897_v59 }
 0x30d   : > { %v1366_v39 = vpop.f32.mrf.mxu2  ;;  %1867 = vmatmul.msk.bf16.gmra.mxu0 %vm1022_vm7, %v1898_v51 }
 0x30e   : > { %v1367_v33 = vadd.f32 %v1366_v39, %v1270_v63  ;;  %v2938_v39 = vpop.permute.xlu1 %1423 }
 0x310   : > { %v1381_v11 = vmax.f32 %v1367_v33, 0.0 }
 0x312   : > { %v1397_v32 = vpack.c.bf16 %v1381_v11, %v1377_v61 }
 0x315   : > { %v1369_v54 = vpop.f32.mrf.mxu2 }
 0x316   : > { %v1370_v46 = vadd.f32 %v1369_v54, %v1275_v55  ;;  %v1552_v55 = vand.u32 127, %v1551_v15 }
 0x318   : > { %v1385_v1 = vmax.f32 %v1370_v46, 0.0  ;;  %v1553_v8 = vadd.s32 128, %v1552_v55  ;;  %v1557_v47 = vadd.s32 %v2908_v16, %v1552_v55  ;;  %v1554_v15 = vadd.s32 256, %v1552_v55 }
 0x319   : > { %1863 = vmatmul.msk.bf16.gmra.mxu1 %vm1022_vm7, %v1898_v51  ;;  %1865 = vmatmul.msk.bf16.gmra.mxu3 %vm1022_vm7, %v1898_v51 }
 0x31a   : > { %vm1561_vm8 = vcmp.lt.s32.totalorder %v1557_v47, 548 }
 0x31d   : > { %v1371_v42 = vpop.f32.mrf.mxu2 }
 0x31e   : > { %v1372_v62 = vadd.f32 %v1371_v42, %v1280_v57 }
 0x320   : > { %v1389_v2 = vmax.f32 %v1372_v62, 0.0 }
 0x322   : > { %v1401_v12 = vpack.c.bf16 %v1389_v2, %v1385_v1 }
 0x324   : > { %1505 = vmatpush.bf16.msrb.mxu2 %v1401_v12 }
 0x328   : > { %1506 = vmatpush.bf16.msrb.mxu2 %v1397_v32 }
 0x32b   : > { %1868 = vmatmul.msk.bf16.vlgmr.msrb.gmra.mxu2 %vm1022_vm7, %v1897_v59  ;;  %v1558_v59 = vadd.s32 %v2908_v16, %v1553_v8 }
 0x32d   : > { %vm1562_vm9 = vcmp.lt.s32.totalorder %v1558_v59, 548 }
 0x33b   : > { %1869 = vmatmul.msk.bf16.gmra.mxu2 %vm1022_vm7, %v1898_v51 }
 0x37a   : > { %v1489_v42 = vpop.f32.mrf.mxu0 }
 0x37b   : > { %v1490_v32 = vadd.f32 %v1489_v42, %v2904_v14 }
 0x386   : > { %v1451_v63 = vpop.f32.mrf.mxu1 }
 0x387   : > { %v1452_v57 = vadd.f32 %v1451_v63, %v2904_v14  ;;  %v1491_v63 = vpop.f32.mrf.mxu0 }
 0x389   : > { %v1518_v17 = vmul.f32 %v1452_v57, %v2771_v52  ;;  %v1555_v57 = vadd.s32 384, %v1552_v55  ;;  %v1492_v55 = vadd.f32 %v1491_v63, %v2914_v28 }
 0x38b   : > { %v1534_v9 = vadd.f32 %v1518_v17, %v2849_v6 }
 0x38c   : > { %v1470_v22 = vpop.f32.mrf.mxu3 }
 0x38d   : > { %v1471_v21 = vadd.f32 %v1470_v22, %v2904_v14  ;;  %v1565_v19 = vsel %vm1561_vm8, %v1534_v9, 0.0  ;;  %v1560_v9 = vadd.s32 %v2908_v16, %v1555_v57 }
 0x38e   : > { %v1453_v20 = vpop.f32.mrf.mxu1 }
 0x38f   : > { %v1519_v30 = vmul.f32 %v1471_v21, %v2771_v52  ;;  %v1454_v31 = vadd.f32 %v1453_v20, %v2914_v28  ;;  %v1520_v21 = vmul.f32 %v1490_v32, %v2771_v52  ;;  %v1559_v20 = vadd.s32 %v2908_v16, %v1554_v15 }
 0x390   : > { %vm1564_vm11 = vcmp.lt.s32.totalorder %v1560_v9, 548 }
 0x391   : > { %v1535_v18 = vadd.f32 %v1519_v30, %v2834_v60  ;;  %v1522_v29 = vmul.f32 %v1454_v31, %v2771_v52  ;;  %vm1563_vm10 = vcmp.lt.s32.totalorder %v1559_v20, 548  ;;  %v1494_v31 = vpop.f32.mrf.mxu0 }
 0x393   : > { %v1566_v34 = vsel %vm1562_vm9, %v1535_v18, 0.0  ;;  %v1538_v60 = vadd.f32 %v1522_v29, %v2847_v5 }
 0x394   : > { %v1581_v24 = vpack.c.bf16 %v1566_v34, %v1565_v19  ;;  %v1472_v35 = vpop.f32.mrf.mxu3  ;;  %v1524_v19 = vmul.f32 %v1492_v55, %v2771_v52 }
 0x395   : > { %v1473_v37 = vadd.f32 %v1472_v35, %v2914_v28  ;;  %v1569_v13 = vsel %vm1561_vm8, %v1538_v60, 0.0 }
 0x396   : > { %1589 = vst [vmem:[%s2927_s27] sm:$0xff] %v1581_v24  ;;  %v1456_v6 = vpop.f32.mrf.mxu1  ;;  %v1540_v29 = vadd.f32 %v1524_v19, %v2802_v27  ;;  %v1495_v24 = vadd.f32 %v1494_v31, %v2924_v40 }
 0x397   : > { %v1523_v36 = vmul.f32 %v1473_v37, %v2771_v52  ;;  %v1457_v38 = vadd.f32 %v1456_v6, %v2924_v40 }
 0x398   : > { %v1571_v37 = vsel %vm1563_vm10, %v1540_v29, 0.0  ;;  %v1528_v6 = vmul.f32 %v1495_v24, %v2771_v52 }
 0x399   : > { %v1539_v25 = vadd.f32 %v1523_v36, %v2830_v56  ;;  %v1526_v45 = vmul.f32 %v1457_v38, %v2771_v52  ;;  %v1496_v36 = vpop.f32.mrf.mxu0 }
 0x39a   : > { %v1544_v27 = vadd.f32 %v1528_v6, %v2788_v7 }
 0x39b   : > { %v1570_v43 = vsel %vm1562_vm9, %v1539_v25, 0.0  ;;  %v1542_v54 = vadd.f32 %v1526_v45, %v2839_v3 }
 0x39c   : > { %v1583_v50 = vpack.c.bf16 %v1570_v43, %v1569_v13  ;;  %v1475_v49 = vpop.f32.mrf.mxu3  ;;  %v1497_v13 = vadd.f32 %v1496_v36, %v2938_v39  ;;  %v1575_v45 = vsel %vm1563_vm10, %v1544_v27, 0.0 }
 0x39d   : > { %v1476_v51 = vadd.f32 %v1475_v49, %v2924_v40  ;;  %v1573_v62 = vsel %vm1561_vm8, %v1542_v54, 0.0 }
 0x39e   : > { %1591 = vst [vmem:[%s2927_s27 + $0x10] sm:$0xff] %v1583_v50  ;;  %v1458_v5 = vpop.f32.mrf.mxu1  ;;  %v1532_v50 = vmul.f32 %v1497_v13, %v2771_v52 }
 0x39f   : > { %v1527_v46 = vmul.f32 %v1476_v51, %v2771_v52  ;;  %v1459_v56 = vadd.f32 %v1458_v5, %v2938_v39 }
 0x3a0   : > { %v1548_v7 = vadd.f32 %v1532_v50, %v2795_v58 }
 0x3a1   : > { %v1543_v33 = vadd.f32 %v1527_v46, %v2816_v26  ;;  %v1530_v1 = vmul.f32 %v1459_v56, %v2771_v52 }
 0x3a2   : > { %v1579_v56 = vsel %vm1563_vm10, %v1548_v7, 0.0 }
 0x3a3   : > { %v1574_v0 = vsel %vm1562_vm9, %v1543_v33, 0.0  ;;  %v1546_v3 = vadd.f32 %v1530_v1, %v2841_v4 }
 0x3a4   : > { %v1585_v2 = vpack.c.bf16 %v1574_v0, %v1573_v62  ;;  %v1477_v11 = vpop.f32.mrf.mxu3 }
 0x3a5   : > { %v1478_v12 = vadd.f32 %v1477_v11, %v2938_v39  ;;  %v1577_v8 = vsel %vm1561_vm8, %v1546_v3, 0.0 }
 0x3a6   : > { %1593 = vst [vmem:[%s2927_s27 + $0x20] sm:$0xff] %v1585_v2 }
 0x3a7   : > { %v1531_v61 = vmul.f32 %v1478_v12, %v2771_v52 }
 0x3a9   : > { %v1547_v26 = vadd.f32 %v1531_v61, %v2818_v10  ;;  %v1536_v10 = vadd.f32 %v1520_v21, %v2800_v23 }
 0x3ab   : > { %v1578_v17 = vsel %vm1562_vm9, %v1547_v26, 0.0  ;;  %v1567_v18 = vsel %vm1563_vm10, %v1536_v10, 0.0 }
 0x3ac   : > { %v1587_v22 = vpack.c.bf16 %v1578_v17, %v1577_v8 }
 0x3ad   : > { %v1629_v33 = vld [vmem:[%s2927_s27 + $0x20] sm:$0xff] (%p2277_p3) }
 0x3ae   : > { %1595 = vst [vmem:[%s2927_s27 + $0x30] sm:$0xff] %v1587_v22  ;;  %v1508_v4 = vpop.f32.mrf.mxu2 }
 0x3af   : > { %v1509_v30 = vadd.f32 %v1508_v4, %v2904_v14  ;;  %1630 = vst [vmem:[%s1608_s12 + $0x40] sm:$0xff] (%p2277_p3), %v1629_v33 }
 0x3b1   : > { %v1521_v47 = vmul.f32 %v1509_v30, %v2771_v52 }
 0x3b3   : > { %v1537_v59 = vadd.f32 %v1521_v47, %v2883_v53 }
 0x3b5   : > { %v1568_v34 = vsel %vm1564_vm11, %v1537_v59, 0.0  ;;  %v1633_v0 = vld [vmem:[%s2927_s27 + $0x30] sm:$0xff] (%p2277_p3) }
 0x3b6   : > { %v1582_v16 = vpack.c.bf16 %v1568_v34, %v1567_v18  ;;  %v1510_v14 = vpop.f32.mrf.mxu2  ;;  %1634 = vst [vmem:[%s1608_s12 + $0x60] sm:$0xff] (%p2277_p3), %v1633_v0 }
 0x3b7   : > { %v1511_v23 = vadd.f32 %v1510_v14, %v2914_v28 }
 0x3b8   : > { %1590 = vst [vmem:[%s2927_s27 + $0x8] sm:$0xff] %v1582_v16 }
 0x3b9   : > { %v1525_v35 = vmul.f32 %v1511_v23, %v2771_v52 }
 0x3bb   : > { %v1541_v53 = vadd.f32 %v1525_v35, %v2879_v44 }
 0x3bd   : > { %v1572_v60 = vsel %vm1564_vm11, %v1541_v53, 0.0 }
 0x3be   : > { %v1584_v38 = vpack.c.bf16 %v1572_v60, %v1571_v37  ;;  %v1513_v25 = vpop.f32.mrf.mxu2 }
 0x3bf   : > { %v1514_v28 = vadd.f32 %v1513_v25, %v2924_v40  ;;  %v1623_v58 = vld [vmem:[%s2927_s27 + $0x8] sm:$0xff] (%p2277_p3) }
 0x3c0   : > { %1592 = vst [vmem:[%s2927_s27 + $0x18] sm:$0xff] %v1584_v38 }
 0x3c1   : > { %v1529_v44 = vmul.f32 %v1514_v28, %v2771_v52  ;;  %1624 = vst [vmem:[%s1608_s12 + $0x8] sm:$0xff] (%p2277_p3), %v1623_v58 }
 0x3c3   : > { %v1545_v43 = vadd.f32 %v1529_v44, %v2875_v41 }
 0x3c5   : > { %v1576_v49 = vsel %vm1564_vm11, %v1545_v43, 0.0 }
 0x3c6   : > { %v1586_v51 = vpack.c.bf16 %v1576_v49, %v1575_v45  ;;  %v1515_v5 = vpop.f32.mrf.mxu2 }
 0x3c7   : > { %v1516_v40 = vadd.f32 %v1515_v5, %v2938_v39  ;;  %v1627_v39 = vld [vmem:[%s2927_s27 + $0x18] sm:$0xff] (%p2277_p3) }
 0x3c8   : > { %1594 = vst [vmem:[%s2927_s27 + $0x28] sm:$0xff] %v1586_v51 }
 0x3c9   : > { %v1533_v54 = vmul.f32 %v1516_v40, %v2771_v52  ;;  %v1621_v52 = vld [vmem:[%s2927_s27] sm:$0xff] (%p2277_p3)  ;;  %1628 = vst [vmem:[%s1608_s12 + $0x28] sm:$0xff] (%p2277_p3), %v1627_v39 }
 0x3ca   : > { %1622 = vst [vmem:[%s1608_s12] sm:$0xff] (%p2277_p3), %v1621_v52 }
 0x3cb   : > { %v1549_v46 = vadd.f32 %v1533_v54, %v2877_v48  ;;  %v1625_v48 = vld [vmem:[%s2927_s27 + $0x10] sm:$0xff] (%p2277_p3) }
 0x3cc   : > { %1603 = sbr.rel (!%p2277_p3) target bundleno = 985 (0x3d9), region = 169  ;;  %1626 = vst [vmem:[%s1608_s12 + $0x20] sm:$0xff] (%p2277_p3), %v1625_v48 }
 0x3cd   : > { %v1580_v41 = vsel %vm1564_vm11, %v1549_v46, 0.0 }
 0x3ce   : > { %v1588_v42 = vpack.c.bf16 %v1580_v41, %v1579_v56 }
 0x3cf   : > { %v1631_v62 = vld [vmem:[%s2927_s27 + $0x28] sm:$0xff] (%p2277_p3) }
 0x3d0   : > { %1596 = vst [vmem:[%s2927_s27 + $0x38] sm:$0xff] %v1588_v42 }
 0x3d1   : > { %1632 = vst [vmem:[%s1608_s12 + $0x48] sm:$0xff] %v1631_v62 }
 0x3d7   : > { %v1635_v1 = vld [vmem:[%s2927_s27 + $0x38] sm:$0xff] }
 0x3d8   : > { %1636 = vst [vmem:[%s1608_s12 + $0x68] sm:$0xff] %v1635_v1 }
 0x3d9 PF: > { %s21_s9 = sadd.s32 1, %s2092_s9   ;;  %s3087_s21 = sld [smem:[#allocation11_spill]] }
 0x3da   : > { %p18_p10 = scmp.ge.s32.totalorder %s21_s9, 6   ;;  %s3088_s23 = sld [smem:[#allocation12_spill]] }
 0x3db   : > { %s3089_s11 = sld [smem:[#allocation8_spill]]  ;;  %s3092_s15 = smov %s2056_s16 }
 0x3dc   : > { %s3090_s30 = sld [smem:[#allocation9_spill]]  ;;  %s3093_s16 = smov %s2282_s25 }
 0x3dd   : > { %s3091_s10 = sld [smem:[#allocation10_spill]]  ;;  %s3094_s17 = smov %s2064_s18 }
 0x3de   : > { %s3096_s19 = smov %s2072_s20  ;;  %s3099_s22 = smov %s2088_s24 }
 0x3df   : > { %s3095_s18 = smov %s3087_s21  ;;  %20 = sbr.rel (!%p18_p10) target bundleno = 12 (0xc), region = 239 }
 0x3e0   : > { %s3097_s20 = smov %s3088_s23 }
 0x3e1   : > { %s3098_s21 = smov %s3089_s11 }
 0x3e2   : > { %s3100_s23 = smov %s3090_s30 }
 0x3e3   : > { %s3101_s24 = smov %s3091_s10 }

// kernel: tds_forward_pallas.6
= control target key start
LH: loop header
LB: loop body
LE: loop exit
PB: predicated region body
PF: predicated region fallthrough
CT: control target
= control target key end

     0   :  { %s1408_s21 = smov 0   ;;  %s1410_s22 = smov 0   ;;  %s1675_s0 = inlined_call_operand.vmem [shape: bf16[2,32,768], index: 0, kind: input, shape index: {}, may-alias: {0,1}]   ;;  %s1676_s1 = inlined_call_operand.vmem [shape: bf16[2,32,768], index: 1, kind: input, shape index: {}, may-alias: {0,1}]   ;;  %s1677_s2 = inlined_call_operand.vmem [shape: bf16[2,32,768], index: 2, kind: input, shape index: {}, may-alias: {2,3}]   ;;  %s1678_s3 = inlined_call_operand.vmem [shape: bf16[2,32,768], index: 3, kind: input, shape index: {}, may-alias: {2,3}]   ;;  %s1679_s4 = inlined_call_operand.vmem [shape: bf16[32,160], index: 4, kind: input, shape index: {}]   ;;  %s1680_s5 = inlined_call_operand.vmem [shape: f32[32,1], index: 5, kind: input, shape index: {}]   ;;  %s1681_s6 = inlined_call_operand.vmem [shape: bf16[2,32,384], index: 6, kind: output, shape index: {}]  }
   0x1   :  { %s1412_s23 = smov 0   ;;  %s1414_s24 = smov 0  }
   0x2   :  { %s1416_s25 = smov 0  }
   0x3 LB: > { %s28_s26 = sadd.s32 1, %s1364_s24  ;;  %p44_p1 = scmp.ne.s32.totalorder %s1356_s22, %s1352_s21  ;;  %s1368_s25 = sphi %s1416_s25, %s16_s25   ;;  %s1364_s24 = sphi %s1414_s24, %s1686_s24   ;;  %s1360_s23 = sphi %s1412_s23, %s1685_s23   ;;  %s1356_s22 = sphi %s1410_s22, %s1684_s22   ;;  %s1352_s21 = sphi %s1408_s21, %s1683_s21  }
   0x4   : > { %p30_p0 = scmp.ge.s32.totalorder %s28_s26, 2  ;;  %p45_p2 = scmp.eq.s32.totalorder %s1368_s25, 0 }
   0x5   : > { %s37_s29 = sadd.s32 1, %s1356_s22  ;;  %p1135_p5 = scmp.ge.s32.totalorder %s1368_s25, 2 }
   0x6   : > { %s1688_s26 = smov (%p30_p0, %s28_s26), 0  ;;  %p1439_p3 = por %p45_p2, %p44_p1 }
   0x7   : > { %s32_s28 = ssub.s32 %s1364_s24, %s1688_s26  ;;  %238 = sbr.rel (%p1135_p5) target bundleno = 56 (0x38), region = 24 }
   0x8   : > { %p35_p4 = scmp.eq.s32.totalorder %s32_s28, 0 }
   0xa   : > { %s1447_s30 = scalar_select %p35_p4, %s1356_s22, %s37_s29  }
   0xc   : > { %241 = sbr.rel (!%p1439_p3) target bundleno = 25 (0x19), region = 28  ;;  %s243_s7 = sand.u32 (%p1439_p3), 1, %s1356_s22  }
   0xd   : > { %s1279_s8 = smul.u32 (%p1439_p3), 96, %s1364_s24 }
   0xe   : > { %s1278_s9 = smul.u32 (%p1439_p3), 48, %s243_s7 }
   0xf   : > { %s250_s12 = scalar_lea.vmem (%p1439_p3), %s1675_s0, %s1279_s8 }
  0x10   : > { %v265_v0 = vld [vmem:[%s250_s12] sm:$0xff] (%p1439_p3)  ;;  %v267_v1 = vld [vmem:[%s250_s12 + $0x18] sm:$0xff] (%p1439_p3)  ;;  %v269_v2 = vld [vmem:[%s250_s12 + $0x30] sm:$0xff] (%p1439_p3)  ;;  %s245_s13 = scalar_lea.vmem (%p1439_p3), [#allocation2], %s1278_s9 }
  0x11   : > { %266 = vst [vmem:[%s245_s13] sm:$0xff] %v265_v0  ;;  %v271_v3 = vld [vmem:[%s250_s12 + $0x48] sm:$0xff]  ;;  %v1139_v5 = vld [vmem:[%s250_s12 + $0x20] sm:$0xf]  ;;  %v1141_v6 = vld [vmem:[%s250_s12 + $0x38] sm:$0xf] }
  0x12   : > { %268 = vst [vmem:[%s245_s13 + $0xc] sm:$0xff] %v267_v1  ;;  %v1137_v4 = vld [vmem:[%s250_s12 + $0x8] sm:$0xf]  ;;  %v1143_v7 = vld [vmem:[%s250_s12 + $0x50] sm:$0xf] }
  0x13   : > { %270 = vst [vmem:[%s245_s13 + $0x18] sm:$0xff] %v269_v2 }
  0x14   : > { %272 = vst [vmem:[%s245_s13 + $0x24] sm:$0xff] %v271_v3 }
  0x15   : > { %1138 = vst [vmem:[%s245_s13 + $0x8] sm:$0xf] %v1137_v4 }
  0x16   : > { %1140 = vst [vmem:[%s245_s13 + $0x14] sm:$0xf] %v1139_v5 }
  0x17   : > { %1142 = vst [vmem:[%s245_s13 + $0x20] sm:$0xf] %v1141_v6 }
  0x18   : > { %1144 = vst [vmem:[%s245_s13 + $0x2c] sm:$0xf] %v1143_v7 }
  0x19 PF: > { %294 = sbr.rel (!%p1439_p3) target bundleno = 34 (0x22), region = 54  ;;  %s296_s14 = sand.u32 (%p1439_p3), 1, %s1356_s22  }
  0x1a   : > { %s1146_s15 = smul.u32 (%p1439_p3), 96, %s1364_s24  ;;  %s1145_s16 = sshll.u32 (%p1439_p3), %s296_s14, 4 }
  0x1b   : > { %s298_s20 = scalar_lea.vmem (%p1439_p3), [#allocation3], %s1145_s16 }
  0x1c   : > { %s1012_s19 = scalar_lea.vmem (%p1439_p3), %s1676_s1, %s1146_s15 }
  0x1d   : > { %v1147_v8 = vld [vmem:[%s1012_s19 + $0xc] sm:$0xf] (%p1439_p3)  ;;  %v1148_v9 = vld [vmem:[%s1012_s19 + $0x24] sm:$0xf] (%p1439_p3)  ;;  %v1149_v10 = vld [vmem:[%s1012_s19 + $0x3c] sm:$0xf] (%p1439_p3) }
  0x1e   : > { %322 = vst [vmem:[%s298_s20] sm:$0xf] %v1147_v8  ;;  %v1150_v11 = vld [vmem:[%s1012_s19 + $0x54] sm:$0xf] }
  0x1f   : > { %324 = vst [vmem:[%s298_s20 + $0x4] sm:$0xf] %v1148_v9 }
  0x20   : > { %326 = vst [vmem:[%s298_s20 + $0x8] sm:$0xf] %v1149_v10 }
  0x21   : > { %328 = vst [vmem:[%s298_s20 + $0xc] sm:$0xf] %v1150_v11 }
  0x22 PF: > { %360 = sbr.rel (!%p1439_p3) target bundleno = 47 (0x2f), region = 95  ;;  %s362_s28 = sand.u32 (%p1439_p3), 1, %s1356_s22  }
  0x23   : > { %s1281_s29 = smul.u32 (%p1439_p3), 96, %s1364_s24 }
  0x24   : > { %s1280_s7 = smul.u32 (%p1439_p3), 48, %s362_s28 }
  0x25   : > { %s369_s10 = scalar_lea.vmem (%p1439_p3), %s1677_s2, %s1281_s29 }
  0x26   : > { %v384_v12 = vld [vmem:[%s369_s10] sm:$0xff] (%p1439_p3)  ;;  %v386_v13 = vld [vmem:[%s369_s10 + $0x18] sm:$0xff] (%p1439_p3)  ;;  %v388_v14 = vld [vmem:[%s369_s10 + $0x30] sm:$0xff] (%p1439_p3)  ;;  %s364_s11 = scalar_lea.vmem (%p1439_p3), [#allocation4], %s1280_s7 }
  0x27   : > { %385 = vst [vmem:[%s364_s11] sm:$0xff] %v384_v12  ;;  %v390_v15 = vld [vmem:[%s369_s10 + $0x48] sm:$0xff]  ;;  %v1154_v17 = vld [vmem:[%s369_s10 + $0x20] sm:$0xf]  ;;  %v1156_v18 = vld [vmem:[%s369_s10 + $0x38] sm:$0xf] }
  0x28   : > { %387 = vst [vmem:[%s364_s11 + $0xc] sm:$0xff] %v386_v13  ;;  %v1152_v16 = vld [vmem:[%s369_s10 + $0x8] sm:$0xf]  ;;  %v1158_v19 = vld [vmem:[%s369_s10 + $0x50] sm:$0xf] }
  0x29   : > { %389 = vst [vmem:[%s364_s11 + $0x18] sm:$0xff] %v388_v14 }
  0x2a   : > { %391 = vst [vmem:[%s364_s11 + $0x24] sm:$0xff] %v390_v15 }
  0x2b   : > { %1153 = vst [vmem:[%s364_s11 + $0x8] sm:$0xf] %v1152_v16 }
  0x2c   : > { %1155 = vst [vmem:[%s364_s11 + $0x14] sm:$0xf] %v1154_v17 }
  0x2d   : > { %1157 = vst [vmem:[%s364_s11 + $0x20] sm:$0xf] %v1156_v18 }
  0x2e   : > { %1159 = vst [vmem:[%s364_s11 + $0x2c] sm:$0xf] %v1158_v19 }
  0x2f PF: > { %413 = sbr.rel (!%p1439_p3) target bundleno = 56 (0x38), region = 121  ;;  %s415_s12 = sand.u32 (%p1439_p3), 1, %s1356_s22  }
  0x30   : > { %s1161_s13 = smul.u32 (%p1439_p3), 96, %s1364_s24  ;;  %s1160_s14 = sshll.u32 (%p1439_p3), %s415_s12, 4 }
  0x31   : > { %s417_s18 = scalar_lea.vmem (%p1439_p3), [#allocation5], %s1160_s14 }
  0x32   : > { %s1027_s17 = scalar_lea.vmem (%p1439_p3), %s1678_s3, %s1161_s13 }
  0x33   : > { %v1162_v20 = vld [vmem:[%s1027_s17 + $0xc] sm:$0xf] (%p1439_p3)  ;;  %v1163_v21 = vld [vmem:[%s1027_s17 + $0x24] sm:$0xf] (%p1439_p3)  ;;  %v1164_v22 = vld [vmem:[%s1027_s17 + $0x3c] sm:$0xf] (%p1439_p3) }
  0x34   : > { %441 = vst [vmem:[%s417_s18] sm:$0xf] %v1162_v20  ;;  %v1165_v23 = vld [vmem:[%s1027_s17 + $0x54] sm:$0xf] }
  0x35   : > { %443 = vst [vmem:[%s417_s18 + $0x4] sm:$0xf] %v1163_v21 }
  0x36   : > { %445 = vst [vmem:[%s417_s18 + $0x8] sm:$0xf] %v1164_v22 }
  0x37   : > { %447 = vst [vmem:[%s417_s18 + $0xc] sm:$0xf] %v1165_v23 }
  0x38 PF: > { %p1166_p6 = scmp.ge.s32.totalorder %s1368_s25, 1  ;;  %p478_p7 = scmp.lt.s32.totalorder %s1368_s25, 3 }
  0x3a   : > { %p479_p8 = pnand %p1166_p6, %p478_p7 }
  0x3b   : > { %s485_s27 = sand.u32 (!%p479_p8), 1, %s1352_s21   ;;  %s1370_s28 = smov (!%p479_p8), 127  }
  0x3c   : > { %482 = sbr.rel (%p479_p8) target bundleno = 410 (0x19a), region = 162  ;;  %s1511_s7 = sshll.u32 (!%p479_p8), %s485_s27, 4 }
  0x3d   : > { %s1282_s19 = smul.u32 (!%p479_p8), 48, %s485_s27  ;;  %s1371_s8 = smov (!%p479_p8), 126  }
  0x3e   : > { %s494_s9 = scalar_lea.vmem (!%p479_p8), [#allocation3], %s1511_s7  ;;  %s508_s21 = scalar_lea.vmem (!%p479_p8), [#allocation5], %s1511_s7 }
  0x3f   : > { %s501_s20 = scalar_lea.vmem (!%p479_p8), [#allocation4], %s1282_s19  ;;  %s1492_s29 = scalar_lea.vmem (!%p479_p8), [#allocation2], %s1282_s19 }
  0x40   : > { %p558_p9 = scmp.lt.s32.totalorder (!%p479_p8), %s1360_s23, 1 }
  0x41   : > { %v1269_v24 = vld [vmem:[%s501_s20 + $0x1c] sm:$0xf]  ;;  %v1218_v25 = vld [vmem:[%s501_s20 + $0x24] sm:$0xf0]  ;;  %v1266_v26 = vld [vmem:[%s501_s20 + $0x4] sm:$0xf] }
  0x42   : > { %v1221_v27 = vor.u32 %v1269_v24, %v1218_v25  ;;  %v1206_v28 = vld [vmem:[%s501_s20 + $0xc] sm:$0xf0]  ;;  %v1216_v29 = vld [vmem:[%s501_s20 + $0x18] sm:$0xf]  ;;  %v1270_v30 = vld [vmem:[%s501_s20 + $0x20] sm:$0xf0] }
  0x43   : > { %v1209_v31 = vor.u32 %v1266_v26, %v1206_v28  ;;  %v1217_v32 = vor.u32 %v1270_v30, %v1216_v29  ;;  %v1224_v33 = vld [vmem:[%s501_s20 + $0x20] sm:$0xf]  ;;  %v1271_v34 = vld [vmem:[%s501_s20 + $0x28] sm:$0xf0]  ;;  %v1212_v37 = vld [vmem:[%s501_s20 + $0x8] sm:$0xf] }
  0x44   : > { %744 = vrot.lane.b32.xlu0 %v1221_v27, %s1370_s28  ;;  %853 = vmatpush.bf16.msra.mxu2 %v1221_v27  ;;  %v1204_v35 = vld [vmem:[%s501_s20] sm:$0xf]  ;;  %v1267_v36 = vld [vmem:[%s501_s20 + $0x8] sm:$0xf0]  ;;  %v1268_v38 = vld [vmem:[%s501_s20 + $0x10] sm:$0xf0]  ;;  %v1486_v39 = vor.u32 %v1271_v34, %v1224_v33 }
  0x45   : > { %736 = vrot.lane.b32.xlu1 %v1209_v31, %s1370_s28  ;;  %742 = vrot.lane.b32.xlu2 %v1217_v32, %s1370_s28  ;;  %v1205_v40 = vor.u32 %v1267_v36, %v1204_v35  ;;  %v1488_v41 = vor.u32 %v1268_v38, %v1212_v37  ;;  %v1192_v42 = vld [vmem:[%s1492_s29 + $0x20] sm:$0xf]  ;;  %v1261_v43 = vld [vmem:[%s1492_s29 + $0x1c] sm:$0xf]  ;;  %vm692_vm0 = vcmask 1039360   ;;  %vm808_vm1 = vcmask 261120  }
  0x46   : > { %815 = vmatpush.bf16.msra.mxu0 %v1217_v32  ;;  %v1186_v44 = vld [vmem:[%s1492_s29 + $0x24] sm:$0xf0]  ;;  %v1263_v45 = vld [vmem:[%s1492_s29 + $0x28] sm:$0xf0]  ;;  %v1258_v46 = vld [vmem:[%s1492_s29 + $0x4] sm:$0xf] }
  0x47   : > { %v1174_v47 = vld [vmem:[%s1492_s29 + $0xc] sm:$0xf0]  ;;  %v1503_v48 = vor.u32 %v1261_v43, %v1186_v44  ;;  %v1505_v49 = vor.u32 %v1263_v45, %v1192_v42  ;;  %v1180_v51 = vld [vmem:[%s1492_s29 + $0x8] sm:$0xf]  ;;  %v1260_v52 = vld [vmem:[%s1492_s29 + $0x10] sm:$0xf0] }
  0x48   : > { %854 = vmatpush.bf16.msra.mxu2 %v1209_v31  ;;  %v1507_v50 = vor.u32 %v1258_v46, %v1174_v47  ;;  %v1184_v53 = vld [vmem:[%s1492_s29 + $0x18] sm:$0xf]  ;;  %v1262_v54 = vld [vmem:[%s1492_s29 + $0x20] sm:$0xf0]  ;;  %v1520_v55 = vor.u32 %v1260_v52, %v1180_v51  ;;  %v1265_v56 = vld [vmem:[%s494_s9 + $0x8] sm:$0xff]  ;;  %vm721_vm2 = vcmask 1031168  }
  0x49   : > { %v1523_v57 = vor.u32 %v1262_v54, %v1184_v53  ;;  %v1264_v58 = vld [vmem:[%s494_s9] sm:$0xff]  ;;  %v1259_v60 = vld [vmem:[%s1492_s29 + $0x8] sm:$0xf0]  ;;  %v1372_v32 = vmov 0   ;;  %s1690_s23 = smov (!%p558_p9, %s1360_s23), 1 }
  0x4a   : > { %816 = vmatpush.bf16.msra.mxu0 %v1205_v40  ;;  %v1172_v59 = vld [vmem:[%s1492_s29] sm:$0xf]  ;;  %v1273_v62 = vld [vmem:[%s508_s21 + $0x8] sm:$0xff]  ;;  %v1274_v5 = vld [vmem:[%s1679_s4 + $0x4] sm:$0xf]  ;;  %1327 = vset.pattern.permute.xlu0 %v1372_v32  ;;  %s1283_s16 = smul.u32 48, %s1690_s23 }
  0x4b   : > { %v1533_v61 = vor.u32 %v1259_v60, %v1172_v59  ;;  %v1272_v63 = vld [vmem:[%s508_s21] sm:$0xff]  ;;  %v1238_v6 = vld [vmem:[%s1679_s4 + $0x8] sm:$0xf0]  ;;  %v1246_v20 = vld [vmem:[%s1679_s4 + $0x18] sm:$0xf0]  ;;  %1328 = vset.pattern.permute.xlu1 %v1372_v32  ;;  %1329 = vset.pattern.permute.xlu2 %v1372_v32 }
  0x4c   : > { %746 = vrot.lane.b32.xlu0 %v1486_v39, %s1370_s28  ;;  %v1558_v9 = vor.u32 %v1274_v5, %v1238_v6  ;;  %v1276_v19 = vld [vmem:[%s1679_s4 + $0x14] sm:$0xf]  ;;  %v766_v33 = vld [vmem:[%s1680_s5] sm:$0xff]  ;;  %v767_v34 = vld [vmem:[%s1680_s5 + $0x8] sm:$0xff]  ;;  %s1644_s27 = scalar_lea.vmem %s1681_s6, %s1283_s16 }
  0x4d   : > { %738 = vrot.lane.b32.xlu1 %v1488_v41, %s1370_s28  ;;  %734 = vrot.lane.b32.xlu2 %v1205_v40, %s1370_s28  ;;  %v1581_v21 = vor.u32 %v1276_v19, %v1246_v20  ;;  %v1275_v40 = vld [vmem:[%s1679_s4 + $0x4] sm:$0xf0]  ;;  %v768_v51 = vld [vmem:[%s1680_s5 + $0x10] sm:$0xff] }
  0x4e   : > { %v1244_v59 = vld [vmem:[%s1679_s4 + $0x10] sm:$0xf]  ;;  %v1277_v60 = vld [vmem:[%s1679_s4 + $0x14] sm:$0xf0] }
  0x54   : > { %715 = vrot.lane.b32.xlu0 %v1503_v48, %s1371_s8 }
  0x55   : > { %717 = vrot.lane.b32.xlu1 %v1505_v49, %s1371_s8  ;;  %707 = vrot.lane.b32.xlu2 %v1507_v50, %s1371_s8 }
  0x5c   : > { %709 = vrot.lane.b32.xlu0 %v1520_v55, %s1371_s8 }
  0x5d   : > { %719 = vrot.lane.b32.xlu1 %v1265_v56, %s1371_s8  ;;  %713 = vrot.lane.b32.xlu2 %v1523_v57, %s1371_s8 }
  0x64   : > { %686 = vrot.lane.b32.xlu0 %v1503_v48, %s1370_s28 }
  0x65   : > { %688 = vrot.lane.b32.xlu1 %v1505_v49, %s1370_s28  ;;  %711 = vrot.lane.b32.xlu2 %v1264_v58, %s1371_s8 }
  0x6c   : > { %705 = vrot.lane.b32.xlu0 %v1533_v61, %s1371_s8 }
  0x6d   : > { %678 = vrot.lane.b32.xlu1 %v1507_v50, %s1370_s28  ;;  %680 = vrot.lane.b32.xlu2 %v1520_v55, %s1370_s28 }
  0x74   : > { %690 = vrot.lane.b32.xlu0 %v1265_v56, %s1370_s28 }
  0x75   : > { %684 = vrot.lane.b32.xlu1 %v1523_v57, %s1370_s28  ;;  %682 = vrot.lane.b32.xlu2 %v1264_v58, %s1370_s28 }
  0x7c   : > { %748 = vrot.lane.b32.xlu0 %v1273_v62, %s1370_s28 }
  0x7d   : > { %676 = vrot.lane.b32.xlu1 %v1533_v61, %s1370_s28  ;;  %740 = vrot.lane.b32.xlu2 %v1272_v63, %s1370_s28 }
  0x84   : > { %772 = vperm.xlu0 %1327, %v766_v33  }
  0x85   : > { %777 = vperm.xlu1 %1328, %v767_v34   ;;  %782 = vperm.xlu2 %1329, %v768_v51  }
  0x9f   : > { %v743_v0 = vpop.permute.xlu2 %742 }
  0xa7   : > { %v735_v1 = vpop.permute.xlu2 %734 }
  0xaf   : > { %v708_v8 = vpop.permute.xlu2 %707 }
  0xb6   : > { %v745_v2 = vpop.permute.xlu0 %744 }
  0xb7   : > { %v737_v3 = vpop.permute.xlu1 %736  ;;  %v753_v4 = vsel %vm692_vm0, %v743_v0, %v745_v2  ;;  %v714_v14 = vpop.permute.xlu2 %713 }
  0xb8   : > { %840 = vmatpush.bf16.msra.mxu1 %v753_v4  ;;  %v750_v7 = vsel %vm692_vm0, %v735_v1, %v737_v3 }
  0xbc   : > { %841 = vmatpush.bf16.msra.mxu1 %v750_v7 }
  0xbe   : > { %v1560_v10 = vpop.permute.xlu0 %746 }
  0xbf   : > { %v1562_v11 = vpop.permute.xlu1 %738  ;;  %v754_v12 = vsel %vm692_vm0, %v745_v2, %v1560_v10  ;;  %1250 = vmatmul.msk.bf16.vlgmr.msra.gmra.mxu1 %vm808_vm1, %v1558_v9  ;;  %v712_v26 = vpop.permute.xlu2 %711 }
  0xc0   : > { %891 = vmatpush.bf16.msrb.mxu1 %v1486_v39  ;;  %878 = vmatpush.bf16.msra.mxu3 %v754_v12  ;;  %v751_v13 = vsel %vm692_vm0, %v737_v3, %v1562_v11  ;;  %v1236_v39 = vld [vmem:[%s1679_s4] sm:$0xf]  ;;  %v930_v3 = vlaneseq }
  0xc1   : > { %v1237_v46 = vor.u32 %v1275_v40, %v1236_v39 }
  0xc2   : > { %v931_v5 = vand.u32 127, %v930_v3 }
  0xc4   : > { %892 = vmatpush.bf16.msrb.mxu1 %v1488_v41  ;;  %879 = vmatpush.bf16.msra.mxu3 %v751_v13 }
  0xc6   : > { %v716_v15 = vpop.permute.xlu0 %715 }
  0xc7   : > { %v718_v16 = vpop.permute.xlu1 %717  ;;  %v725_v17 = vsel %vm721_vm2, %v714_v14, %v716_v15  ;;  %1252 = vmatmul.msk.bf16.vlgmr.msra.gmra.mxu3 %vm808_vm1, %v1558_v9  ;;  %v681_v31 = vpop.permute.xlu2 %680 }
  0xc8   : > { %817 = vmatpush.bf16.msra.mxu0 %v725_v17  ;;  %v726_v18 = vsel %vm721_vm2, %v716_v15, %v718_v16 }
  0xc9   : > { %855 = vmatpush.bf16.msra.mxu2 %v726_v18 }
  0xce   : > { %v710_v22 = vpop.permute.xlu0 %709 }
  0xcf   : > { %v720_v23 = vpop.permute.xlu1 %719  ;;  %v723_v24 = vsel %vm721_vm2, %v708_v8, %v710_v22  ;;  %1251 = vmatmul.msk.bf16.gmra.mxu1 %vm808_vm1, %v1581_v21  ;;  %v724_v27 = vsel %vm721_vm2, %v710_v22, %v712_v26  ;;  %v683_v41 = vpop.permute.xlu2 %682 }
  0xd0   : > { %856 = vmatpush.bf16.msra.mxu2 %v723_v24  ;;  %v727_v25 = vsel %vm721_vm2, %v718_v16, %v720_v23  ;;  %v695_v47 = vsel %vm692_vm0, %v681_v31, %v683_v41 }
  0xd1   : > { %893 = vmatpush.bf16.msrb.mxu1 %v727_v25 }
  0xd5   : > { %894 = vmatpush.bf16.msrb.mxu1 %v724_v27 }
  0xd6   : > { %v687_v28 = vpop.permute.xlu0 %686 }
  0xd7   : > { %v689_v29 = vpop.permute.xlu1 %688  ;;  %1253 = vmatmul.msk.bf16.gmra.mxu3 %vm808_vm1, %v1581_v21 }
  0xd8   : > { %v697_v30 = vsel %vm692_vm0, %v687_v28, %v689_v29 }
  0xd9   : > { %857 = vmatpush.bf16.msra.mxu2 %v697_v30 }
  0xde   : > { %v706_v35 = vpop.permute.xlu0 %705 }
  0xdf   : > { %v679_v36 = vpop.permute.xlu1 %678  ;;  %v722_v37 = vsel %vm721_vm2, %v706_v35, %v708_v8  ;;  %v933_v8 = vadd.s32 256, %v931_v5 }
  0xe0   : > { %818 = vmatpush.bf16.msra.mxu0 %v722_v37  ;;  %v694_v38 = vsel %vm692_vm0, %v679_v36, %v681_v31 }
  0xe1   : > { %858 = vmatpush.bf16.msra.mxu2 %v694_v38  ;;  %vm940_vm3 = vcmp.lt.s32.totalorder %v933_v8, 272 }
  0xe5   : > { %859 = vmatpush.bf16.msra.mxu2 %v1503_v48  ;;  %v769_v48 = vld [vmem:[%s1680_s5 + $0x18] sm:$0xff] }
  0xe6   : > { %v691_v42 = vpop.permute.xlu0 %690  ;;  %787 = vperm.xlu1 %1328, %v769_v48  }
  0xe7   : > { %v685_v43 = vpop.permute.xlu1 %684  ;;  %v698_v44 = vsel %vm692_vm0, %v689_v29, %v691_v42 }
  0xe8   : > { %v696_v45 = vsel %vm692_vm0, %v685_v43, %v687_v28  ;;  %895 = vmatpush.bf16.msrb.mxu1 %v698_v44 }
  0xe9   : > { %819 = vmatpush.bf16.msra.mxu0 %v696_v45  ;;  %860 = vmatpush.bf16.msra.mxu2 %v1507_v50  ;;  %v741_v50 = vpop.permute.xlu2 %740 }
  0xea   : > { %v752_v58 = vsel %vm692_vm0, %v1562_v11, %v741_v50 }
  0xec   : > { %861 = vmatmul.bf16.vlgmr.msra.gmra.mxu2 %v1237_v46  ;;  %896 = vmatpush.bf16.msrb.mxu1 %v695_v47 }
  0xee   : > { %v749_v52 = vpop.permute.xlu0 %748 }
  0xef   : > { %v677_v53 = vpop.permute.xlu1 %676  ;;  %v755_v54 = vsel %vm692_vm0, %v1560_v10, %v749_v52 }
  0xf0   : > { %v693_v56 = vsel %vm692_vm0, %v677_v53, %v679_v36  ;;  %916 = vmatpush.bf16.msrb.mxu3 %v755_v54  ;;  %897 = vmatpush.bf16.msrb.mxu1 %v1505_v49  ;;  %v1245_v49 = vor.u32 %v1277_v60, %v1244_v59 }
  0xf1   : > { %820 = vmatpush.bf16.msra.mxu0 %v693_v56  ;;  %v783_v33 = vpop.permute.xlu2 %782 }
  0xf4   : > { %917 = vmatpush.bf16.msrb.mxu3 %v752_v58  ;;  %898 = vmatpush.bf16.msrb.mxu1 %v1520_v55 }
  0xf5   : > { %821 = vmatpush.bf16.msra.mxu0 %v1523_v57 }
  0xf6   : > { %v773_v7 = vpop.permute.xlu0 %772 }
  0xf7   : > { %1254 = vmatmul.msk.bf16.vlgmr.msrb.gmra.mxu3 %vm808_vm1, %v1558_v9  ;;  %899 = vmatmul.bf16.vlgmr.msrb.gmra.mxu1 %v1237_v46  ;;  %v778_v19 = vpop.permute.xlu1 %777 }
  0xf9   : > { %822 = vmatpush.bf16.msra.mxu0 %v1533_v61 }
  0xfc   : > { %823 = vmatmul.bf16.vlgmr.msra.gmra.mxu0 %v1237_v46  ;;  %866 = vmatmul.bf16.gmra.mxu2 %v1245_v49 }
 0x107   : > { %1255 = vmatmul.msk.bf16.gmra.mxu3 %vm808_vm1, %v1581_v21  ;;  %904 = vmatmul.bf16.gmra.mxu1 %v1245_v49 }
 0x10c   : > { %828 = vmatmul.bf16.gmra.mxu0 %v1245_v49 }
 0x13c   : > { %v843_v55 = vpop.f32.mrf.mxu1 }
 0x144   : > { %v845_v62 = vpop.f32.mrf.mxu1 }
 0x14a   : > { %v881_v57 = vpop.f32.mrf.mxu3 }
 0x14c   : > { %v848_v0 = vpop.f32.mrf.mxu1 }
 0x152   : > { %v883_v63 = vpop.f32.mrf.mxu3 }
 0x154   : > { %v1635_v2 = vpop.f32.mrf.mxu1 }
 0x158   : > { %v788_v45 = vpop.permute.xlu1 %787 }
 0x15a   : > { %v886_v1 = vpop.f32.mrf.mxu3 }
 0x162   : > { %v1638_v61 = vpop.f32.mrf.mxu3 }
 0x16f   : > { %v862_v4 = vpop.f32.mrf.mxu2 }
 0x170   : > { %v863_v10 = vadd.f32 %v862_v4, %v773_v7 }
 0x172   : > { %v882_v16 = vadd.f32 %v881_v57, %v863_v10 }
 0x174   : > { %v900_v6 = vpop.f32.mrf.mxu1 }
 0x175   : > { %v901_v9 = vadd.f32 %v900_v6, %v773_v7 }
 0x177   : > { %v864_v11 = vpop.f32.mrf.mxu2 }
 0x178   : > { %v865_v23 = vadd.f32 %v864_v11, %v778_v19 }
 0x179   : > { %v824_v12 = vpop.f32.mrf.mxu0 }
 0x17a   : > { %v825_v13 = vadd.f32 %v824_v12, %v773_v7  ;;  %v919_v14 = vpop.f32.mrf.mxu3  ;;  %v884_v30 = vadd.f32 %v883_v63, %v865_v23 }
 0x17b   : > { %v920_v15 = vadd.f32 %v919_v14, %v901_v9 }
 0x17c   : > { %v844_v17 = vadd.f32 %v843_v55, %v825_v13  ;;  %v902_v18 = vpop.f32.mrf.mxu1 }
 0x17d   : > { %v943_v20 = vsel %vm940_vm3, %v920_v15, 0.0  ;;  %v903_v25 = vadd.f32 %v902_v18, %v778_v19 }
 0x17e   : > { %v953_v21 = vpack.c.bf16 %v882_v16, %v844_v17  ;;  %v954_v22 = vpack.c.bf16 %v943_v20, %v943_v20 }
 0x17f   : > { %v867_v28 = vpop.f32.mrf.mxu2 }
 0x180   : > { %961 = vst [vmem:[%s1644_s27] sm:$0xff] %v953_v21  ;;  %v868_v38 = vadd.f32 %v867_v28, %v783_v33 }
 0x181   : > { %v826_v24 = vpop.f32.mrf.mxu0  ;;  %962 = vst [vmem:[%s1644_s27 + $0x8] sm:$0xf] %v954_v22 }
 0x182   : > { %v827_v26 = vadd.f32 %v826_v24, %v778_v19  ;;  %v921_v27 = vpop.f32.mrf.mxu3  ;;  %v887_v43 = vadd.f32 %v886_v1, %v868_v38 }
 0x183   : > { %v922_v29 = vadd.f32 %v921_v27, %v903_v25 }
 0x184   : > { %v846_v31 = vadd.f32 %v845_v62, %v827_v26  ;;  %v905_v32 = vpop.f32.mrf.mxu1 }
 0x185   : > { %v946_v34 = vsel %vm940_vm3, %v922_v29, 0.0  ;;  %v906_v37 = vadd.f32 %v905_v32, %v783_v33 }
 0x186   : > { %v955_v35 = vpack.c.bf16 %v884_v30, %v846_v31  ;;  %v956_v36 = vpack.c.bf16 %v946_v34, %v946_v34 }
 0x187   : > { %v869_v46 = vpop.f32.mrf.mxu2 }
 0x188   : > { %963 = vst [vmem:[%s1644_s27 + $0xc] sm:$0xff] %v955_v35  ;;  %v870_v53 = vadd.f32 %v869_v46, %v788_v45 }
 0x189   : > { %v829_v39 = vpop.f32.mrf.mxu0  ;;  %964 = vst [vmem:[%s1644_s27 + $0x14] sm:$0xf] %v956_v36 }
 0x18a   : > { %v830_v40 = vadd.f32 %v829_v39, %v783_v33  ;;  %v924_v41 = vpop.f32.mrf.mxu3  ;;  %v889_v60 = vadd.f32 %v1638_v61, %v870_v53 }
 0x18b   : > { %v925_v42 = vadd.f32 %v924_v41, %v906_v37 }
 0x18c   : > { %v849_v44 = vadd.f32 %v848_v0, %v830_v40  ;;  %v907_v52 = vpop.f32.mrf.mxu1 }
 0x18d   : > { %v949_v47 = vsel %vm940_vm3, %v925_v42, 0.0  ;;  %v908_v50 = vadd.f32 %v907_v52, %v788_v45 }
 0x18e   : > { %v957_v48 = vpack.c.bf16 %v887_v43, %v849_v44  ;;  %v958_v51 = vpack.c.bf16 %v949_v47, %v949_v47 }
 0x190   : > { %965 = vst [vmem:[%s1644_s27 + $0x18] sm:$0xff] %v957_v48 }
 0x191   : > { %v831_v54 = vpop.f32.mrf.mxu0  ;;  %966 = vst [vmem:[%s1644_s27 + $0x20] sm:$0xf] %v958_v51 }
 0x192   : > { %v832_v56 = vadd.f32 %v831_v54, %v788_v45  ;;  %v926_v58 = vpop.f32.mrf.mxu3 }
 0x193   : > { %v927_v59 = vadd.f32 %v926_v58, %v908_v50 }
 0x194   : > { %v851_v49 = vadd.f32 %v1635_v2, %v832_v56 }
 0x195   : > { %v952_v55 = vsel %vm940_vm3, %v927_v59, 0.0 }
 0x196   : > { %v959_v57 = vpack.c.bf16 %v889_v60, %v851_v49  ;;  %v960_v62 = vpack.c.bf16 %v952_v55, %v952_v55 }
 0x198   : > { %967 = vst [vmem:[%s1644_s27 + $0x24] sm:$0xff] %v959_v57 }
 0x199   : > { %968 = vst [vmem:[%s1644_s27 + $0x2c] sm:$0xf] %v960_v62 }
 0x19a PF: > { %s16_s25 = sadd.s32 1, %s1368_s25   ;;  %s1683_s21 = smov %s1356_s22 }
 0x19b   : > { %p13_p10 = scmp.ge.s32.totalorder %s16_s25, 4   ;;  %s1684_s22 = smov %s1447_s30 }
 0x19c   : > { %s1685_s23 = smov %s1364_s24  ;;  %s1686_s24 = smov %s1688_s26 }
 0x19d   :  { %15 = sbr.rel (!%p13_p10) target bundleno = 3 (0x3), region = 249 }

// kernel: tds_forward_pallas.7
= control target key start
LH: loop header
LB: loop body
LE: loop exit
PB: predicated region body
PF: predicated region fallthrough
CT: control target
= control target key end

     0   :  { %s1784_s13 = smov 0   ;;  %s1786_s14 = smov 0   ;;  %s2272_s0 = inlined_call_operand.vmem [shape: bf16[2,32,384], index: 0, kind: input, shape index: {}, may-alias: {0,1,2}]   ;;  %s2273_s1 = inlined_call_operand.vmem [shape: bf16[2,32,384], index: 1, kind: input, shape index: {}, may-alias: {0,1,2}]   ;;  %s2274_s2 = inlined_call_operand.vmem [shape: bf16[2,32,384], index: 2, kind: input, shape index: {}, may-alias: {0,1,2}]   ;;  %s2275_s3 = inlined_call_operand.vmem [shape: bf16[32,160], index: 3, kind: input, shape index: {}]   ;;  %s2276_s4 = inlined_call_operand.vmem [shape: f32[32,1], index: 4, kind: input, shape index: {}]   ;;  %s2277_s5 = inlined_call_operand.vmem [shape: bf16[32,32], index: 5, kind: input, shape index: {}]   ;;  %s2278_s6 = inlined_call_operand.vmem [shape: f32[32,1], index: 6, kind: input, shape index: {}]   ;;  %s2279_s7 = inlined_call_operand.vmem [shape: bf16[32,32], index: 7, kind: input, shape index: {}]   ;;  %s2280_s8 = inlined_call_operand.vmem [shape: f32[32,1], index: 8, kind: input, shape index: {}]   ;;  %s2281_s9 = inlined_call_operand.<no memory space> [shape: f32[1], index: 9, kind: input, shape index: {}]   ;;  %s2282_s10 = inlined_call_operand.vmem [shape: bf16[2,32,384], index: 10, kind: output, shape index: {}]  }
   0x1   :  { %15 = sst [smem:[#allocation2]] %s2281_s9  ;;  %s1788_s15 = smov 0  }
   0x2 LB: > { %s33_s16 = sadd.s32 1, %s1714_s14  ;;  %p1529_p1 = scmp.ge.s32.totalorder %s1718_s15, 2  ;;  %s1718_s15 = sphi %s1788_s15, %s21_s15   ;;  %s1714_s14 = sphi %s1786_s14, %s2284_s14   ;;  %s1710_s13 = sphi %s1784_s13, %s2283_s13  }
   0x3   : > { %p35_p0 = scmp.ge.s32.totalorder %s33_s16, 2  ;;  %p1534_p2 = scmp.ge.s32.totalorder %s1718_s15, 1 }
   0x4   : > { %p494_p3 = scmp.lt.s32.totalorder %s1718_s15, 3 }
   0x5   : > { %s2286_s16 = smov (%p35_p0, %s33_s16), 0 }
   0x6   : > { %p495_p4 = pnand %p1534_p2, %p494_p3 }
   0x7   : > { %p567_p5 = scmp.lt.s32.totalorder (!%p495_p4), %s1710_s13, 1  ;;  %s1721_s20 = smov (!%p495_p4), 124  }
   0x8   : > { %498 = sbr.rel (%p495_p4) target bundleno = 869 (0x365), region = 134  ;;  %s1722_s21 = smov (!%p495_p4), 125  }
   0x9   : > { %s1723_s22 = smov (!%p495_p4), 126   ;;  %s1724_s23 = smov (!%p495_p4), 127  }
   0xa   : > { %s1725_s24 = smov (!%p495_p4), 2   ;;  %s751_s29 = sld [smem:[#allocation2]] (!%p495_p4) }
   0xd   : > { %s2288_s13 = smov (!%p567_p5, %s1710_s13), 1  ;;  %v1720_v0 = vmov 0   ;;  %vm721_vm0 = vcmask 1022976   ;;  %vm744_vm1 = vcmask 1014784   ;;  %vm700_vm2 = vcmask 1031168  }
   0xe   : > { %s1637_s9 = smul.u32 48, %s2288_s13  ;;  %1685 = vset.pattern.permute.xlu1 %v1720_v0  ;;  %1687 = vset.pattern.permute.xlu0 %v1720_v0  ;;  %v623_v19 = vunpack.c.l.b16 %v1720_v0  ;;  %vm681_vm3 = vcmask 1039360   ;;  %vm878_vm4 = vcmask 15360   ;;  %vm939_vm5 = vcmask 261120  }
   0xf   : > { %1686 = vset.pattern.permute.xlu2 %v1720_v0 }
  0x10   : > { %s1811_s19 = scalar_lea.vmem %s2273_s1, %s1637_s9  ;;  %v1859_v20 = vpack.c.b16 %v623_v19, %v623_v19 }
  0x11   : > { %v1553_v1 = vld [vmem:[%s1811_s19 + $0x18] sm:$0xf]  ;;  %v1621_v2 = vld [vmem:[%s1811_s19 + $0x20] sm:$0xf0]  ;;  %v1541_v3 = vld [vmem:[%s1811_s19] sm:$0xf] }
  0x12   : > { %v1816_v4 = vor.u32 %v1621_v2, %v1553_v1  ;;  %v1618_v5 = vld [vmem:[%s1811_s19 + $0x8] sm:$0xf0]  ;;  %v1620_v7 = vld [vmem:[%s1811_s19 + $0x1c] sm:$0xf]  ;;  %v1555_v8 = vld [vmem:[%s1811_s19 + $0x24] sm:$0xf0] }
  0x13   : > { %v1819_v6 = vor.u32 %v1618_v5, %v1541_v3  ;;  %v1617_v9 = vld [vmem:[%s1811_s19 + $0x4] sm:$0xf]  ;;  %v1543_v10 = vld [vmem:[%s1811_s19 + $0xc] sm:$0xf0]  ;;  %v1831_v11 = vor.u32 %v1620_v7, %v1555_v8  ;;  %v1561_v13 = vld [vmem:[%s1811_s19 + $0x20] sm:$0xf] }
  0x14   : > { %736 = vrot.lane.b32.xlu2 %v1816_v4, %s1721_s20  ;;  %713 = vrot.lane.b32.xlu0 %v1816_v4, %s1722_s21  ;;  %v1833_v12 = vor.u32 %v1617_v9, %v1543_v10  ;;  %v1622_v14 = vld [vmem:[%s1811_s19 + $0x28] sm:$0xf0]  ;;  %v1549_v16 = vld [vmem:[%s1811_s19 + $0x8] sm:$0xf] }
  0x15   : > { %705 = vrot.lane.b32.xlu1 %v1819_v6, %s1722_s21  ;;  %v1843_v15 = vor.u32 %v1622_v14, %v1561_v13  ;;  %v1619_v17 = vld [vmem:[%s1811_s19 + $0x10] sm:$0xf0] }
  0x16   : > { %v1851_v18 = vor.u32 %v1619_v17, %v1549_v16 }
  0x1c   : > { %738 = vrot.lane.b32.xlu2 %v1831_v11, %s1721_s20  ;;  %715 = vrot.lane.b32.xlu0 %v1831_v11, %s1722_s21 }
  0x1d   : > { %707 = vrot.lane.b32.xlu1 %v1833_v12, %s1722_s21 }
  0x24   : > { %696 = vrot.lane.b32.xlu2 %v1831_v11, %s1723_s22  ;;  %740 = vrot.lane.b32.xlu0 %v1843_v15, %s1721_s20 }
  0x25   : > { %694 = vrot.lane.b32.xlu1 %v1816_v4, %s1723_s22 }
  0x2c   : > { %732 = vrot.lane.b32.xlu2 %v1851_v18, %s1721_s20  ;;  %728 = vrot.lane.b32.xlu0 %v1819_v6, %s1721_s20 }
  0x2d   : > { %730 = vrot.lane.b32.xlu1 %v1833_v12, %s1721_s20 }
  0x34   : > { %673 = vrot.lane.b32.xlu2 %v1859_v20, %s1724_s23  ;;  %688 = vrot.lane.b32.xlu0 %v1819_v6, %s1723_s22 }
  0x35   : > { %690 = vrot.lane.b32.xlu1 %v1833_v12, %s1723_s22 }
  0x3c   : > { %717 = vrot.lane.b32.xlu2 %v1843_v15, %s1722_s21  ;;  %675 = vrot.lane.b32.xlu0 %v1816_v4, %s1724_s23 }
  0x3d   : > { %677 = vrot.lane.b32.xlu1 %v1831_v11, %s1724_s23 }
  0x44   : > { %667 = vrot.lane.b32.xlu2 %v1819_v6, %s1724_s23  ;;  %719 = vrot.lane.b32.xlu0 %v1859_v20, %s1722_s21 }
  0x45   : > { %665 = vrot.lane.b32.xlu1 %v1859_v20, %s1724_s23 }
  0x4c   : > { %711 = vrot.lane.b32.xlu2 %v1859_v20, %s1722_s21  ;;  %669 = vrot.lane.b32.xlu0 %v1833_v12, %s1724_s23 }
  0x4d   : > { %709 = vrot.lane.b32.xlu1 %v1851_v18, %s1722_s21 }
  0x54   : > { %679 = vrot.lane.b32.xlu2 %v1843_v15, %s1724_s23  ;;  %698 = vrot.lane.b32.xlu0 %v1843_v15, %s1723_s22 }
  0x55   : > { %692 = vrot.lane.b32.xlu1 %v1851_v18, %s1723_s22 }
  0x5c   : > { %734 = vrot.lane.b32.xlu2 %v1859_v20, %s1721_s20  ;;  %671 = vrot.lane.b32.xlu0 %v1851_v18, %s1724_s23 }
  0x5d   : > { %742 = vrot.lane.b32.xlu1 %v1859_v20, %s1721_s20 }
  0x6e   : > { %v737_v21 = vpop.permute.xlu2 %736 }
  0x6f   : > { %870 = vrot.lane.b32.xlu1 %v737_v21, %s1725_s24 }
  0x76   : > { %v739_v24 = vpop.permute.xlu2 %738 }
  0x77   : > { %v748_v42 = vsel %vm744_vm1, %v737_v21, %v739_v24 }
  0x7e   : > { %v697_v27 = vpop.permute.xlu2 %696 }
  0x86   : > { %v714_v22 = vpop.permute.xlu0 %713  ;;  %v1891_v30 = vpop.permute.xlu2 %732 }
  0x87   : > { %v706_v23 = vpop.permute.xlu1 %705  ;;  %854 = vrot.lane.b32.xlu0 %v714_v22, %s1725_s24 }
  0x88   : > { %846 = vrot.lane.b32.xlu2 %v706_v23, %s1725_s24 }
  0x8e   : > { %v716_v25 = vpop.permute.xlu0 %715  ;;  %v674_v35 = vpop.permute.xlu2 %673 }
  0x8f   : > { %v708_v26 = vpop.permute.xlu1 %707  ;;  %v725_v37 = vsel %vm721_vm0, %v714_v22, %v716_v25 }
  0x90   : > { %v722_v33 = vsel %vm721_vm0, %v706_v23, %v708_v26 }
  0x96   : > { %v1888_v28 = vpop.permute.xlu0 %740  ;;  %v718_v43 = vpop.permute.xlu2 %717 }
  0x97   : > { %v695_v29 = vpop.permute.xlu1 %694  ;;  %v749_v41 = vsel %vm744_vm1, %v739_v24, %v1888_v28  ;;  %v726_v52 = vsel %vm721_vm0, %v716_v25, %v718_v43 }
  0x98   : > { %838 = vrot.lane.b32.xlu0 %v695_v29, %s1725_s24  ;;  %v703_v46 = vsel %vm700_vm2, %v695_v29, %v697_v27  ;;  %v1567_v29 = vld [vmem:[%s2275_s3 + $0x8] sm:$0xf0] }
  0x9e   : > { %v729_v31 = vpop.permute.xlu0 %728  ;;  %v668_v49 = vpop.permute.xlu2 %667 }
  0x9f   : > { %v731_v32 = vpop.permute.xlu1 %730  ;;  %862 = vrot.lane.b32.xlu1 %v729_v31, %s1725_s24 }
  0xa0   : > { %848 = vrot.lane.b32.xlu0 %v722_v33, %s1725_s24  ;;  %v746_v34 = vsel %vm744_vm1, %v731_v32, %v1891_v30  ;;  %v745_v47 = vsel %vm744_vm1, %v729_v31, %v731_v32 }
  0xa6   : > { %v689_v36 = vpop.permute.xlu0 %688  ;;  %v712_v55 = vpop.permute.xlu2 %711 }
  0xa7   : > { %v691_v38 = vpop.permute.xlu1 %690  ;;  %830 = vrot.lane.b32.xlu2 %v689_v36, %s1725_s24  ;;  %856 = vrot.lane.b32.xlu1 %v725_v37, %s1725_s24 }
  0xa8   : > { %866 = vrot.lane.b32.xlu0 %v746_v34, %s1725_s24  ;;  %v701_v39 = vsel %vm700_vm2, %v689_v36, %v691_v38 }
  0xae   : > { %v676_v40 = vpop.permute.xlu0 %675  ;;  %v680_v0 = vpop.permute.xlu2 %679 }
  0xaf   : > { %874 = vrot.lane.b32.xlu2 %v749_v41, %s1725_s24  ;;  %872 = vrot.lane.b32.xlu1 %v748_v42, %s1725_s24  ;;  %v678_v44 = vpop.permute.xlu1 %677  ;;  %v685_v53 = vsel %vm681_vm3, %v674_v35, %v676_v40 }
  0xb0   : > { %832 = vrot.lane.b32.xlu0 %v701_v39, %s1725_s24  ;;  %v686_v45 = vsel %vm681_vm3, %v676_v40, %v678_v44  ;;  %v687_v2 = vsel %vm681_vm3, %v678_v44, %v680_v0  ;;  %v1625_v44 = vld [vmem:[%s2275_s3 + $0x14] sm:$0xf] }
  0xb6   : > { %v720_v48 = vpop.permute.xlu0 %719  ;;  %v735_v7 = vpop.permute.xlu2 %734 }
  0xb7   : > { %840 = vrot.lane.b32.xlu1 %v703_v46, %s1725_s24  ;;  %864 = vrot.lane.b32.xlu2 %v745_v47, %s1725_s24  ;;  %v666_v50 = vpop.permute.xlu1 %665  ;;  %v727_v59 = vsel %vm721_vm0, %v718_v43, %v720_v48  ;;  %v747_v8 = vsel %vm744_vm1, %v1891_v30, %v735_v7 }
  0xb8   : > { %824 = vrot.lane.b32.xlu0 %v686_v45, %s1725_s24  ;;  %v682_v51 = vsel %vm681_vm3, %v666_v50, %v668_v49  ;;  %v1575_v45 = vld [vmem:[%s2275_s3 + $0x18] sm:$0xf0]  ;;  %v758_v50 = vld [vmem:[%s2276_s4 + $0x10] sm:$0xff] }
  0xb9   : > { %v2007_v47 = vor.u32 %v1625_v44, %v1575_v45 }
  0xbe   : > { %v670_v54 = vpop.permute.xlu0 %669 }
  0xbf   : > { %858 = vrot.lane.b32.xlu1 %v726_v52, %s1725_s24  ;;  %822 = vrot.lane.b32.xlu2 %v685_v53, %s1725_s24  ;;  %v710_v56 = vpop.permute.xlu1 %709  ;;  %v683_v58 = vsel %vm681_vm3, %v668_v49, %v670_v54 }
  0xc0   : > { %814 = vrot.lane.b32.xlu0 %v682_v51, %s1725_s24  ;;  %v724_v57 = vsel %vm721_vm0, %v710_v56, %v712_v55  ;;  %v723_v61 = vsel %vm721_vm0, %v708_v26, %v710_v56 }
  0xc6   : > { %v699_v60 = vpop.permute.xlu0 %698 }
  0xc7   : > { %816 = vrot.lane.b32.xlu1 %v683_v58, %s1725_s24  ;;  %860 = vrot.lane.b32.xlu2 %v727_v59, %s1725_s24  ;;  %v704_v62 = vsel %vm700_vm2, %v697_v27, %v699_v60  ;;  %v693_v63 = vpop.permute.xlu1 %692 }
  0xc8   : > { %852 = vrot.lane.b32.xlu0 %v724_v57, %s1725_s24  ;;  %v702_v1 = vsel %vm700_vm2, %v691_v38, %v693_v63  ;;  %v757_v57 = vld [vmem:[%s2276_s4 + $0x8] sm:$0xff] }
  0xce   : > { %v672_v3 = vpop.permute.xlu0 %671 }
  0xcf   : > { %806 = vrot.lane.b32.xlu1 %v1859_v20, %s1725_s24  ;;  %850 = vrot.lane.b32.xlu2 %v723_v61, %s1725_s24  ;;  %v684_v5 = vsel %vm681_vm3, %v670_v54, %v672_v3  ;;  %v756_v54 = vld [vmem:[%s2276_s4] sm:$0xff] }
  0xd0   : > { %842 = vrot.lane.b32.xlu0 %v704_v62, %s1725_s24  ;;  %v1565_v61 = vld [vmem:[%s2275_s3] sm:$0xf]  ;;  %v1624_v62 = vld [vmem:[%s2275_s3 + $0x4] sm:$0xf0] }
  0xd7   : > { %844 = vrot.lane.b32.xlu1 %v699_v60, %s1725_s24  ;;  %808 = vrot.lane.b32.xlu2 %v1816_v4, %s1725_s24  ;;  %v743_v4 = vpop.permute.xlu1 %742 }
  0xd8   : > { %800 = vrot.lane.b32.xlu0 %v1819_v6, %s1725_s24  ;;  %v750_v6 = vsel %vm744_vm1, %v1888_v28, %v743_v4  ;;  %v1623_v28 = vld [vmem:[%s2275_s3 + $0x4] sm:$0xf]  ;;  %v1566_v4 = vor.u32 %v1624_v62, %v1565_v61  ;;  %v2104_v62 = vld [vmem:[%s1811_s19 + $0x18] sm:$0xff] }
  0xd9   : > { %v1983_v32 = vor.u32 %v1623_v28, %v1567_v29 }
  0xdf   : > { %798 = vrot.lane.b32.xlu2 %v1859_v20, %s1725_s24  ;;  %834 = vrot.lane.b32.xlu1 %v702_v1, %s1725_s24 }
  0xe0   : > { %826 = vrot.lane.b32.xlu0 %v687_v2, %s1725_s24 }
  0xe1   : > { %v871_v14 = vpop.permute.xlu1 %870 }
  0xe2   : > { %v847_v9 = vpop.permute.xlu2 %846 }
  0xe7   : > { %828 = vrot.lane.b32.xlu1 %v680_v0, %s1725_s24  ;;  %836 = vrot.lane.b32.xlu2 %v693_v63, %s1725_s24 }
  0xe8   : > { %820 = vrot.lane.b32.xlu0 %v672_v3, %s1725_s24 }
  0xef   : > { %818 = vrot.lane.b32.xlu2 %v684_v5, %s1725_s24  ;;  %876 = vrot.lane.b32.xlu1 %v750_v6, %s1725_s24  ;;  %v1122_v5 = vld [vmem:[%s2278_s6 + $0x18] sm:$0xff] }
  0xf0   : > { %812 = vrot.lane.b32.xlu0 %v1843_v15, %s1725_s24 }
  0xf7   : > { %810 = vrot.lane.b32.xlu2 %v1831_v11, %s1725_s24  ;;  %868 = vrot.lane.b32.xlu1 %v747_v8, %s1725_s24 }
  0xf8   : > { %804 = vrot.lane.b32.xlu0 %v1851_v18, %s1725_s24 }
  0xf9   : > { %v855_v13 = vpop.permute.xlu0 %854 }
  0xff   : > { %802 = vrot.lane.b32.xlu2 %v1833_v12, %s1725_s24  ;;  %772 = vperm.xlu1 %1685, %v758_v50   ;;  %s2229_s24 = scalar_lea.vmem %s2282_s10, %s1637_s9 }
 0x100   : > { %762 = vperm.xlu0 %1687, %v756_v54  }
 0x101   : > { %v831_v10 = vpop.permute.xlu2 %830 }
 0x107   : > { %767 = vperm.xlu1 %1685, %v757_v57  }
 0x109   : > { %v1963_v15 = vpop.permute.xlu2 %874 }
 0x10a   : > { %v839_v16 = vpop.permute.xlu0 %838 }
 0x10f   : > { %1140 = vperm.xlu1 %1685, %v1122_v5  }
 0x111   : > { %v865_v17 = vpop.permute.xlu2 %864  ;;  %v863_v19 = vpop.permute.xlu1 %862 }
 0x112   : > { %v849_v20 = vpop.permute.xlu0 %848  ;;  %v903_v30 = vsel %vm878_vm4, %v863_v19, %v865_v17 }
 0x113   : > { %v897_v23 = vsel %vm878_vm4, %v847_v9, %v849_v20 }
 0x119   : > { %v823_v21 = vpop.permute.xlu2 %822  ;;  %v857_v11 = vpop.permute.xlu1 %856 }
 0x11a   : > { %v1965_v22 = vpop.permute.xlu0 %866  ;;  %v900_v18 = vsel %vm878_vm4, %v855_v13, %v857_v11 }
 0x11b   : > { %946 = vmatpush.bf16.msra.mxu0 %v900_v18  ;;  %v904_v31 = vsel %vm878_vm4, %v865_v17, %v1965_v22  ;;  %v1626_v17 = vld [vmem:[%s2275_s3 + $0x14] sm:$0xf0] }
 0x11f   : > { %947 = vmatpush.bf16.msra.mxu0 %v897_v23 }
 0x121   : > { %v861_v12 = vpop.permute.xlu2 %860  ;;  %v873_v24 = vpop.permute.xlu1 %872 }
 0x122   : > { %v1969_v25 = vpop.permute.xlu0 %832  ;;  %v906_v26 = vsel %vm878_vm4, %v871_v14, %v873_v24  ;;  %v907_v27 = vsel %vm878_vm4, %v873_v24, %v1963_v15  ;;  %v1238_v14 = vld [vmem:[%s2280_s8] sm:$0xff] }
 0x123   : > { %971 = vmatpush.bf16.msra.mxu1 %v906_v26  ;;  %1009 = vmatpush.bf16.msra.mxu3 %v907_v27  ;;  %v891_v37 = vsel %vm878_vm4, %v831_v10, %v1969_v25  ;;  %v1241_v26 = vld [vmem:[%s2280_s8 + $0x18] sm:$0xff]  ;;  %v1120_v27 = vld [vmem:[%s2278_s6 + $0x8] sm:$0xff] }
 0x124   : > { %1244 = vperm.xlu1 %1685, %v1238_v14   ;;  %1130 = vperm.xlu0 %1687, %v1120_v27  }
 0x127   : > { %972 = vmatpush.bf16.msra.mxu1 %v903_v30  ;;  %1010 = vmatpush.bf16.msra.mxu3 %v904_v31 }
 0x129   : > { %v851_v33 = vpop.permute.xlu2 %850  ;;  %v841_v34 = vpop.permute.xlu1 %840 }
 0x12a   : > { %v1985_v35 = vpop.permute.xlu0 %824  ;;  %v894_v36 = vsel %vm878_vm4, %v839_v16, %v841_v34  ;;  %1579 = vmatmul.msk.bf16.vlgmr.msra.gmra.mxu1 %vm939_vm5, %v1983_v32  ;;  %1581 = vmatmul.msk.bf16.vlgmr.msra.gmra.mxu3 %vm939_vm5, %v1983_v32  ;;  %v898_v46 = vsel %vm878_vm4, %v849_v20, %v851_v33  ;;  %v1573_v16 = vld [vmem:[%s2275_s3 + $0x10] sm:$0xf] }
 0x12b   : > { %948 = vmatpush.bf16.msra.mxu0 %v894_v36  ;;  %v888_v41 = vsel %vm878_vm4, %v823_v21, %v1985_v35  ;;  %v1574_v18 = vor.u32 %v1626_v17, %v1573_v16 }
 0x12c   : > { %1259 = vperm.xlu1 %1685, %v1241_v26  }
 0x12f   : > { %949 = vmatpush.bf16.msra.mxu0 %v891_v37 }
 0x131   : > { %v1994_v38 = vpop.permute.xlu2 %808  ;;  %v859_v39 = vpop.permute.xlu1 %858 }
 0x132   : > { %v815_v40 = vpop.permute.xlu0 %814  ;;  %v901_v42 = vsel %vm878_vm4, %v857_v11, %v859_v39  ;;  %v902_v43 = vsel %vm878_vm4, %v859_v39, %v861_v12  ;;  %v1119_v39 = vld [vmem:[%s2278_s6] sm:$0xff] }
 0x133   : > { %950 = vmatpush.bf16.msra.mxu0 %v888_v41  ;;  %984 = vmatpush.bf16.msra.mxu2 %v901_v42 }
 0x134   : > { %1022 = vmatpush.bf16.msrb.mxu1 %v902_v43 }
 0x137   : > { %985 = vmatpush.bf16.msra.mxu2 %v898_v46 }
 0x139   : > { %v799_v48 = vpop.permute.xlu2 %798  ;;  %v817_v49 = vpop.permute.xlu1 %816 }
 0x13a   : > { %v853_v51 = vpop.permute.xlu0 %852  ;;  %v885_v52 = vsel %vm878_vm4, %v815_v40, %v817_v49  ;;  %1580 = vmatmul.msk.bf16.gmra.mxu1 %vm939_vm5, %v2007_v47  ;;  %1582 = vmatmul.msk.bf16.gmra.mxu3 %vm939_vm5, %v2007_v47  ;;  %v1239_v40 = vld [vmem:[%s2280_s8 + $0x8] sm:$0xff] }
 0x13b   : > { %951 = vmatpush.bf16.msra.mxu0 %v885_v52  ;;  %v899_v53 = vsel %vm878_vm4, %v851_v33, %v853_v51 }
 0x13c   : > { %1023 = vmatpush.bf16.msrb.mxu1 %v899_v53 }
 0x141   : > { %v837_v55 = vpop.permute.xlu2 %836  ;;  %v807_v56 = vpop.permute.xlu1 %806 }
 0x142   : > { %v843_v58 = vpop.permute.xlu0 %842  ;;  %v882_v59 = vsel %vm878_vm4, %v807_v56, %v1994_v38 }
 0x143   : > { %952 = vmatpush.bf16.msra.mxu0 %v882_v59  ;;  %v895_v60 = vsel %vm878_vm4, %v841_v34, %v843_v58  ;;  %v1121_v34 = vld [vmem:[%s2278_s6 + $0x10] sm:$0xff] }
 0x144   : > { %986 = vmatpush.bf16.msra.mxu2 %v895_v60 }
 0x149   : > { %v845_v63 = vpop.permute.xlu1 %844  ;;  %v819_v2 = vpop.permute.xlu2 %818 }
 0x14a   : > { %v801_v0 = vpop.permute.xlu0 %800  ;;  %v896_v1 = vsel %vm878_vm4, %v843_v58, %v845_v63  ;;  %v886_v21 = vsel %vm878_vm4, %v817_v49, %v819_v2  ;;  %v2107_v63 = vld [vmem:[%s1811_s19 + $0x24] sm:$0xff] }
 0x14b   : > { %v879_v3 = vsel %vm878_vm4, %v799_v48, %v801_v0  ;;  %1024 = vmatpush.bf16.msrb.mxu1 %v896_v1 }
 0x14c   : > { %953 = vmatpush.bf16.msra.mxu0 %v879_v3  ;;  %v1066_v3 = vunpack.c.l.bf16 %v2104_v62 }
 0x14f   : > { %954 = vmatmul.bf16.vlgmr.msra.gmra.mxu0 %v1566_v4 }
 0x151   : > { %v835_v6 = vpop.permute.xlu1 %834  ;;  %v811_v10 = vpop.permute.xlu2 %810 }
 0x152   : > { %v827_v7 = vpop.permute.xlu0 %826  ;;  %v892_v8 = vsel %vm878_vm4, %v1969_v25, %v835_v6  ;;  %v893_v9 = vsel %vm878_vm4, %v835_v6, %v837_v55  ;;  %v883_v23 = vsel %vm878_vm4, %v1994_v38, %v811_v10  ;;  %v759_v25 = vld [vmem:[%s2276_s4 + $0x18] sm:$0xff] }
 0x153   : > { %987 = vmatpush.bf16.msra.mxu2 %v892_v8  ;;  %1025 = vmatpush.bf16.msrb.mxu1 %v893_v9  ;;  %v889_v13 = vsel %vm878_vm4, %v1985_v35, %v827_v7  ;;  %v1240_v35 = vld [vmem:[%s2280_s8 + $0x10] sm:$0xff] }
 0x154   : > { %777 = vperm.xlu2 %1686, %v759_v25   ;;  %1254 = vperm.xlu0 %1687, %v1240_v35  }
 0x157   : > { %988 = vmatpush.bf16.msra.mxu2 %v889_v13  ;;  %v2118_v13 = vld [vmem:[%s1811_s19] sm:$0xff] }
 0x159   : > { %v829_v19 = vpop.permute.xlu1 %828  ;;  %v803_v12 = vpop.permute.xlu2 %802 }
 0x15a   : > { %v821_v20 = vpop.permute.xlu0 %820  ;;  %v890_v11 = vsel %vm878_vm4, %v827_v7, %v829_v19  ;;  %v880_v30 = vsel %vm878_vm4, %v801_v0, %v803_v12 }
 0x15b   : > { %989 = vmatpush.bf16.msra.mxu2 %v886_v21  ;;  %1026 = vmatpush.bf16.msrb.mxu1 %v890_v11  ;;  %v887_v24 = vsel %vm878_vm4, %v819_v2, %v821_v20  ;;  %v2109_v2 = vstv %s751_s29  ;;  %v1060_v11 = vunpack.c.l.bf16 %v2118_v13 }
 0x15c   : > { %1135 = vperm.xlu2 %1686, %v1121_v34  }
 0x15f   : > { %959 = vmatmul.bf16.gmra.mxu0 %v1574_v18  ;;  %990 = vmatpush.bf16.msra.mxu2 %v883_v23 }
 0x160   : > { %1027 = vmatpush.bf16.msrb.mxu1 %v887_v24 }
 0x161   : > { %v877_v28 = vpop.permute.xlu1 %876 }
 0x162   : > { %v813_v29 = vpop.permute.xlu0 %812  ;;  %v908_v31 = vsel %vm878_vm4, %v1963_v15, %v877_v28 }
 0x163   : > { %991 = vmatpush.bf16.msra.mxu2 %v880_v30  ;;  %1047 = vmatpush.bf16.msrb.mxu3 %v908_v31  ;;  %v884_v33 = vsel %vm878_vm4, %v811_v10, %v813_v29  ;;  %v1069_v10 = vunpack.c.l.bf16 %v2107_v63  ;;  %v2140_v29 = vld [vmem:[%s2277_s5] sm:$0xff]  ;;  %v2145_v30 = vld [vmem:[%s2277_s5 + $0x8] sm:$0xff] }
 0x164   : > { %1028 = vmatpush.bf16.msrb.mxu1 %v884_v33  ;;  %1125 = vperm.xlu2 %1686, %v1119_v39  }
 0x166   : > { %992 = vmatmul.bf16.vlgmr.msra.gmra.mxu2 %v1566_v4 }
 0x169   : > { %v869_v36 = vpop.permute.xlu1 %868 }
 0x16a   : > { %v805_v37 = vpop.permute.xlu0 %804  ;;  %v905_v15 = vsel %vm878_vm4, %v1965_v22, %v869_v36 }
 0x16b   : > { %v881_v38 = vsel %vm878_vm4, %v803_v12, %v805_v37  ;;  %1048 = vmatpush.bf16.msrb.mxu3 %v905_v15 }
 0x16c   : > { %1029 = vmatpush.bf16.msrb.mxu1 %v881_v38  ;;  %1249 = vperm.xlu2 %1686, %v1239_v40  }
 0x16e   : > { %1583 = vmatmul.msk.bf16.vlgmr.msrb.gmra.mxu3 %vm939_vm5, %v1983_v32 }
 0x16f   : > { %1030 = vmatmul.bf16.vlgmr.msrb.gmra.mxu1 %v1566_v4  ;;  %v2113_v4 = vld [vmem:[%s1811_s19 + $0xc] sm:$0xff] }
 0x170   : > { %v1063_v16 = vunpack.c.l.bf16 %v2113_v4 }
 0x171   : > { %v2091_v44 = vpop.permute.xlu1 %772 }
 0x172   : > { %v2096_v51 = vpop.permute.xlu0 %762 }
 0x176   : > { %997 = vmatmul.bf16.gmra.mxu2 %v1574_v18 }
 0x179   : > { %v2093_v48 = vpop.permute.xlu1 %767 }
 0x17e   : > { %1584 = vmatmul.msk.bf16.gmra.mxu3 %vm939_vm5, %v2007_v47 }
 0x17f   : > { %1035 = vmatmul.bf16.gmra.mxu1 %v1574_v18 }
 0x1a7   : > { %v974_v22 = vpop.f32.mrf.mxu1 }
 0x1ad   : > { %v2089_v41 = vpop.f32.mrf.mxu3 }
 0x1ae   : > { %v2100_v56 = vpop.permute.xlu2 %777 }
 0x1af   : > { %v976_v43 = vpop.f32.mrf.mxu1 }
 0x1b5   : > { %v1014_v45 = vpop.f32.mrf.mxu3 }
 0x1b7   : > { %v979_v46 = vpop.f32.mrf.mxu1 }
 0x1bd   : > { %v1017_v52 = vpop.f32.mrf.mxu3 }
 0x1bf   : > { %v981_v58 = vpop.f32.mrf.mxu1 }
 0x1c5   : > { %v1019_v9 = vpop.f32.mrf.mxu3 }
 0x1cc   : > { %v955_v42 = vpop.f32.mrf.mxu0 }
 0x1cd   : > { %v956_v53 = vadd.f32 %v955_v42, %v2096_v51 }
 0x1cf   : > { %v975_v59 = vadd.f32 %v974_v22, %v956_v53 }
 0x1d1   : > { %v1072_v5 = vmax.f32 %v975_v59, 0.0 }
 0x1d3   : > { %v1085_v18 = vmul.f32 %v2109_v2, %v1072_v5  ;;  %v1061_v5 = vunpack.c.h.bf16 %v2118_v13 }
 0x1d4   : > { %v957_v32 = vpop.f32.mrf.mxu0 }
 0x1d5   : > { %v958_v47 = vadd.f32 %v957_v32, %v2093_v48  ;;  %v2133_v26 = vadd.f32 %v1085_v18, %v1060_v11 }
 0x1d7   : > { %v977_v55 = vadd.f32 %v976_v43, %v958_v47 }
 0x1d9   : > { %v1075_v0 = vmax.f32 %v977_v55, 0.0 }
 0x1db   : > { %v1088_v17 = vmul.f32 %v2109_v2, %v1075_v0 }
 0x1dc   : > { %v960_v49 = vpop.f32.mrf.mxu0 }
 0x1dd   : > { %v961_v50 = vadd.f32 %v960_v49, %v2091_v44  ;;  %v2131_v12 = vadd.f32 %v1088_v17, %v1063_v16  ;;  %v592_v16 = vld [vmem:[%s1811_s19 + $0x8] sm:$0xf] }
 0x1df   : > { %v980_v54 = vadd.f32 %v979_v46, %v961_v50  ;;  %v1113_v27 = vpack.c.bf16 %v2131_v12, %v2133_v26 }
 0x1e1   : > { %v1078_v60 = vmax.f32 %v980_v54, 0.0 }
 0x1e3   : > { %v1091_v6 = vmul.f32 %v2109_v2, %v1078_v60  ;;  %v596_v60 = vld [vmem:[%s1811_s19 + $0x20] sm:$0xf] }
 0x1e4   : > { %v962_v57 = vpop.f32.mrf.mxu0 }
 0x1e5   : > { %v963_v61 = vadd.f32 %v962_v57, %v2100_v56  ;;  %v2123_v20 = vadd.f32 %v1091_v6, %v1066_v3 }
 0x1e7   : > { %v982_v1 = vadd.f32 %v981_v58, %v963_v61 }
 0x1e9   : > { %v1081_v7 = vmax.f32 %v982_v1, 0.0  ;;  %v993_v8 = vpop.f32.mrf.mxu2 }
 0x1ea   : > { %v994_v37 = vadd.f32 %v993_v8, %v2096_v51 }
 0x1eb   : > { %v1094_v14 = vmul.f32 %v2109_v2, %v1081_v7 }
 0x1ec   : > { %v1031_v19 = vpop.f32.mrf.mxu1  ;;  %v1013_v39 = vadd.f32 %v2089_v41, %v994_v37  ;;  %v1067_v41 = vunpack.c.h.bf16 %v2104_v62  ;;  %v598_v62 = vld [vmem:[%s1811_s19 + $0x2c] sm:$0xf] }
 0x1ed   : > { %v2125_v21 = vadd.f32 %v1094_v14, %v1069_v10  ;;  %v1032_v46 = vadd.f32 %v1031_v19, %v2096_v51  ;;  %v1064_v51 = vunpack.c.h.bf16 %v2113_v4  ;;  %v1068_v10 = vunpack.c.l.bf16 %v596_v60 }
 0x1ee   : > { %v1071_v14 = vunpack.c.l.bf16 %v598_v62 }
 0x1ef   : > { %v1116_v23 = vpack.c.bf16 %v2125_v21, %v2123_v20 }
 0x1f1   : > { %1165 = vmatpush.bf16.msrb.mxu0 %v1116_v23  ;;  %1631 = vmatpush.bf16.msra.mxu1 %v1116_v23  ;;  %v995_v24 = vpop.f32.mrf.mxu2  ;;  %v1050_v25 = vpop.f32.mrf.mxu3 }
 0x1f2   : > { %v996_v35 = vadd.f32 %v995_v24, %v2093_v48  ;;  %v1051_v58 = vadd.f32 %v1050_v25, %v1032_v46  ;;  %v1062_v25 = vunpack.c.l.bf16 %v592_v16 }
 0x1f4   : > { %v1033_v28 = vpop.f32.mrf.mxu1  ;;  %v1015_v38 = vadd.f32 %v1014_v45, %v996_v35  ;;  %v1074_v8 = vmax.f32 %v1051_v58, 0.0 }
 0x1f5   : > { %1166 = vmatpush.bf16.msrb.mxu0 %v1113_v27  ;;  %1632 = vmatpush.bf16.msra.mxu1 %v1113_v27  ;;  %v1034_v50 = vadd.f32 %v1033_v28, %v2093_v48 }
 0x1f6   : > { %v1076_v49 = vmax.f32 %v1015_v38, 0.0  ;;  %v1087_v27 = vmul.f32 %v2109_v2, %v1074_v8 }
 0x1f8   : > { %1593 = vmatmul.msk.bf16.vlgmr.msrb.gmra.mxu0 %vm939_vm5, %v2140_v29  ;;  %1594 = vmatmul.msk.bf16.vlgmr.msra.gmra.mxu1 %vm939_vm5, %v2145_v30  ;;  %v1089_v59 = vmul.f32 %v2109_v2, %v1076_v49 }
 0x1f9   : > { %v998_v31 = vpop.f32.mrf.mxu2  ;;  %v1052_v33 = vpop.f32.mrf.mxu3 }
 0x1fa   : > { %v999_v34 = vadd.f32 %v998_v31, %v2091_v44  ;;  %v1053_v55 = vadd.f32 %v1052_v33, %v1034_v50  ;;  %v2179_v11 = vadd.f32 %v1089_v59, %v1064_v51 }
 0x1fc   : > { %v1036_v36 = vpop.f32.mrf.mxu1  ;;  %v1018_v15 = vadd.f32 %v1017_v52, %v999_v34  ;;  %v1073_v52 = vmax.f32 %v1013_v39, 0.0 }
 0x1fd   : > { %v1037_v43 = vadd.f32 %v1036_v36, %v2091_v44  ;;  %v1070_v44 = vunpack.c.h.bf16 %v2107_v63  ;;  %v1077_v63 = vmax.f32 %v1053_v55, 0.0  ;;  %v2196_v36 = vadd.f32 %v1087_v27, %v1062_v25  ;;  %v1630_v55 = vld [vmem:[%s2279_s7 + $0x8] sm:$0xff] }
 0x1fe   : > { %v1079_v42 = vmax.f32 %v1018_v15, 0.0  ;;  %v1086_v1 = vmul.f32 %v2109_v2, %v1073_v52  ;;  %v1136_v15 = vpop.permute.xlu2 %1135 }
 0x1ff   : > { %v1090_v18 = vmul.f32 %v2109_v2, %v1077_v63 }
 0x200   : > { %v1092_v54 = vmul.f32 %v2109_v2, %v1079_v42  ;;  %v2183_v24 = vadd.f32 %v1086_v1, %v1061_v5 }
 0x201   : > { %v1000_v40 = vpop.f32.mrf.mxu2  ;;  %v1055_v22 = vpop.f32.mrf.mxu3 }
 0x202   : > { %v1001_v32 = vadd.f32 %v1000_v40, %v2100_v56  ;;  %v1056_v53 = vadd.f32 %v1055_v22, %v1037_v43  ;;  %v2170_v7 = vadd.f32 %v1092_v54, %v1067_v41  ;;  %v1114_v33 = vpack.c.bf16 %v2179_v11, %v2183_v24  ;;  %v1141_v40 = vpop.permute.xlu1 %1140  ;;  %v1131_v22 = vpop.permute.xlu0 %1130 }
 0x204   : > { %v1020_v47 = vadd.f32 %v1019_v9, %v1001_v32  ;;  %v1038_v45 = vpop.f32.mrf.mxu1  ;;  %v1080_v61 = vmax.f32 %v1056_v53, 0.0  ;;  %v594_v9 = vld [vmem:[%s1811_s19 + $0x14] sm:$0xf] }
 0x205   : > { %v1039_v0 = vadd.f32 %v1038_v45, %v2100_v56  ;;  %v1065_v13 = vunpack.c.l.bf16 %v594_v9 }
 0x206   : > { %v1082_v57 = vmax.f32 %v1020_v47, 0.0  ;;  %v1093_v17 = vmul.f32 %v2109_v2, %v1080_v61  ;;  %v1126_v50 = vpop.permute.xlu2 %1125 }
 0x207   : > { %v2192_v34 = vadd.f32 %v1090_v18, %v1065_v13 }
 0x208   : > { %v1095_v48 = vmul.f32 %v2109_v2, %v1082_v57  ;;  %v2186_v28 = vadd.f32 %v1093_v17, %v1068_v10 }
 0x209   : > { %v1057_v3 = vpop.f32.mrf.mxu3  ;;  %v1115_v37 = vpack.c.bf16 %v2192_v34, %v2196_v36 }
 0x20a   : > { %v1058_v6 = vadd.f32 %v1057_v3, %v1039_v0  ;;  %v2172_v4 = vadd.f32 %v1095_v48, %v1070_v44 }
 0x20c   : > { %v1083_v56 = vmax.f32 %v1058_v6, 0.0  ;;  %v1117_v19 = vpack.c.bf16 %v2172_v4, %v2170_v7 }
 0x20e   : > { %v1096_v23 = vmul.f32 %v2109_v2, %v1083_v56  ;;  %1184 = vmatpush.bf16.msrb.mxu2 %v1117_v19  ;;  %1633 = vmatpush.bf16.msra.mxu3 %v1117_v19 }
 0x210   : > { %v2188_v31 = vadd.f32 %v1096_v23, %v1071_v14 }
 0x212   : > { %v1118_v35 = vpack.c.bf16 %v2188_v31, %v2186_v28  ;;  %1185 = vmatpush.bf16.msrb.mxu2 %v1114_v33  ;;  %1634 = vmatpush.bf16.msra.mxu3 %v1114_v33 }
 0x214   : > { %1203 = vmatpush.bf16.msrb.mxu1 %v1118_v35  ;;  %v1245_v35 = vpop.permute.xlu1 %1244 }
 0x215   : > { %1595 = vmatmul.msk.bf16.vlgmr.msrb.gmra.mxu2 %vm939_vm5, %v2140_v29  ;;  %1596 = vmatmul.msk.bf16.vlgmr.msra.gmra.mxu3 %vm939_vm5, %v2145_v30 }
 0x218   : > { %1204 = vmatpush.bf16.msrb.mxu1 %v1115_v37 }
 0x21b   : > { %1597 = vmatmul.msk.bf16.vlgmr.msrb.gmra.mxu1 %vm939_vm5, %v2140_v29 }
 0x22b   : > { %1598 = vmatmul.msk.bf16.gmra.mxu1 %vm939_vm5, %v2145_v30  ;;  %v1629_v30 = vld [vmem:[%s2279_s7] sm:$0xff] }
 0x275   : > { %v1168_v38 = vpop.f32.mrf.mxu0  ;;  %v1173_v39 = vpop.f32.mrf.mxu1 }
 0x276   : > { %v1174_v42 = vadd.f32 %v1173_v39, %v1136_v15  ;;  %v1169_v47 = vadd.f32 %v1168_v38, %v1126_v50 }
 0x278   : > { %v1222_v53 = vmax.f32 %v1174_v42, 0.0  ;;  %v1216_v29 = vmax.f32 %v1169_v47, 0.0  ;;  %v1250_v42 = vpop.permute.xlu2 %1249 }
 0x27d   : > { %v1170_v43 = vpop.f32.mrf.mxu0  ;;  %v1175_v32 = vpop.f32.mrf.mxu1 }
 0x27e   : > { %v1171_v46 = vadd.f32 %v1170_v43, %v1131_v22  ;;  %v1176_v49 = vadd.f32 %v1175_v32, %v1141_v40 }
 0x280   : > { %v1225_v52 = vmax.f32 %v1176_v49, 0.0  ;;  %v1219_v45 = vmax.f32 %v1171_v46, 0.0 }
 0x282   : > { %v1235_v41 = vpack.c.bf16 %v1225_v52, %v1222_v53  ;;  %v1232_v54 = vpack.c.bf16 %v1219_v45, %v1216_v29  ;;  %v1255_v45 = vpop.permute.xlu0 %1254 }
 0x284   : > { %1284 = vmatpush.bf16.msrb.mxu3 %v1235_v41 }
 0x288   : > { %1285 = vmatpush.bf16.msrb.mxu3 %v1232_v54 }
 0x28b   : > { %1607 = vmatmul.msk.bf16.vlgmr.msrb.gmra.mxu3 %vm939_vm5, %v1629_v30 }
 0x298   : > { %v1187_v57 = vpop.f32.mrf.mxu2  ;;  %v1192_v44 = vpop.f32.mrf.mxu3 }
 0x299   : > { %v1206_v58 = vpop.f32.mrf.mxu1  ;;  %v1193_v51 = vadd.f32 %v1192_v44, %v1136_v15  ;;  %v1188_v62 = vadd.f32 %v1187_v57, %v1126_v50 }
 0x29a   : > { %v1207_v56 = vadd.f32 %v1206_v58, %v1126_v50 }
 0x29b   : > { %1608 = vmatmul.msk.bf16.gmra.mxu3 %vm939_vm5, %v1630_v55  ;;  %v1223_v1 = vmax.f32 %v1193_v51, 0.0  ;;  %v1217_v6 = vmax.f32 %v1188_v62, 0.0 }
 0x29c   : > { %v1218_v25 = vmax.f32 %v1207_v56, 0.0 }
 0x2a0   : > { %v1189_v59 = vpop.f32.mrf.mxu2  ;;  %v1194_v48 = vpop.f32.mrf.mxu3 }
 0x2a1   : > { %v1190_v60 = vadd.f32 %v1189_v59, %v1131_v22  ;;  %v1195_v61 = vadd.f32 %v1194_v48, %v1141_v40  ;;  %v1208_v0 = vpop.f32.mrf.mxu1  ;;  %v1260_v48 = vpop.permute.xlu1 %1259 }
 0x2a2   : > { %v1209_v16 = vadd.f32 %v1208_v0, %v1131_v22 }
 0x2a3   : > { %v1226_v3 = vmax.f32 %v1195_v61, 0.0  ;;  %v1220_v5 = vmax.f32 %v1190_v60, 0.0 }
 0x2a4   : > { %v1221_v18 = vmax.f32 %v1209_v16, 0.0 }
 0x2a5   : > { %v1236_v63 = vpack.c.bf16 %v1226_v3, %v1223_v1  ;;  %v1233_v8 = vpack.c.bf16 %v1220_v5, %v1217_v6 }
 0x2a6   : > { %v1234_v27 = vpack.c.bf16 %v1221_v18, %v1218_v25 }
 0x2a7   : > { %1303 = vmatpush.bf16.msra.mxu0 %v1236_v63 }
 0x2a9   : > { %v1211_v9 = vpop.f32.mrf.mxu1 }
 0x2aa   : > { %v1212_v10 = vadd.f32 %v1211_v9, %v1136_v15 }
 0x2ab   : > { %1304 = vmatpush.bf16.msra.mxu0 %v1233_v8 }
 0x2ac   : > { %v1224_v19 = vmax.f32 %v1212_v10, 0.0 }
 0x2ae   : > { %1609 = vmatmul.msk.bf16.vlgmr.msra.gmra.mxu0 %vm939_vm5, %v1629_v30 }
 0x2b1   : > { %v1213_v14 = vpop.f32.mrf.mxu1 }
 0x2b2   : > { %v1214_v17 = vadd.f32 %v1213_v14, %v1141_v40 }
 0x2b4   : > { %v1227_v13 = vmax.f32 %v1214_v17, 0.0 }
 0x2b6   : > { %v1237_v23 = vpack.c.bf16 %v1227_v13, %v1224_v19 }
 0x2b8   : > { %1322 = vmatpush.bf16.msra.mxu2 %v1237_v23 }
 0x2bc   : > { %1323 = vmatpush.bf16.msra.mxu2 %v1234_v27 }
 0x2be   : > { %1610 = vmatmul.msk.bf16.gmra.mxu0 %vm939_vm5, %v1630_v55 }
 0x2bf   : > { %1611 = vmatmul.msk.bf16.vlgmr.msra.gmra.mxu2 %vm939_vm5, %v1629_v30  ;;  %v1360_v30 = vlaneseq }
 0x2c1   : > { %v1361_v59 = vand.u32 127, %v1360_v30 }
 0x2c3   : > { %v1363_v62 = vadd.s32 256, %v1361_v59 }
 0x2c5   : > { %vm1370_vm6 = vcmp.lt.s32.totalorder %v1363_v62, 272 }
 0x2cf   : > { %1612 = vmatmul.msk.bf16.gmra.mxu2 %vm939_vm5, %v1630_v55 }
 0x30e   : > { %v1287_v33 = vpop.f32.mrf.mxu3 }
 0x30f   : > { %v1288_v37 = vadd.f32 %v1287_v33, %v1245_v35 }
 0x311   : > { %v1335_v39 = vmul.f32 %v1288_v37, %v2109_v2 }
 0x313   : > { %v1347_v43 = vadd.f32 %v1335_v39, %v2133_v26 }
 0x316   : > { %v1289_v15 = vpop.f32.mrf.mxu3 }
 0x317   : > { %v1290_v32 = vadd.f32 %v1289_v15, %v1250_v42 }
 0x319   : > { %v1338_v53 = vmul.f32 %v1290_v32, %v2109_v2 }
 0x31e   : > { %v1292_v50 = vpop.f32.mrf.mxu3 }
 0x31f   : > { %v1293_v41 = vadd.f32 %v1292_v50, %v1255_v45 }
 0x321   : > { %v1341_v57 = vmul.f32 %v1293_v41, %v2109_v2 }
 0x323   : > { %v1353_v60 = vadd.f32 %v1341_v57, %v2123_v20 }
 0x326   : > { %v1294_v58 = vpop.f32.mrf.mxu3 }
 0x327   : > { %v1295_v61 = vadd.f32 %v1294_v58, %v1260_v48 }
 0x329   : > { %v1344_v5 = vmul.f32 %v1295_v61, %v2109_v2 }
 0x32b   : > { %v1306_v38 = vpop.f32.mrf.mxu0 }
 0x32c   : > { %v1307_v40 = vadd.f32 %v1306_v38, %v1245_v35 }
 0x32e   : > { %v1336_v22 = vmul.f32 %v1307_v40, %v2109_v2 }
 0x330   : > { %v1348_v46 = vadd.f32 %v1336_v22, %v2183_v24  ;;  %v1350_v24 = vadd.f32 %v1338_v53, %v2131_v12 }
 0x332   : > { %v1383_v49 = vpack.c.bf16 %v1348_v46, %v1347_v43 }
 0x333   : > { %v1308_v47 = vpop.f32.mrf.mxu0 }
 0x334   : > { %1391 = vst [vmem:[%s2229_s24] sm:$0xff] %v1383_v49  ;;  %v1309_v52 = vadd.f32 %v1308_v47, %v1250_v42 }
 0x336   : > { %v1339_v26 = vmul.f32 %v1309_v52, %v2109_v2 }
 0x338   : > { %v1351_v29 = vadd.f32 %v1339_v26, %v2179_v11 }
 0x33a   : > { %v1385_v54 = vpack.c.bf16 %v1351_v29, %v1350_v24 }
 0x33b   : > { %v1311_v55 = vpop.f32.mrf.mxu0 }
 0x33c   : > { %1393 = vst [vmem:[%s2229_s24 + $0xc] sm:$0xff] %v1385_v54  ;;  %v1312_v44 = vadd.f32 %v1311_v55, %v1255_v45 }
 0x33e   : > { %v1342_v51 = vmul.f32 %v1312_v44, %v2109_v2 }
 0x340   : > { %v1354_v12 = vadd.f32 %v1342_v51, %v2170_v7  ;;  %v1356_v7 = vadd.f32 %v1344_v5, %v2125_v21 }
 0x342   : > { %v1387_v0 = vpack.c.bf16 %v1354_v12, %v1353_v60  ;;  %v1325_v11 = vpop.f32.mrf.mxu2 }
 0x343   : > { %v1326_v1 = vadd.f32 %v1325_v11, %v1245_v35  ;;  %v1313_v3 = vpop.f32.mrf.mxu0 }
 0x344   : > { %1395 = vst [vmem:[%s2229_s24 + $0x18] sm:$0xff] %v1387_v0  ;;  %v1314_v63 = vadd.f32 %v1313_v3, %v1260_v48 }
 0x345   : > { %v1337_v6 = vmul.f32 %v1326_v1, %v2109_v2 }
 0x346   : > { %v1345_v8 = vmul.f32 %v1314_v63, %v2109_v2 }
 0x347   : > { %v1349_v20 = vadd.f32 %v1337_v6, %v2196_v36 }
 0x348   : > { %v1357_v9 = vadd.f32 %v1345_v8, %v2172_v4 }
 0x349   : > { %v1373_v10 = vsel %vm1370_vm6, %v1349_v20, 0.0 }
 0x34a   : > { %v1384_v14 = vpack.c.bf16 %v1373_v10, %v1373_v10  ;;  %v1389_v16 = vpack.c.bf16 %v1357_v9, %v1356_v7  ;;  %v1327_v17 = vpop.f32.mrf.mxu2 }
 0x34b   : > { %v1328_v56 = vadd.f32 %v1327_v17, %v1250_v42 }
 0x34c   : > { %1392 = vst [vmem:[%s2229_s24 + $0x8] sm:$0xf] %v1384_v14 }
 0x34d   : > { %1397 = vst [vmem:[%s2229_s24 + $0x24] sm:$0xff] %v1389_v16  ;;  %v1340_v19 = vmul.f32 %v1328_v56, %v2109_v2 }
 0x34f   : > { %v1352_v13 = vadd.f32 %v1340_v19, %v2192_v34 }
 0x351   : > { %v1376_v36 = vsel %vm1370_vm6, %v1352_v13, 0.0 }
 0x352   : > { %v1386_v18 = vpack.c.bf16 %v1376_v36, %v1376_v36  ;;  %v1330_v21 = vpop.f32.mrf.mxu2 }
 0x353   : > { %v1331_v23 = vadd.f32 %v1330_v21, %v1255_v45 }
 0x354   : > { %1394 = vst [vmem:[%s2229_s24 + $0x14] sm:$0xf] %v1386_v18 }
 0x355   : > { %v1343_v4 = vmul.f32 %v1331_v23, %v2109_v2 }
 0x357   : > { %v1355_v25 = vadd.f32 %v1343_v4, %v2186_v28 }
 0x359   : > { %v1379_v27 = vsel %vm1370_vm6, %v1355_v25, 0.0 }
 0x35a   : > { %v1388_v33 = vpack.c.bf16 %v1379_v27, %v1379_v27  ;;  %v1332_v35 = vpop.f32.mrf.mxu2 }
 0x35b   : > { %v1333_v37 = vadd.f32 %v1332_v35, %v1260_v48 }
 0x35c   : > { %1396 = vst [vmem:[%s2229_s24 + $0x20] sm:$0xf] %v1388_v33 }
 0x35d   : > { %v1346_v15 = vmul.f32 %v1333_v37, %v2109_v2 }
 0x35f   : > { %v1358_v34 = vadd.f32 %v1346_v15, %v2188_v31 }
 0x361   : > { %v1382_v38 = vsel %vm1370_vm6, %v1358_v34, 0.0 }
 0x362   : > { %v1390_v39 = vpack.c.bf16 %v1382_v38, %v1382_v38 }
 0x364   : > { %1398 = vst [vmem:[%s2229_s24 + $0x2c] sm:$0xf] %v1390_v39 }
 0x365 PF: > { %s21_s15 = sadd.s32 1, %s1718_s15   ;;  %s2283_s13 = smov %s1714_s14 }
 0x366   : > { %p18_p6 = scmp.ge.s32.totalorder %s21_s15, 4   ;;  %s2284_s14 = smov %s2286_s16 }
 0x368   :  { %20 = sbr.rel (!%p18_p6) target bundleno = 2 (0x2), region = 188 }

</bundles_post_ra>
